<compile_context>
chip_gen: v7x
topology: tpu7x:2x2x1
jax: 0.10.0
libtpu: 0.0.40
codegen_flags: <defaults>
</compile_context>

<pallas_src>
import functools

import jax
import jax.numpy as jnp
from jax import lax
from jax.experimental import pallas as pl
from jax.experimental.pallas import tpu as pltpu


_NEG_INF = -1e9


def _round_up(x, m):
  return ((x + m - 1) // m) * m


def _sigmoid(x):
  # 0.5*(tanh(0.5x)+1) == sigmoid(x): one EUP transcendental instead of two.
  return 0.5 * jnp.tanh(0.5 * x) + 0.5


# ----------------------------------------------------------------------------
# Pallas kernel: bidirectional LSTM + linear tag projection + masked CE mean
# ----------------------------------------------------------------------------
def _bilstm_tag_loss_kernel(
    x_ref,        # (T*Bp, Ep)    f32  word embeddings, time-major, flattened
    seqm_ref,     # (T, Bp, 1)    f32  1.0 where t < length[b]
    wm_ref,       # (T*Bp, 1)     f32  loss mask (batch_word_mask), flattened
    tags_ref,     # (T*Bp, 1)     i32  gold tag indices, flattened
    wih_ref,      # (Ep, 8*Hp)    bf16 [W_ih_fwd | W_ih_bwd]  (gate-block padded)
    whh_f_ref,    # (Hp, 4*Hp)    bf16 forward  recurrent weights
    whh_b_ref,    # (Hp, 4*Hp)    bf16 backward recurrent weights
    bias_ref,     # (1, 8*Hp)     f32  [b_fwd | b_bwd]   (b_ih + b_hh)
    wtagf_ref,    # (Hp, NTp)     bf16 lstm2tag weight, forward half
    wtagb_ref,    # (Hp, NTp)     bf16 lstm2tag weight, backward half
    btag_ref,     # (1, NTp)      f32  lstm2tag bias (padded cols = -1e9)
    loss_ref,     # (1, 1)        f32  output: mean masked cross-entropy
    gin_scratch,  # (T, Bp, 8*Hp) f32  hoisted input-gate pre-activations
    hf_scratch,   # (T, Bp, Hp)   f32  forward-direction hidden states
    hb_scratch,   # (T, Bp, Hp)   f32  backward-direction hidden states
    *, inv_count,
):
  T, Bp, _ = seqm_ref.shape
  Hp = whh_f_ref.shape[0]
  G = 4 * Hp
  NTp = wtagf_ref.shape[1]

  # ---- hoisted input projection: one big lane-dense bf16 MXU matmul --------
  gin = jnp.dot(x_ref[...].astype(jnp.bfloat16), wih_ref[...],
                preferred_element_type=jnp.float32)         # f32 accumulation
  gin = gin + bias_ref[...]                                  # biases fused once
  gin_scratch[...] = gin.reshape(T, Bp, 2 * G)
  # TODO(synk): on v7x at production T/B, store gin/hf/hb scratches in bf16 and
  # stream over a T grid axis ("arbitrary") to fit the 64 MiB VMEM budget.

  def lstm_step(g_in, h, c, whh_ref):
    # bf16 cast only at the dot call site; carried h/c and gate math stay f32.
    g = g_in + jnp.dot(h.astype(jnp.bfloat16), whh_ref[...],
                       preferred_element_type=jnp.float32)
    i_g = _sigmoid(g[:, 0:Hp])            # each gate slab is full vregs
    f_g = _sigmoid(g[:, Hp:2 * Hp])
    g_g = jnp.tanh(g[:, 2 * Hp:3 * Hp])
    o_g = _sigmoid(g[:, 3 * Hp:4 * Hp])
    c_new = f_g * c + i_g * g_g
    h_new = o_g * jnp.tanh(c_new)
    return h_new, c_new

  zeros_bh = jnp.zeros((Bp, Hp), jnp.float32)

  # ---- fused forward + backward recurrence (two independent chains) --------
  def step_body(t, carry):
    hf, cf, hb, cb = carry
    tb = T - 1 - t
    mf = seqm_ref[t]                                         # (Bp, 1)
    mb = seqm_ref[tb]
    hf_new, cf_new = lstm_step(gin_scratch[t, :, 0:G], hf, cf, whh_f_ref)
    hb_new, cb_new = lstm_step(gin_scratch[tb, :, G:2 * G], hb, cb, whh_b_ref)
    hf = mf * hf_new + (1.0 - mf) * hf
    cf = mf * cf_new + (1.0 - mf) * cf
    hb = mb * hb_new + (1.0 - mb) * hb
    cb = mb * cb_new + (1.0 - mb) * cb
    hf_scratch[t] = hf * mf     # padded positions -> 0 (like pad_packed_sequence)
    hb_scratch[tb] = hb * mb
    return hf, cf, hb, cb

  # Full unroll for small T (LLO visibility); partial unroll once T grows so
  # per-step temporaries + carries don't spill the 64-entry vreg file.
  unroll = True if T <= 16 else 8
  lax.fori_loop(0, T, step_body,
                (zeros_bh, zeros_bh, zeros_bh, zeros_bh), unroll=unroll)

  # ---- hoisted tag projection + masked cross entropy (one batched pass) ----
  hf_all = hf_scratch[...].reshape(T * Bp, Hp)
  hb_all = hb_scratch[...].reshape(T * Bp, Hp)
  logits = (jnp.dot(hf_all.astype(jnp.bfloat16), wtagf_ref[...],
                    preferred_element_type=jnp.float32)
            + jnp.dot(hb_all.astype(jnp.bfloat16), wtagb_ref[...],
                      preferred_element_type=jnp.float32)
            + btag_ref[...])                                 # (T*Bp, NTp)

  # cross entropy (reduction='none'): lse(logits) - logits[target]
  mx = jnp.max(logits, axis=-1, keepdims=True)
  lse = jnp.log(jnp.sum(jnp.exp(logits - mx), axis=-1, keepdims=True)) + mx
  onehot = (lax.broadcasted_iota(jnp.int32, (T * Bp, NTp), 1)
            == tags_ref[...]).astype(jnp.float32)            # single iota build
  tgt = jnp.sum(onehot * logits, axis=-1, keepdims=True)     # (T*Bp, 1)
  ce = (lse - tgt) * wm_ref[...]                             # (T*Bp, 1)

  # CrossEntropyLoss(reduction='none') * mask, then .mean() over all B*T tokens
  loss_ref[...] = jnp.sum(ce, axis=0, keepdims=True) * inv_count


# ----------------------------------------------------------------------------
# Wrapper (embedding gather + (8,128)-aligned padding is plain-JAX glue)
# ----------------------------------------------------------------------------
def _pad_gate_blocks(w, h, h_pad, lead_pad):
  """(K, 4h) -> (lead_pad, 4*h_pad), zero-padding each gate block separately."""
  w = w.astype(jnp.float32)
  k = w.shape[0]
  w4 = w.reshape(k, 4, h)
  w4 = jnp.pad(w4, ((0, lead_pad - k), (0, 0), (0, h_pad - h)))
  return w4.reshape(lead_pad, 4 * h_pad)


def _vmem_limit_bytes(T, Bp, Ep, Hp, NTp):
  """Derive the scoped-VMEM limit from the actual footprint (+2x headroom)."""
  f32, bf16, lane = 4, 2, 128
  ins = (T * Bp * Ep * f32              # x2d
         + 3 * T * Bp * lane * f32      # seqm / wm / tags (lane-padded)
         + Ep * 8 * Hp * bf16           # wih
         + 2 * Hp * 4 * Hp * bf16       # whh fwd/bwd
         + 8 * 8 * Hp * f32             # bias (sublane-padded)
         + 2 * Hp * NTp * bf16          # wtag fwd/bwd
         + 8 * NTp * f32)               # btag
  scr = T * Bp * 8 * Hp * f32 + 2 * T * Bp * Hp * f32
  total = ins + scr + 8 * lane * f32
  return int(min(64 * 2**20, max(8 * 2**20, 2 * total)))


def sequence_labeling_loss(word_ids, lengths, word_mask, tags, params):
  """Scalar training loss (masked mean cross-entropy)."""
  emb = params["word_emb"][word_ids].astype(jnp.float32)    # (B, T, E) gather (glue)
  B, T, E = emb.shape
  H = params["whh_f"].shape[0]
  ntags = params["wtag"].shape[1]

  # (8, 128)-aligned padded sizes
  Bp = _round_up(max(B, 8), 8)
  Ep = _round_up(E, 128)
  Hp = _round_up(H, 128)
  NTp = _round_up(ntags, 128)

  # ---- lane/sublane-dense, time-major inputs -------------------------------
  x = jnp.transpose(emb, (1, 0, 2))                         # (T, B, E)
  x = jnp.pad(x, ((0, 0), (0, Bp - B), (0, Ep - E)))        # (T, Bp, Ep)
  x2d = x.reshape(T * Bp, Ep)                               # lane-dense slab

  lens_p = jnp.pad(lengths.astype(jnp.int32), (0, Bp - B))  # padded rows: len 0
  seq_mask = (jnp.arange(T)[:, None] < lens_p[None, :]).astype(jnp.float32)[..., None]
  wm = jnp.pad(jnp.transpose(word_mask.astype(jnp.float32), (1, 0)),
               ((0, 0), (0, Bp - B))).reshape(T * Bp, 1)    # (T*Bp, 1)
  tg = jnp.pad(jnp.transpose(tags.astype(jnp.int32), (1, 0)),
               ((0, 0), (0, Bp - B))).reshape(T * Bp, 1)    # (T*Bp, 1)

  # ---- gate-block padded weights (bf16 MXU operands) ------------------------
  wih_f = _pad_gate_blocks(params["wih_f"], H, Hp, Ep)
  wih_b = _pad_gate_blocks(params["wih_b"], H, Hp, Ep)
  wih_cat = jnp.concatenate([wih_f, wih_b], axis=1).astype(jnp.bfloat16)  # (Ep, 8Hp)
  whh_f = _pad_gate_blocks(params["whh_f"], H, Hp, Hp).astype(jnp.bfloat16)
  whh_b = _pad_gate_blocks(params["whh_b"], H, Hp, Hp).astype(jnp.bfloat16)
  b_f = _pad_gate_blocks(params["b_f"], H, Hp, 1)
  b_b = _pad_gate_blocks(params["b_b"], H, Hp, 1)
  bias_cat = jnp.concatenate([b_f, b_b], axis=1)            # (1, 8Hp) f32

  wtag = params["wtag"].astype(jnp.float32)
  wtag_f = jnp.pad(wtag[:H], ((0, Hp - H), (0, NTp - ntags))).astype(jnp.bfloat16)
  wtag_b = jnp.pad(wtag[H:], ((0, Hp - H), (0, NTp - ntags))).astype(jnp.bfloat16)
  # padded tag columns get a large-negative bias so they vanish from the lse
  btag = jnp.full((1, NTp), _NEG_INF, jnp.float32)
  btag = btag.at[:, :ntags].set(params["btag"].astype(jnp.float32))

  vmem = pl.BlockSpec(memory_space=pltpu.MemorySpace.VMEM)
  kernel = functools.partial(_bilstm_tag_loss_kernel,
                             inv_count=1.0 / float(T * B))

  # TODO(synk): for real batch sizes add a leading grid axis over Bp//8 tiles
  # with dimension_semantics=("parallel",) and per-tile partial-loss outputs
  # (reduced in the wrapper) so v7x's second TensorCore is used; at Bp=8 the
  # single grid-less call is already a single sublane tile.
  loss = pl.pallas_call(
      kernel,
      out_shape=jax.ShapeDtypeStruct((1, 1), jnp.float32),
      in_specs=[vmem] * 11,
      out_specs=vmem,
      scratch_shapes=[
          pltpu.VMEM((T, Bp, 8 * Hp), jnp.float32),   # hoisted gate pre-activations
          pltpu.VMEM((T, Bp, Hp), jnp.float32),       # forward hidden states
          pltpu.VMEM((T, Bp, Hp), jnp.float32),       # backward hidden states
      ],
      compiler_params=pltpu.CompilerParams(
          vmem_limit_bytes=_vmem_limit_bytes(T, Bp, Ep, Hp, NTp)),
  )(x2d, seq_mask, wm, tg,
    wih_cat, whh_f, whh_b, bias_cat,
    wtag_f, wtag_b, btag)
  return loss[0, 0]


# ----------------------------------------------------------------------------
# Pure-JAX reference (same semantics as the PyTorch module) for validation
# ----------------------------------------------------------------------------
def reference_loss(word_ids, lengths, word_mask, tags, params):
  emb = params["word_emb"][word_ids].astype(jnp.float32)    # (B, T, E)
  B, T, E = emb.shape
  H = params["whh_f"].shape[0]
  seqm = (jnp.arange(T)[None, :] < lengths[:, None]).astype(jnp.float32)  # (B, T)

  def run_dir(wih, whh, b, reverse):
    h = jnp.zeros((B, H), jnp.float32)
    c = jnp.zeros((B, H), jnp.float32)
    outs = [None] * T
    order = range(T - 1, -1, -1) if reverse else range(T)
    for t in order:
      m = seqm[:, t:t + 1]
      g = emb[:, t, :] @ wih + h @ whh + b
      i_g = jax.nn.sigmoid(g[:, :H])
      f_g = jax.nn.sigmoid(g[:, H:2 * H])
      g_g = jnp.tanh(g[:, 2 * H:3 * H])
      o_g = jax.nn.sigmoid(g[:, 3 * H:])
      c_new = f_g * c + i_g * g_g
      h_new = o_g * jnp.tanh(c_new)
      h = m * h_new + (1.0 - m) * h
      c = m * c_new + (1.0 - m) * c
      outs[t] = h * m
    return jnp.stack(outs, axis=1)                          # (B, T, H)

  hf = run_dir(params["wih_f"], params["whh_f"], params["b_f"], False)
  hb = run_dir(params["wih_b"], params["whh_b"], params["b_b"], True)
  hcat = jnp.concatenate([hf, hb], axis=-1)                 # (B, T, 2H)
  logits = hcat @ params["wtag"] + params["btag"]           # (B, T, ntags)
  lse = jax.nn.logsumexp(logits, axis=-1)
  tgt = jnp.take_along_axis(logits, tags[..., None], axis=-1)[..., 0]
  ce = (lse - tgt) * word_mask.astype(jnp.float32)
  return jnp.mean(ce)


# ----------------------------------------------------------------------------
if __name__ == "__main__":
  # small synthetic config
  B, T = 2, 8
  nwords = 50
  E = 32        # word_embedding_dim
  H = 32        # hidden_dim
  ntags = 5

  key = jax.random.PRNGKey(0)
  ks = jax.random.split(key, 12)

  def u(k, shape, scale=0.1):
    return jax.random.uniform(k, shape, jnp.float32, -scale, scale)

  params = {
      "word_emb": u(ks[0], (nwords, E), 0.5),
      "wih_f": u(ks[1], (E, 4 * H)),
      "whh_f": u(ks[2], (H, 4 * H)),
      "b_f":   u(ks[3], (1, 4 * H)),
      "wih_b": u(ks[4], (E, 4 * H)),
      "whh_b": u(ks[5], (H, 4 * H)),
      "b_b":   u(ks[6], (1, 4 * H)),
      "wtag":  u(ks[7], (2 * H, ntags)),
      "btag":  u(ks[8], (1, ntags)),
  }

  word_ids = jax.random.randint(ks[9], (B, T), 0, nwords, jnp.int32)
  tags = jax.random.randint(ks[10], (B, T), 0, ntags, jnp.int32)
  lengths = jnp.array([T, 5], dtype=jnp.int32)
  word_mask = (jnp.arange(T)[None, :] < lengths[:, None]).astype(jnp.float32)

  # TODO(synk): char-embedding branch (get_char_sequence / char LSTM) and
  # new_LSTMCell are external helpers not defined in the module; this kernel
  # implements the config.use_char_embedding=False / standard-LSTM path.

  loss = sequence_labeling_loss(word_ids, lengths, word_mask, tags, params)
  jax.block_until_ready(loss)

  ref = reference_loss(word_ids, lengths, word_mask, tags, params)
  # bf16 MXU operands (f32 accumulation) -> relaxed tolerance vs f32 reference.
  assert jnp.allclose(loss, ref, rtol=2e-2, atol=1e-2), (loss, ref)

  print("KERNEL_OK")
</pallas_src>

<mosaic_0001>
module attributes {stable_mosaic.version = 11 : i64} {
  func.func @_bilstm_tag_loss_kernel(%arg0: memref<64x128xf32, #tpu.memory_space<vmem>>, %arg1: memref<8x8x1xf32, #tpu.memory_space<vmem>>, %arg2: memref<64x1xf32, #tpu.memory_space<vmem>>, %arg3: memref<64x1xi32, #tpu.memory_space<vmem>>, %arg4: memref<128x1024xbf16, #tpu.memory_space<vmem>>, %arg5: memref<128x512xbf16, #tpu.memory_space<vmem>>, %arg6: memref<128x512xbf16, #tpu.memory_space<vmem>>, %arg7: memref<1x1024xf32, #tpu.memory_space<vmem>>, %arg8: memref<128x128xbf16, #tpu.memory_space<vmem>>, %arg9: memref<128x128xbf16, #tpu.memory_space<vmem>>, %arg10: memref<1x128xf32, #tpu.memory_space<vmem>>, %arg11: memref<1x1xf32, #tpu.memory_space<vmem>>, %arg12: memref<8x8x1024xf32, #tpu.memory_space<vmem>>, %arg13: memref<8x8x128xf32, #tpu.memory_space<vmem>>, %arg14: memref<8x8x128xf32, #tpu.memory_space<vmem>>) attributes {dimension_semantics = [], scalar_prefetch = 0 : i64, scratch_operands = 3 : i64, tpu.core_type = #tpu.core_type<tc>} {
    %c0 = arith.constant 0 : index
    %c0_0 = arith.constant 0 : index
    %0 = vector.load %arg0[%c0, %c0_0] : memref<64x128xf32, #tpu.memory_space<vmem>>, vector<64x128xf32>
    %1 = arith.truncf %0 : vector<64x128xf32> to vector<64x128xbf16>
    %c0_1 = arith.constant 0 : index
    %c0_2 = arith.constant 0 : index
    %2 = vector.load %arg4[%c0_1, %c0_2] : memref<128x1024xbf16, #tpu.memory_space<vmem>>, vector<128x1024xbf16>
    %cst = arith.constant dense<0.000000e+00> : vector<64x1024xf32>
    %3 = tpu.matmul %1, %2, %cst {dimension_numbers = #tpu.dot_dimension_numbers<[1], [0], [0], [1], [0, 0, 1, 1], [], []>} : vector<64x128xbf16>, vector<128x1024xbf16>, vector<64x1024xf32> -> vector<64x1024xf32>
    %c0_3 = arith.constant 0 : index
    %c0_4 = arith.constant 0 : index
    %4 = vector.load %arg7[%c0_3, %c0_4] : memref<1x1024xf32, #tpu.memory_space<vmem>>, vector<1x1024xf32>
    %5 = vector.broadcast %4 : vector<1x1024xf32> to vector<64x1024xf32>
    %6 = arith.addf %3, %5 : vector<64x1024xf32>
    %7 = vector.shape_cast %6 : vector<64x1024xf32> to vector<8x8x1024xf32>
    %c0_5 = arith.constant 0 : index
    %c0_6 = arith.constant 0 : index
    %c0_7 = arith.constant 0 : index
    %8 = vector.load %arg12[%c0_5, %c0_6, %c0_7] : memref<8x8x1024xf32, #tpu.memory_space<vmem>>, vector<8x8x1024xf32>
    tpu.vector_store %arg12[%c0_5, %c0_6, %c0_7], %7 {strides = array<i32>} : memref<8x8x1024xf32, #tpu.memory_space<vmem>>, vector<8x8x1024xf32>,
    %cst_8 = arith.constant 0.000000e+00 : f32
    %9 = vector.broadcast %cst_8 : f32 to vector<8x128xf32>
    %c0_i32 = arith.constant 0 : i32
    %c7_i32 = arith.constant 7 : i32
    %10 = arith.subi %c7_i32, %c0_i32 : i32
    %11 = arith.index_cast %c0_i32 : i32 to index
    %c0_9 = arith.constant 0 : index
    %c0_10 = arith.constant 0 : index
    %12 = vector.load %arg1[%11, %c0_9, %c0_10] : memref<8x8x1xf32, #tpu.memory_space<vmem>>, vector<1x8x1xf32>
    %13 = vector.shape_cast %12 : vector<1x8x1xf32> to vector<8x1xf32>
    %14 = arith.index_cast %10 : i32 to index
    %c0_11 = arith.constant 0 : index
    %c0_12 = arith.constant 0 : index
    %15 = vector.load %arg1[%14, %c0_11, %c0_12] : memref<8x8x1xf32, #tpu.memory_space<vmem>>, vector<1x8x1xf32>
    %16 = vector.shape_cast %15 : vector<1x8x1xf32> to vector<8x1xf32>
    %17 = arith.index_cast %c0_i32 : i32 to index
    %c0_13 = arith.constant 0 : index
    %c0_14 = arith.constant 0 : index
    %18 = vector.load %arg12[%17, %c0_13, %c0_14] : memref<8x8x1024xf32, #tpu.memory_space<vmem>>, vector<1x8x512xf32>
    %19 = vector.shape_cast %18 : vector<1x8x512xf32> to vector<8x512xf32>
    %20 = arith.truncf %9 : vector<8x128xf32> to vector<8x128xbf16>
    %c0_15 = arith.constant 0 : index
    %c0_16 = arith.constant 0 : index
    %21 = vector.load %arg5[%c0_15, %c0_16] : memref<128x512xbf16, #tpu.memory_space<vmem>>, vector<128x512xbf16>
    %cst_17 = arith.constant dense<0.000000e+00> : vector<8x512xf32>
    %22 = tpu.matmul %20, %21, %cst_17 {dimension_numbers = #tpu.dot_dimension_numbers<[1], [0], [0], [1], [0, 0, 1, 1], [], []>} : vector<8x128xbf16>, vector<128x512xbf16>, vector<8x512xf32> -> vector<8x512xf32>
    %23 = arith.addf %19, %22 : vector<8x512xf32>
    %24 = vector.extract_strided_slice %23 {offsets = [0, 0], sizes = [8, 128], strides = [1, 1]} : vector<8x512xf32> to vector<8x128xf32>
    %cst_18 = arith.constant 5.000000e-01 : f32
    %25 = vector.broadcast %cst_18 : f32 to vector<8x128xf32>
    %26 = arith.mulf %25, %24 : vector<8x128xf32>
    %27 = math.tanh %26 : vector<8x128xf32>
    %cst_19 = arith.constant 5.000000e-01 : f32
    %28 = vector.broadcast %cst_19 : f32 to vector<8x128xf32>
    %29 = arith.mulf %28, %27 : vector<8x128xf32>
    %cst_20 = arith.constant 5.000000e-01 : f32
    %30 = vector.broadcast %cst_20 : f32 to vector<8x128xf32>
    %31 = arith.addf %29, %30 : vector<8x128xf32>
    %32 = vector.extract_strided_slice %23 {offsets = [0, 128], sizes = [8, 128], strides = [1, 1]} : vector<8x512xf32> to vector<8x128xf32>
    %cst_21 = arith.constant 5.000000e-01 : f32
    %33 = vector.broadcast %cst_21 : f32 to vector<8x128xf32>
    %34 = arith.mulf %33, %32 : vector<8x128xf32>
    %35 = math.tanh %34 : vector<8x128xf32>
    %cst_22 = arith.constant 5.000000e-01 : f32
    %36 = vector.broadcast %cst_22 : f32 to vector<8x128xf32>
    %37 = arith.mulf %36, %35 : vector<8x128xf32>
    %cst_23 = arith.constant 5.000000e-01 : f32
    %38 = vector.broadcast %cst_23 : f32 to vector<8x128xf32>
    %39 = arith.addf %37, %38 : vector<8x128xf32>
    %40 = vector.extract_strided_slice %23 {offsets = [0, 256], sizes = [8, 128], strides = [1, 1]} : vector<8x512xf32> to vector<8x128xf32>
    %41 = math.tanh %40 : vector<8x128xf32>
    %42 = vector.extract_strided_slice %23 {offsets = [0, 384], sizes = [8, 128], strides = [1, 1]} : vector<8x512xf32> to vector<8x128xf32>
    %cst_24 = arith.constant 5.000000e-01 : f32
    %43 = vector.broadcast %cst_24 : f32 to vector<8x128xf32>
    %44 = arith.mulf %43, %42 : vector<8x128xf32>
    %45 = math.tanh %44 : vector<8x128xf32>
    %cst_25 = arith.constant 5.000000e-01 : f32
    %46 = vector.broadcast %cst_25 : f32 to vector<8x128xf32>
    %47 = arith.mulf %46, %45 : vector<8x128xf32>
    %cst_26 = arith.constant 5.000000e-01 : f32
    %48 = vector.broadcast %cst_26 : f32 to vector<8x128xf32>
    %49 = arith.addf %47, %48 : vector<8x128xf32>
    %50 = arith.mulf %39, %9 : vector<8x128xf32>
    %51 = arith.mulf %31, %41 : vector<8x128xf32>
    %52 = arith.addf %50, %51 : vector<8x128xf32>
    %53 = math.tanh %52 : vector<8x128xf32>
    %54 = arith.mulf %49, %53 : vector<8x128xf32>
    %55 = arith.index_cast %10 : i32 to index
    %c0_27 = arith.constant 0 : index
    %c512 = arith.constant 512 : index
    %56 = vector.load %arg12[%55, %c0_27, %c512] : memref<8x8x1024xf32, #tpu.memory_space<vmem>>, vector<1x8x512xf32>
    %57 = vector.shape_cast %56 : vector<1x8x512xf32> to vector<8x512xf32>
    %58 = arith.truncf %9 : vector<8x128xf32> to vector<8x128xbf16>
    %c0_28 = arith.constant 0 : index
    %c0_29 = arith.constant 0 : index
    %59 = vector.load %arg6[%c0_28, %c0_29] : memref<128x512xbf16, #tpu.memory_space<vmem>>, vector<128x512xbf16>
    %cst_30 = arith.constant dense<0.000000e+00> : vector<8x512xf32>
    %60 = tpu.matmul %58, %59, %cst_30 {dimension_numbers = #tpu.dot_dimension_numbers<[1], [0], [0], [1], [0, 0, 1, 1], [], []>} : vector<8x128xbf16>, vector<128x512xbf16>, vector<8x512xf32> -> vector<8x512xf32>
    %61 = arith.addf %57, %60 : vector<8x512xf32>
    %62 = vector.extract_strided_slice %61 {offsets = [0, 0], sizes = [8, 128], strides = [1, 1]} : vector<8x512xf32> to vector<8x128xf32>
    %cst_31 = arith.constant 5.000000e-01 : f32
    %63 = vector.broadcast %cst_31 : f32 to vector<8x128xf32>
    %64 = arith.mulf %63, %62 : vector<8x128xf32>
    %65 = math.tanh %64 : vector<8x128xf32>
    %cst_32 = arith.constant 5.000000e-01 : f32
    %66 = vector.broadcast %cst_32 : f32 to vector<8x128xf32>
    %67 = arith.mulf %66, %65 : vector<8x128xf32>
    %cst_33 = arith.constant 5.000000e-01 : f32
    %68 = vector.broadcast %cst_33 : f32 to vector<8x128xf32>
    %69 = arith.addf %67, %68 : vector<8x128xf32>
    %70 = vector.extract_strided_slice %61 {offsets = [0, 128], sizes = [8, 128], strides = [1, 1]} : vector<8x512xf32> to vector<8x128xf32>
    %cst_34 = arith.constant 5.000000e-01 : f32
    %71 = vector.broadcast %cst_34 : f32 to vector<8x128xf32>
    %72 = arith.mulf %71, %70 : vector<8x128xf32>
    %73 = math.tanh %72 : vector<8x128xf32>
    %cst_35 = arith.constant 5.000000e-01 : f32
    %74 = vector.broadcast %cst_35 : f32 to vector<8x128xf32>
    %75 = arith.mulf %74, %73 : vector<8x128xf32>
    %cst_36 = arith.constant 5.000000e-01 : f32
    %76 = vector.broadcast %cst_36 : f32 to vector<8x128xf32>
    %77 = arith.addf %75, %76 : vector<8x128xf32>
    %78 = vector.extract_strided_slice %61 {offsets = [0, 256], sizes = [8, 128], strides = [1, 1]} : vector<8x512xf32> to vector<8x128xf32>
    %79 = math.tanh %78 : vector<8x128xf32>
    %80 = vector.extract_strided_slice %61 {offsets = [0, 384], sizes = [8, 128], strides = [1, 1]} : vector<8x512xf32> to vector<8x128xf32>
    %cst_37 = arith.constant 5.000000e-01 : f32
    %81 = vector.broadcast %cst_37 : f32 to vector<8x128xf32>
    %82 = arith.mulf %81, %80 : vector<8x128xf32>
    %83 = math.tanh %82 : vector<8x128xf32>
    %cst_38 = arith.constant 5.000000e-01 : f32
    %84 = vector.broadcast %cst_38 : f32 to vector<8x128xf32>
    %85 = arith.mulf %84, %83 : vector<8x128xf32>
    %cst_39 = arith.constant 5.000000e-01 : f32
    %86 = vector.broadcast %cst_39 : f32 to vector<8x128xf32>
    %87 = arith.addf %85, %86 : vector<8x128xf32>
    %88 = arith.mulf %77, %9 : vector<8x128xf32>
    %89 = arith.mulf %69, %79 : vector<8x128xf32>
    %90 = arith.addf %88, %89 : vector<8x128xf32>
    %91 = math.tanh %90 : vector<8x128xf32>
    %92 = arith.mulf %87, %91 : vector<8x128xf32>
    %93 = vector.broadcast %13 : vector<8x1xf32> to vector<8x128xf32>
    %94 = arith.mulf %93, %54 : vector<8x128xf32>
    %cst_40 = arith.constant 1.000000e+00 : f32
    %95 = vector.broadcast %cst_40 : f32 to vector<8x1xf32>
    %96 = arith.subf %95, %13 : vector<8x1xf32>
    %97 = vector.broadcast %96 : vector<8x1xf32> to vector<8x128xf32>
    %98 = arith.mulf %97, %9 : vector<8x128xf32>
    %99 = arith.addf %94, %98 : vector<8x128xf32>
    %100 = vector.broadcast %13 : vector<8x1xf32> to vector<8x128xf32>
    %101 = arith.mulf %100, %52 : vector<8x128xf32>
    %cst_41 = arith.constant 1.000000e+00 : f32
    %102 = vector.broadcast %cst_41 : f32 to vector<8x1xf32>
    %103 = arith.subf %102, %13 : vector<8x1xf32>
    %104 = vector.broadcast %103 : vector<8x1xf32> to vector<8x128xf32>
    %105 = arith.mulf %104, %9 : vector<8x128xf32>
    %106 = arith.addf %101, %105 : vector<8x128xf32>
    %107 = vector.broadcast %16 : vector<8x1xf32> to vector<8x128xf32>
    %108 = arith.mulf %107, %92 : vector<8x128xf32>
    %cst_42 = arith.constant 1.000000e+00 : f32
    %109 = vector.broadcast %cst_42 : f32 to vector<8x1xf32>
    %110 = arith.subf %109, %16 : vector<8x1xf32>
    %111 = vector.broadcast %110 : vector<8x1xf32> to vector<8x128xf32>
    %112 = arith.mulf %111, %9 : vector<8x128xf32>
    %113 = arith.addf %108, %112 : vector<8x128xf32>
    %114 = vector.broadcast %16 : vector<8x1xf32> to vector<8x128xf32>
    %115 = arith.mulf %114, %90 : vector<8x128xf32>
    %cst_43 = arith.constant 1.000000e+00 : f32
    %116 = vector.broadcast %cst_43 : f32 to vector<8x1xf32>
    %117 = arith.subf %116, %16 : vector<8x1xf32>
    %118 = vector.broadcast %117 : vector<8x1xf32> to vector<8x128xf32>
    %119 = arith.mulf %118, %9 : vector<8x128xf32>
    %120 = arith.addf %115, %119 : vector<8x128xf32>
    %121 = vector.broadcast %13 : vector<8x1xf32> to vector<8x128xf32>
    %122 = arith.mulf %99, %121 : vector<8x128xf32>
    %123 = arith.index_cast %c0_i32 : i32 to index
    %c0_44 = arith.constant 0 : index
    %c0_45 = arith.constant 0 : index
    %124 = vector.load %arg13[%123, %c0_44, %c0_45] : memref<8x8x128xf32, #tpu.memory_space<vmem>>, vector<1x8x128xf32>
    %125 = vector.shape_cast %124 : vector<1x8x128xf32> to vector<8x128xf32>
    %126 = vector.shape_cast %122 : vector<8x128xf32> to vector<1x8x128xf32>
    tpu.vector_store %arg13[%123, %c0_44, %c0_45], %126 {strides = array<i32>} : memref<8x8x128xf32, #tpu.memory_space<vmem>>, vector<1x8x128xf32>,
    %127 = vector.broadcast %16 : vector<8x1xf32> to vector<8x128xf32>
    %128 = arith.mulf %113, %127 : vector<8x128xf32>
    %129 = arith.index_cast %10 : i32 to index
    %c0_46 = arith.constant 0 : index
    %c0_47 = arith.constant 0 : index
    %130 = vector.load %arg14[%129, %c0_46, %c0_47] : memref<8x8x128xf32, #tpu.memory_space<vmem>>, vector<1x8x128xf32>
    %131 = vector.shape_cast %130 : vector<1x8x128xf32> to vector<8x128xf32>
    %132 = vector.shape_cast %128 : vector<8x128xf32> to vector<1x8x128xf32>
    tpu.vector_store %arg14[%129, %c0_46, %c0_47], %132 {strides = array<i32>} : memref<8x8x128xf32, #tpu.memory_space<vmem>>, vector<1x8x128xf32>,
    %c1_i32 = arith.constant 1 : i32
    %c7_i32_48 = arith.constant 7 : i32
    %133 = arith.subi %c7_i32_48, %c1_i32 : i32
    %134 = arith.index_cast %c1_i32 : i32 to index
    %c0_49 = arith.constant 0 : index
    %c0_50 = arith.constant 0 : index
    %135 = vector.load %arg1[%134, %c0_49, %c0_50] : memref<8x8x1xf32, #tpu.memory_space<vmem>>, vector<1x8x1xf32>
    %136 = vector.shape_cast %135 : vector<1x8x1xf32> to vector<8x1xf32>
    %137 = arith.index_cast %133 : i32 to index
    %c0_51 = arith.constant 0 : index
    %c0_52 = arith.constant 0 : index
    %138 = vector.load %arg1[%137, %c0_51, %c0_52] : memref<8x8x1xf32, #tpu.memory_space<vmem>>, vector<1x8x1xf32>
    %139 = vector.shape_cast %138 : vector<1x8x1xf32> to vector<8x1xf32>
    %140 = arith.index_cast %c1_i32 : i32 to index
    %c0_53 = arith.constant 0 : index
    %c0_54 = arith.constant 0 : index
    %141 = vector.load %arg12[%140, %c0_53, %c0_54] : memref<8x8x1024xf32, #tpu.memory_space<vmem>>, vector<1x8x512xf32>
    %142 = vector.shape_cast %141 : vector<1x8x512xf32> to vector<8x512xf32>
    %143 = arith.truncf %99 : vector<8x128xf32> to vector<8x128xbf16>
    %c0_55 = arith.constant 0 : index
    %c0_56 = arith.constant 0 : index
    %144 = vector.load %arg5[%c0_55, %c0_56] : memref<128x512xbf16, #tpu.memory_space<vmem>>, vector<128x512xbf16>
    %cst_57 = arith.constant dense<0.000000e+00> : vector<8x512xf32>
    %145 = tpu.matmul %143, %144, %cst_57 {dimension_numbers = #tpu.dot_dimension_numbers<[1], [0], [0], [1], [0, 0, 1, 1], [], []>} : vector<8x128xbf16>, vector<128x512xbf16>, vector<8x512xf32> -> vector<8x512xf32>
    %146 = arith.addf %142, %145 : vector<8x512xf32>
    %147 = vector.extract_strided_slice %146 {offsets = [0, 0], sizes = [8, 128], strides = [1, 1]} : vector<8x512xf32> to vector<8x128xf32>
    %cst_58 = arith.constant 5.000000e-01 : f32
    %148 = vector.broadcast %cst_58 : f32 to vector<8x128xf32>
    %149 = arith.mulf %148, %147 : vector<8x128xf32>
    %150 = math.tanh %149 : vector<8x128xf32>
    %cst_59 = arith.constant 5.000000e-01 : f32
    %151 = vector.broadcast %cst_59 : f32 to vector<8x128xf32>
    %152 = arith.mulf %151, %150 : vector<8x128xf32>
    %cst_60 = arith.constant 5.000000e-01 : f32
    %153 = vector.broadcast %cst_60 : f32 to vector<8x128xf32>
    %154 = arith.addf %152, %153 : vector<8x128xf32>
    %155 = vector.extract_strided_slice %146 {offsets = [0, 128], sizes = [8, 128], strides = [1, 1]} : vector<8x512xf32> to vector<8x128xf32>
    %cst_61 = arith.constant 5.000000e-01 : f32
    %156 = vector.broadcast %cst_61 : f32 to vector<8x128xf32>
    %157 = arith.mulf %156, %155 : vector<8x128xf32>
    %158 = math.tanh %157 : vector<8x128xf32>
    %cst_62 = arith.constant 5.000000e-01 : f32
    %159 = vector.broadcast %cst_62 : f32 to vector<8x128xf32>
    %160 = arith.mulf %159, %158 : vector<8x128xf32>
    %cst_63 = arith.constant 5.000000e-01 : f32
    %161 = vector.broadcast %cst_63 : f32 to vector<8x128xf32>
    %162 = arith.addf %160, %161 : vector<8x128xf32>
    %163 = vector.extract_strided_slice %146 {offsets = [0, 256], sizes = [8, 128], strides = [1, 1]} : vector<8x512xf32> to vector<8x128xf32>
    %164 = math.tanh %163 : vector<8x128xf32>
    %165 = vector.extract_strided_slice %146 {offsets = [0, 384], sizes = [8, 128], strides = [1, 1]} : vector<8x512xf32> to vector<8x128xf32>
    %cst_64 = arith.constant 5.000000e-01 : f32
    %166 = vector.broadcast %cst_64 : f32 to vector<8x128xf32>
    %167 = arith.mulf %166, %165 : vector<8x128xf32>
    %168 = math.tanh %167 : vector<8x128xf32>
    %cst_65 = arith.constant 5.000000e-01 : f32
    %169 = vector.broadcast %cst_65 : f32 to vector<8x128xf32>
    %170 = arith.mulf %169, %168 : vector<8x128xf32>
    %cst_66 = arith.constant 5.000000e-01 : f32
    %171 = vector.broadcast %cst_66 : f32 to vector<8x128xf32>
    %172 = arith.addf %170, %171 : vector<8x128xf32>
    %173 = arith.mulf %162, %106 : vector<8x128xf32>
    %174 = arith.mulf %154, %164 : vector<8x128xf32>
    %175 = arith.addf %173, %174 : vector<8x128xf32>
    %176 = math.tanh %175 : vector<8x128xf32>
    %177 = arith.mulf %172, %176 : vector<8x128xf32>
    %178 = arith.index_cast %133 : i32 to index
    %c0_67 = arith.constant 0 : index
    %c512_68 = arith.constant 512 : index
    %179 = vector.load %arg12[%178, %c0_67, %c512_68] : memref<8x8x1024xf32, #tpu.memory_space<vmem>>, vector<1x8x512xf32>
    %180 = vector.shape_cast %179 : vector<1x8x512xf32> to vector<8x512xf32>
    %181 = arith.truncf %113 : vector<8x128xf32> to vector<8x128xbf16>
    %c0_69 = arith.constant 0 : index
    %c0_70 = arith.constant 0 : index
    %182 = vector.load %arg6[%c0_69, %c0_70] : memref<128x512xbf16, #tpu.memory_space<vmem>>, vector<128x512xbf16>
    %cst_71 = arith.constant dense<0.000000e+00> : vector<8x512xf32>
    %183 = tpu.matmul %181, %182, %cst_71 {dimension_numbers = #tpu.dot_dimension_numbers<[1], [0], [0], [1], [0, 0, 1, 1], [], []>} : vector<8x128xbf16>, vector<128x512xbf16>, vector<8x512xf32> -> vector<8x512xf32>
    %184 = arith.addf %180, %183 : vector<8x512xf32>
    %185 = vector.extract_strided_slice %184 {offsets = [0, 0], sizes = [8, 128], strides = [1, 1]} : vector<8x512xf32> to vector<8x128xf32>
    %cst_72 = arith.constant 5.000000e-01 : f32
    %186 = vector.broadcast %cst_72 : f32 to vector<8x128xf32>
    %187 = arith.mulf %186, %185 : vector<8x128xf32>
    %188 = math.tanh %187 : vector<8x128xf32>
    %cst_73 = arith.constant 5.000000e-01 : f32
    %189 = vector.broadcast %cst_73 : f32 to vector<8x128xf32>
    %190 = arith.mulf %189, %188 : vector<8x128xf32>
    %cst_74 = arith.constant 5.000000e-01 : f32
    %191 = vector.broadcast %cst_74 : f32 to vector<8x128xf32>
    %192 = arith.addf %190, %191 : vector<8x128xf32>
    %193 = vector.extract_strided_slice %184 {offsets = [0, 128], sizes = [8, 128], strides = [1, 1]} : vector<8x512xf32> to vector<8x128xf32>
    %cst_75 = arith.constant 5.000000e-01 : f32
    %194 = vector.broadcast %cst_75 : f32 to vector<8x128xf32>
    %195 = arith.mulf %194, %193 : vector<8x128xf32>
    %196 = math.tanh %195 : vector<8x128xf32>
    %cst_76 = arith.constant 5.000000e-01 : f32
    %197 = vector.broadcast %cst_76 : f32 to vector<8x128xf32>
    %198 = arith.mulf %197, %196 : vector<8x128xf32>
    %cst_77 = arith.constant 5.000000e-01 : f32
    %199 = vector.broadcast %cst_77 : f32 to vector<8x128xf32>
    %200 = arith.addf %198, %199 : vector<8x128xf32>
    %201 = vector.extract_strided_slice %184 {offsets = [0, 256], sizes = [8, 128], strides = [1, 1]} : vector<8x512xf32> to vector<8x128xf32>
    %202 = math.tanh %201 : vector<8x128xf32>
    %203 = vector.extract_strided_slice %184 {offsets = [0, 384], sizes = [8, 128], strides = [1, 1]} : vector<8x512xf32> to vector<8x128xf32>
    %cst_78 = arith.constant 5.000000e-01 : f32
    %204 = vector.broadcast %cst_78 : f32 to vector<8x128xf32>
    %205 = arith.mulf %204, %203 : vector<8x128xf32>
    %206 = math.tanh %205 : vector<8x128xf32>
    %cst_79 = arith.constant 5.000000e-01 : f32
    %207 = vector.broadcast %cst_79 : f32 to vector<8x128xf32>
    %208 = arith.mulf %207, %206 : vector<8x128xf32>
    %cst_80 = arith.constant 5.000000e-01 : f32
    %209 = vector.broadcast %cst_80 : f32 to vector<8x128xf32>
    %210 = arith.addf %208, %209 : vector<8x128xf32>
    %211 = arith.mulf %200, %120 : vector<8x128xf32>
    %212 = arith.mulf %192, %202 : vector<8x128xf32>
    %213 = arith.addf %211, %212 : vector<8x128xf32>
    %214 = math.tanh %213 : vector<8x128xf32>
    %215 = arith.mulf %210, %214 : vector<8x128xf32>
    %216 = vector.broadcast %136 : vector<8x1xf32> to vector<8x128xf32>
    %217 = arith.mulf %216, %177 : vector<8x128xf32>
    %cst_81 = arith.constant 1.000000e+00 : f32
    %218 = vector.broadcast %cst_81 : f32 to vector<8x1xf32>
    %219 = arith.subf %218, %136 : vector<8x1xf32>
    %220 = vector.broadcast %219 : vector<8x1xf32> to vector<8x128xf32>
    %221 = arith.mulf %220, %99 : vector<8x128xf32>
    %222 = arith.addf %217, %221 : vector<8x128xf32>
    %223 = vector.broadcast %136 : vector<8x1xf32> to vector<8x128xf32>
    %224 = arith.mulf %223, %175 : vector<8x128xf32>
    %cst_82 = arith.constant 1.000000e+00 : f32
    %225 = vector.broadcast %cst_82 : f32 to vector<8x1xf32>
    %226 = arith.subf %225, %136 : vector<8x1xf32>
    %227 = vector.broadcast %226 : vector<8x1xf32> to vector<8x128xf32>
    %228 = arith.mulf %227, %106 : vector<8x128xf32>
    %229 = arith.addf %224, %228 : vector<8x128xf32>
    %230 = vector.broadcast %139 : vector<8x1xf32> to vector<8x128xf32>
    %231 = arith.mulf %230, %215 : vector<8x128xf32>
    %cst_83 = arith.constant 1.000000e+00 : f32
    %232 = vector.broadcast %cst_83 : f32 to vector<8x1xf32>
    %233 = arith.subf %232, %139 : vector<8x1xf32>
    %234 = vector.broadcast %233 : vector<8x1xf32> to vector<8x128xf32>
    %235 = arith.mulf %234, %113 : vector<8x128xf32>
    %236 = arith.addf %231, %235 : vector<8x128xf32>
    %237 = vector.broadcast %139 : vector<8x1xf32> to vector<8x128xf32>
    %238 = arith.mulf %237, %213 : vector<8x128xf32>
    %cst_84 = arith.constant 1.000000e+00 : f32
    %239 = vector.broadcast %cst_84 : f32 to vector<8x1xf32>
    %240 = arith.subf %239, %139 : vector<8x1xf32>
    %241 = vector.broadcast %240 : vector<8x1xf32> to vector<8x128xf32>
    %242 = arith.mulf %241, %120 : vector<8x128xf32>
    %243 = arith.addf %238, %242 : vector<8x128xf32>
    %244 = vector.broadcast %136 : vector<8x1xf32> to vector<8x128xf32>
    %245 = arith.mulf %222, %244 : vector<8x128xf32>
    %246 = arith.index_cast %c1_i32 : i32 to index
    %c0_85 = arith.constant 0 : index
    %c0_86 = arith.constant 0 : index
    %247 = vector.load %arg13[%246, %c0_85, %c0_86] : memref<8x8x128xf32, #tpu.memory_space<vmem>>, vector<1x8x128xf32>
    %248 = vector.shape_cast %247 : vector<1x8x128xf32> to vector<8x128xf32>
    %249 = vector.shape_cast %245 : vector<8x128xf32> to vector<1x8x128xf32>
    tpu.vector_store %arg13[%246, %c0_85, %c0_86], %249 {strides = array<i32>} : memref<8x8x128xf32, #tpu.memory_space<vmem>>, vector<1x8x128xf32>,
    %250 = vector.broadcast %139 : vector<8x1xf32> to vector<8x128xf32>
    %251 = arith.mulf %236, %250 : vector<8x128xf32>
    %252 = arith.index_cast %133 : i32 to index
    %c0_87 = arith.constant 0 : index
    %c0_88 = arith.constant 0 : index
    %253 = vector.load %arg14[%252, %c0_87, %c0_88] : memref<8x8x128xf32, #tpu.memory_space<vmem>>, vector<1x8x128xf32>
    %254 = vector.shape_cast %253 : vector<1x8x128xf32> to vector<8x128xf32>
    %255 = vector.shape_cast %251 : vector<8x128xf32> to vector<1x8x128xf32>
    tpu.vector_store %arg14[%252, %c0_87, %c0_88], %255 {strides = array<i32>} : memref<8x8x128xf32, #tpu.memory_space<vmem>>, vector<1x8x128xf32>,
    %c2_i32 = arith.constant 2 : i32
    %c7_i32_89 = arith.constant 7 : i32
    %256 = arith.subi %c7_i32_89, %c2_i32 : i32
    %257 = arith.index_cast %c2_i32 : i32 to index
    %c0_90 = arith.constant 0 : index
    %c0_91 = arith.constant 0 : index
    %258 = vector.load %arg1[%257, %c0_90, %c0_91] : memref<8x8x1xf32, #tpu.memory_space<vmem>>, vector<1x8x1xf32>
    %259 = vector.shape_cast %258 : vector<1x8x1xf32> to vector<8x1xf32>
    %260 = arith.index_cast %256 : i32 to index
    %c0_92 = arith.constant 0 : index
    %c0_93 = arith.constant 0 : index
    %261 = vector.load %arg1[%260, %c0_92, %c0_93] : memref<8x8x1xf32, #tpu.memory_space<vmem>>, vector<1x8x1xf32>
    %262 = vector.shape_cast %261 : vector<1x8x1xf32> to vector<8x1xf32>
    %263 = arith.index_cast %c2_i32 : i32 to index
    %c0_94 = arith.constant 0 : index
    %c0_95 = arith.constant 0 : index
    %264 = vector.load %arg12[%263, %c0_94, %c0_95] : memref<8x8x1024xf32, #tpu.memory_space<vmem>>, vector<1x8x512xf32>
    %265 = vector.shape_cast %264 : vector<1x8x512xf32> to vector<8x512xf32>
    %266 = arith.truncf %222 : vector<8x128xf32> to vector<8x128xbf16>
    %c0_96 = arith.constant 0 : index
    %c0_97 = arith.constant 0 : index
    %267 = vector.load %arg5[%c0_96, %c0_97] : memref<128x512xbf16, #tpu.memory_space<vmem>>, vector<128x512xbf16>
    %cst_98 = arith.constant dense<0.000000e+00> : vector<8x512xf32>
    %268 = tpu.matmul %266, %267, %cst_98 {dimension_numbers = #tpu.dot_dimension_numbers<[1], [0], [0], [1], [0, 0, 1, 1], [], []>} : vector<8x128xbf16>, vector<128x512xbf16>, vector<8x512xf32> -> vector<8x512xf32>
    %269 = arith.addf %265, %268 : vector<8x512xf32>
    %270 = vector.extract_strided_slice %269 {offsets = [0, 0], sizes = [8, 128], strides = [1, 1]} : vector<8x512xf32> to vector<8x128xf32>
    %cst_99 = arith.constant 5.000000e-01 : f32
    %271 = vector.broadcast %cst_99 : f32 to vector<8x128xf32>
    %272 = arith.mulf %271, %270 : vector<8x128xf32>
    %273 = math.tanh %272 : vector<8x128xf32>
    %cst_100 = arith.constant 5.000000e-01 : f32
    %274 = vector.broadcast %cst_100 : f32 to vector<8x128xf32>
    %275 = arith.mulf %274, %273 : vector<8x128xf32>
    %cst_101 = arith.constant 5.000000e-01 : f32
    %276 = vector.broadcast %cst_101 : f32 to vector<8x128xf32>
    %277 = arith.addf %275, %276 : vector<8x128xf32>
    %278 = vector.extract_strided_slice %269 {offsets = [0, 128], sizes = [8, 128], strides = [1, 1]} : vector<8x512xf32> to vector<8x128xf32>
    %cst_102 = arith.constant 5.000000e-01 : f32
    %279 = vector.broadcast %cst_102 : f32 to vector<8x128xf32>
    %280 = arith.mulf %279, %278 : vector<8x128xf32>
    %281 = math.tanh %280 : vector<8x128xf32>
    %cst_103 = arith.constant 5.000000e-01 : f32
    %282 = vector.broadcast %cst_103 : f32 to vector<8x128xf32>
    %283 = arith.mulf %282, %281 : vector<8x128xf32>
    %cst_104 = arith.constant 5.000000e-01 : f32
    %284 = vector.broadcast %cst_104 : f32 to vector<8x128xf32>
    %285 = arith.addf %283, %284 : vector<8x128xf32>
    %286 = vector.extract_strided_slice %269 {offsets = [0, 256], sizes = [8, 128], strides = [1, 1]} : vector<8x512xf32> to vector<8x128xf32>
    %287 = math.tanh %286 : vector<8x128xf32>
    %288 = vector.extract_strided_slice %269 {offsets = [0, 384], sizes = [8, 128], strides = [1, 1]} : vector<8x512xf32> to vector<8x128xf32>
    %cst_105 = arith.constant 5.000000e-01 : f32
    %289 = vector.broadcast %cst_105 : f32 to vector<8x128xf32>
    %290 = arith.mulf %289, %288 : vector<8x128xf32>
    %291 = math.tanh %290 : vector<8x128xf32>
    %cst_106 = arith.constant 5.000000e-01 : f32
    %292 = vector.broadcast %cst_106 : f32 to vector<8x128xf32>
    %293 = arith.mulf %292, %291 : vector<8x128xf32>
    %cst_107 = arith.constant 5.000000e-01 : f32
    %294 = vector.broadcast %cst_107 : f32 to vector<8x128xf32>
    %295 = arith.addf %293, %294 : vector<8x128xf32>
    %296 = arith.mulf %285, %229 : vector<8x128xf32>
    %297 = arith.mulf %277, %287 : vector<8x128xf32>
    %298 = arith.addf %296, %297 : vector<8x128xf32>
    %299 = math.tanh %298 : vector<8x128xf32>
    %300 = arith.mulf %295, %299 : vector<8x128xf32>
    %301 = arith.index_cast %256 : i32 to index
    %c0_108 = arith.constant 0 : index
    %c512_109 = arith.constant 512 : index
    %302 = vector.load %arg12[%301, %c0_108, %c512_109] : memref<8x8x1024xf32, #tpu.memory_space<vmem>>, vector<1x8x512xf32>
    %303 = vector.shape_cast %302 : vector<1x8x512xf32> to vector<8x512xf32>
    %304 = arith.truncf %236 : vector<8x128xf32> to vector<8x128xbf16>
    %c0_110 = arith.constant 0 : index
    %c0_111 = arith.constant 0 : index
    %305 = vector.load %arg6[%c0_110, %c0_111] : memref<128x512xbf16, #tpu.memory_space<vmem>>, vector<128x512xbf16>
    %cst_112 = arith.constant dense<0.000000e+00> : vector<8x512xf32>
    %306 = tpu.matmul %304, %305, %cst_112 {dimension_numbers = #tpu.dot_dimension_numbers<[1], [0], [0], [1], [0, 0, 1, 1], [], []>} : vector<8x128xbf16>, vector<128x512xbf16>, vector<8x512xf32> -> vector<8x512xf32>
    %307 = arith.addf %303, %306 : vector<8x512xf32>
    %308 = vector.extract_strided_slice %307 {offsets = [0, 0], sizes = [8, 128], strides = [1, 1]} : vector<8x512xf32> to vector<8x128xf32>
    %cst_113 = arith.constant 5.000000e-01 : f32
    %309 = vector.broadcast %cst_113 : f32 to vector<8x128xf32>
    %310 = arith.mulf %309, %308 : vector<8x128xf32>
    %311 = math.tanh %310 : vector<8x128xf32>
    %cst_114 = arith.constant 5.000000e-01 : f32
    %312 = vector.broadcast %cst_114 : f32 to vector<8x128xf32>
    %313 = arith.mulf %312, %311 : vector<8x128xf32>
    %cst_115 = arith.constant 5.000000e-01 : f32
    %314 = vector.broadcast %cst_115 : f32 to vector<8x128xf32>
    %315 = arith.addf %313, %314 : vector<8x128xf32>
    %316 = vector.extract_strided_slice %307 {offsets = [0, 128], sizes = [8, 128], strides = [1, 1]} : vector<8x512xf32> to vector<8x128xf32>
    %cst_116 = arith.constant 5.000000e-01 : f32
    %317 = vector.broadcast %cst_116 : f32 to vector<8x128xf32>
    %318 = arith.mulf %317, %316 : vector<8x128xf32>
    %319 = math.tanh %318 : vector<8x128xf32>
    %cst_117 = arith.constant 5.000000e-01 : f32
    %320 = vector.broadcast %cst_117 : f32 to vector<8x128xf32>
    %321 = arith.mulf %320, %319 : vector<8x128xf32>
    %cst_118 = arith.constant 5.000000e-01 : f32
    %322 = vector.broadcast %cst_118 : f32 to vector<8x128xf32>
    %323 = arith.addf %321, %322 : vector<8x128xf32>
    %324 = vector.extract_strided_slice %307 {offsets = [0, 256], sizes = [8, 128], strides = [1, 1]} : vector<8x512xf32> to vector<8x128xf32>
    %325 = math.tanh %324 : vector<8x128xf32>
    %326 = vector.extract_strided_slice %307 {offsets = [0, 384], sizes = [8, 128], strides = [1, 1]} : vector<8x512xf32> to vector<8x128xf32>
    %cst_119 = arith.constant 5.000000e-01 : f32
    %327 = vector.broadcast %cst_119 : f32 to vector<8x128xf32>
    %328 = arith.mulf %327, %326 : vector<8x128xf32>
    %329 = math.tanh %328 : vector<8x128xf32>
    %cst_120 = arith.constant 5.000000e-01 : f32
    %330 = vector.broadcast %cst_120 : f32 to vector<8x128xf32>
    %331 = arith.mulf %330, %329 : vector<8x128xf32>
    %cst_121 = arith.constant 5.000000e-01 : f32
    %332 = vector.broadcast %cst_121 : f32 to vector<8x128xf32>
    %333 = arith.addf %331, %332 : vector<8x128xf32>
    %334 = arith.mulf %323, %243 : vector<8x128xf32>
    %335 = arith.mulf %315, %325 : vector<8x128xf32>
    %336 = arith.addf %334, %335 : vector<8x128xf32>
    %337 = math.tanh %336 : vector<8x128xf32>
    %338 = arith.mulf %333, %337 : vector<8x128xf32>
    %339 = vector.broadcast %259 : vector<8x1xf32> to vector<8x128xf32>
    %340 = arith.mulf %339, %300 : vector<8x128xf32>
    %cst_122 = arith.constant 1.000000e+00 : f32
    %341 = vector.broadcast %cst_122 : f32 to vector<8x1xf32>
    %342 = arith.subf %341, %259 : vector<8x1xf32>
    %343 = vector.broadcast %342 : vector<8x1xf32> to vector<8x128xf32>
    %344 = arith.mulf %343, %222 : vector<8x128xf32>
    %345 = arith.addf %340, %344 : vector<8x128xf32>
    %346 = vector.broadcast %259 : vector<8x1xf32> to vector<8x128xf32>
    %347 = arith.mulf %346, %298 : vector<8x128xf32>
    %cst_123 = arith.constant 1.000000e+00 : f32
    %348 = vector.broadcast %cst_123 : f32 to vector<8x1xf32>
    %349 = arith.subf %348, %259 : vector<8x1xf32>
    %350 = vector.broadcast %349 : vector<8x1xf32> to vector<8x128xf32>
    %351 = arith.mulf %350, %229 : vector<8x128xf32>
    %352 = arith.addf %347, %351 : vector<8x128xf32>
    %353 = vector.broadcast %262 : vector<8x1xf32> to vector<8x128xf32>
    %354 = arith.mulf %353, %338 : vector<8x128xf32>
    %cst_124 = arith.constant 1.000000e+00 : f32
    %355 = vector.broadcast %cst_124 : f32 to vector<8x1xf32>
    %356 = arith.subf %355, %262 : vector<8x1xf32>
    %357 = vector.broadcast %356 : vector<8x1xf32> to vector<8x128xf32>
    %358 = arith.mulf %357, %236 : vector<8x128xf32>
    %359 = arith.addf %354, %358 : vector<8x128xf32>
    %360 = vector.broadcast %262 : vector<8x1xf32> to vector<8x128xf32>
    %361 = arith.mulf %360, %336 : vector<8x128xf32>
    %cst_125 = arith.constant 1.000000e+00 : f32
    %362 = vector.broadcast %cst_125 : f32 to vector<8x1xf32>
    %363 = arith.subf %362, %262 : vector<8x1xf32>
    %364 = vector.broadcast %363 : vector<8x1xf32> to vector<8x128xf32>
    %365 = arith.mulf %364, %243 : vector<8x128xf32>
    %366 = arith.addf %361, %365 : vector<8x128xf32>
    %367 = vector.broadcast %259 : vector<8x1xf32> to vector<8x128xf32>
    %368 = arith.mulf %345, %367 : vector<8x128xf32>
    %369 = arith.index_cast %c2_i32 : i32 to index
    %c0_126 = arith.constant 0 : index
    %c0_127 = arith.constant 0 : index
    %370 = vector.load %arg13[%369, %c0_126, %c0_127] : memref<8x8x128xf32, #tpu.memory_space<vmem>>, vector<1x8x128xf32>
    %371 = vector.shape_cast %370 : vector<1x8x128xf32> to vector<8x128xf32>
    %372 = vector.shape_cast %368 : vector<8x128xf32> to vector<1x8x128xf32>
    tpu.vector_store %arg13[%369, %c0_126, %c0_127], %372 {strides = array<i32>} : memref<8x8x128xf32, #tpu.memory_space<vmem>>, vector<1x8x128xf32>,
    %373 = vector.broadcast %262 : vector<8x1xf32> to vector<8x128xf32>
    %374 = arith.mulf %359, %373 : vector<8x128xf32>
    %375 = arith.index_cast %256 : i32 to index
    %c0_128 = arith.constant 0 : index
    %c0_129 = arith.constant 0 : index
    %376 = vector.load %arg14[%375, %c0_128, %c0_129] : memref<8x8x128xf32, #tpu.memory_space<vmem>>, vector<1x8x128xf32>
    %377 = vector.shape_cast %376 : vector<1x8x128xf32> to vector<8x128xf32>
    %378 = vector.shape_cast %374 : vector<8x128xf32> to vector<1x8x128xf32>
    tpu.vector_store %arg14[%375, %c0_128, %c0_129], %378 {strides = array<i32>} : memref<8x8x128xf32, #tpu.memory_space<vmem>>, vector<1x8x128xf32>,
    %c3_i32 = arith.constant 3 : i32
    %c7_i32_130 = arith.constant 7 : i32
    %379 = arith.subi %c7_i32_130, %c3_i32 : i32
    %380 = arith.index_cast %c3_i32 : i32 to index
    %c0_131 = arith.constant 0 : index
    %c0_132 = arith.constant 0 : index
    %381 = vector.load %arg1[%380, %c0_131, %c0_132] : memref<8x8x1xf32, #tpu.memory_space<vmem>>, vector<1x8x1xf32>
    %382 = vector.shape_cast %381 : vector<1x8x1xf32> to vector<8x1xf32>
    %383 = arith.index_cast %379 : i32 to index
    %c0_133 = arith.constant 0 : index
    %c0_134 = arith.constant 0 : index
    %384 = vector.load %arg1[%383, %c0_133, %c0_134] : memref<8x8x1xf32, #tpu.memory_space<vmem>>, vector<1x8x1xf32>
    %385 = vector.shape_cast %384 : vector<1x8x1xf32> to vector<8x1xf32>
    %386 = arith.index_cast %c3_i32 : i32 to index
    %c0_135 = arith.constant 0 : index
    %c0_136 = arith.constant 0 : index
    %387 = vector.load %arg12[%386, %c0_135, %c0_136] : memref<8x8x1024xf32, #tpu.memory_space<vmem>>, vector<1x8x512xf32>
    %388 = vector.shape_cast %387 : vector<1x8x512xf32> to vector<8x512xf32>
    %389 = arith.truncf %345 : vector<8x128xf32> to vector<8x128xbf16>
    %c0_137 = arith.constant 0 : index
    %c0_138 = arith.constant 0 : index
    %390 = vector.load %arg5[%c0_137, %c0_138] : memref<128x512xbf16, #tpu.memory_space<vmem>>, vector<128x512xbf16>
    %cst_139 = arith.constant dense<0.000000e+00> : vector<8x512xf32>
    %391 = tpu.matmul %389, %390, %cst_139 {dimension_numbers = #tpu.dot_dimension_numbers<[1], [0], [0], [1], [0, 0, 1, 1], [], []>} : vector<8x128xbf16>, vector<128x512xbf16>, vector<8x512xf32> -> vector<8x512xf32>
    %392 = arith.addf %388, %391 : vector<8x512xf32>
    %393 = vector.extract_strided_slice %392 {offsets = [0, 0], sizes = [8, 128], strides = [1, 1]} : vector<8x512xf32> to vector<8x128xf32>
    %cst_140 = arith.constant 5.000000e-01 : f32
    %394 = vector.broadcast %cst_140 : f32 to vector<8x128xf32>
    %395 = arith.mulf %394, %393 : vector<8x128xf32>
    %396 = math.tanh %395 : vector<8x128xf32>
    %cst_141 = arith.constant 5.000000e-01 : f32
    %397 = vector.broadcast %cst_141 : f32 to vector<8x128xf32>
    %398 = arith.mulf %397, %396 : vector<8x128xf32>
    %cst_142 = arith.constant 5.000000e-01 : f32
    %399 = vector.broadcast %cst_142 : f32 to vector<8x128xf32>
    %400 = arith.addf %398, %399 : vector<8x128xf32>
    %401 = vector.extract_strided_slice %392 {offsets = [0, 128], sizes = [8, 128], strides = [1, 1]} : vector<8x512xf32> to vector<8x128xf32>
    %cst_143 = arith.constant 5.000000e-01 : f32
    %402 = vector.broadcast %cst_143 : f32 to vector<8x128xf32>
    %403 = arith.mulf %402, %401 : vector<8x128xf32>
    %404 = math.tanh %403 : vector<8x128xf32>
    %cst_144 = arith.constant 5.000000e-01 : f32
    %405 = vector.broadcast %cst_144 : f32 to vector<8x128xf32>
    %406 = arith.mulf %405, %404 : vector<8x128xf32>
    %cst_145 = arith.constant 5.000000e-01 : f32
    %407 = vector.broadcast %cst_145 : f32 to vector<8x128xf32>
    %408 = arith.addf %406, %407 : vector<8x128xf32>
    %409 = vector.extract_strided_slice %392 {offsets = [0, 256], sizes = [8, 128], strides = [1, 1]} : vector<8x512xf32> to vector<8x128xf32>
    %410 = math.tanh %409 : vector<8x128xf32>
    %411 = vector.extract_strided_slice %392 {offsets = [0, 384], sizes = [8, 128], strides = [1, 1]} : vector<8x512xf32> to vector<8x128xf32>
    %cst_146 = arith.constant 5.000000e-01 : f32
    %412 = vector.broadcast %cst_146 : f32 to vector<8x128xf32>
    %413 = arith.mulf %412, %411 : vector<8x128xf32>
    %414 = math.tanh %413 : vector<8x128xf32>
    %cst_147 = arith.constant 5.000000e-01 : f32
    %415 = vector.broadcast %cst_147 : f32 to vector<8x128xf32>
    %416 = arith.mulf %415, %414 : vector<8x128xf32>
    %cst_148 = arith.constant 5.000000e-01 : f32
    %417 = vector.broadcast %cst_148 : f32 to vector<8x128xf32>
    %418 = arith.addf %416, %417 : vector<8x128xf32>
    %419 = arith.mulf %408, %352 : vector<8x128xf32>
    %420 = arith.mulf %400, %410 : vector<8x128xf32>
    %421 = arith.addf %419, %420 : vector<8x128xf32>
    %422 = math.tanh %421 : vector<8x128xf32>
    %423 = arith.mulf %418, %422 : vector<8x128xf32>
    %424 = arith.index_cast %379 : i32 to index
    %c0_149 = arith.constant 0 : index
    %c512_150 = arith.constant 512 : index
    %425 = vector.load %arg12[%424, %c0_149, %c512_150] : memref<8x8x1024xf32, #tpu.memory_space<vmem>>, vector<1x8x512xf32>
    %426 = vector.shape_cast %425 : vector<1x8x512xf32> to vector<8x512xf32>
    %427 = arith.truncf %359 : vector<8x128xf32> to vector<8x128xbf16>
    %c0_151 = arith.constant 0 : index
    %c0_152 = arith.constant 0 : index
    %428 = vector.load %arg6[%c0_151, %c0_152] : memref<128x512xbf16, #tpu.memory_space<vmem>>, vector<128x512xbf16>
    %cst_153 = arith.constant dense<0.000000e+00> : vector<8x512xf32>
    %429 = tpu.matmul %427, %428, %cst_153 {dimension_numbers = #tpu.dot_dimension_numbers<[1], [0], [0], [1], [0, 0, 1, 1], [], []>} : vector<8x128xbf16>, vector<128x512xbf16>, vector<8x512xf32> -> vector<8x512xf32>
    %430 = arith.addf %426, %429 : vector<8x512xf32>
    %431 = vector.extract_strided_slice %430 {offsets = [0, 0], sizes = [8, 128], strides = [1, 1]} : vector<8x512xf32> to vector<8x128xf32>
    %cst_154 = arith.constant 5.000000e-01 : f32
    %432 = vector.broadcast %cst_154 : f32 to vector<8x128xf32>
    %433 = arith.mulf %432, %431 : vector<8x128xf32>
    %434 = math.tanh %433 : vector<8x128xf32>
    %cst_155 = arith.constant 5.000000e-01 : f32
    %435 = vector.broadcast %cst_155 : f32 to vector<8x128xf32>
    %436 = arith.mulf %435, %434 : vector<8x128xf32>
    %cst_156 = arith.constant 5.000000e-01 : f32
    %437 = vector.broadcast %cst_156 : f32 to vector<8x128xf32>
    %438 = arith.addf %436, %437 : vector<8x128xf32>
    %439 = vector.extract_strided_slice %430 {offsets = [0, 128], sizes = [8, 128], strides = [1, 1]} : vector<8x512xf32> to vector<8x128xf32>
    %cst_157 = arith.constant 5.000000e-01 : f32
    %440 = vector.broadcast %cst_157 : f32 to vector<8x128xf32>
    %441 = arith.mulf %440, %439 : vector<8x128xf32>
    %442 = math.tanh %441 : vector<8x128xf32>
    %cst_158 = arith.constant 5.000000e-01 : f32
    %443 = vector.broadcast %cst_158 : f32 to vector<8x128xf32>
    %444 = arith.mulf %443, %442 : vector<8x128xf32>
    %cst_159 = arith.constant 5.000000e-01 : f32
    %445 = vector.broadcast %cst_159 : f32 to vector<8x128xf32>
    %446 = arith.addf %444, %445 : vector<8x128xf32>
    %447 = vector.extract_strided_slice %430 {offsets = [0, 256], sizes = [8, 128], strides = [1, 1]} : vector<8x512xf32> to vector<8x128xf32>
    %448 = math.tanh %447 : vector<8x128xf32>
    %449 = vector.extract_strided_slice %430 {offsets = [0, 384], sizes = [8, 128], strides = [1, 1]} : vector<8x512xf32> to vector<8x128xf32>
    %cst_160 = arith.constant 5.000000e-01 : f32
    %450 = vector.broadcast %cst_160 : f32 to vector<8x128xf32>
    %451 = arith.mulf %450, %449 : vector<8x128xf32>
    %452 = math.tanh %451 : vector<8x128xf32>
    %cst_161 = arith.constant 5.000000e-01 : f32
    %453 = vector.broadcast %cst_161 : f32 to vector<8x128xf32>
    %454 = arith.mulf %453, %452 : vector<8x128xf32>
    %cst_162 = arith.constant 5.000000e-01 : f32
    %455 = vector.broadcast %cst_162 : f32 to vector<8x128xf32>
    %456 = arith.addf %454, %455 : vector<8x128xf32>
    %457 = arith.mulf %446, %366 : vector<8x128xf32>
    %458 = arith.mulf %438, %448 : vector<8x128xf32>
    %459 = arith.addf %457, %458 : vector<8x128xf32>
    %460 = math.tanh %459 : vector<8x128xf32>
    %461 = arith.mulf %456, %460 : vector<8x128xf32>
    %462 = vector.broadcast %382 : vector<8x1xf32> to vector<8x128xf32>
    %463 = arith.mulf %462, %423 : vector<8x128xf32>
    %cst_163 = arith.constant 1.000000e+00 : f32
    %464 = vector.broadcast %cst_163 : f32 to vector<8x1xf32>
    %465 = arith.subf %464, %382 : vector<8x1xf32>
    %466 = vector.broadcast %465 : vector<8x1xf32> to vector<8x128xf32>
    %467 = arith.mulf %466, %345 : vector<8x128xf32>
    %468 = arith.addf %463, %467 : vector<8x128xf32>
    %469 = vector.broadcast %382 : vector<8x1xf32> to vector<8x128xf32>
    %470 = arith.mulf %469, %421 : vector<8x128xf32>
    %cst_164 = arith.constant 1.000000e+00 : f32
    %471 = vector.broadcast %cst_164 : f32 to vector<8x1xf32>
    %472 = arith.subf %471, %382 : vector<8x1xf32>
    %473 = vector.broadcast %472 : vector<8x1xf32> to vector<8x128xf32>
    %474 = arith.mulf %473, %352 : vector<8x128xf32>
    %475 = arith.addf %470, %474 : vector<8x128xf32>
    %476 = vector.broadcast %385 : vector<8x1xf32> to vector<8x128xf32>
    %477 = arith.mulf %476, %461 : vector<8x128xf32>
    %cst_165 = arith.constant 1.000000e+00 : f32
    %478 = vector.broadcast %cst_165 : f32 to vector<8x1xf32>
    %479 = arith.subf %478, %385 : vector<8x1xf32>
    %480 = vector.broadcast %479 : vector<8x1xf32> to vector<8x128xf32>
    %481 = arith.mulf %480, %359 : vector<8x128xf32>
    %482 = arith.addf %477, %481 : vector<8x128xf32>
    %483 = vector.broadcast %385 : vector<8x1xf32> to vector<8x128xf32>
    %484 = arith.mulf %483, %459 : vector<8x128xf32>
    %cst_166 = arith.constant 1.000000e+00 : f32
    %485 = vector.broadcast %cst_166 : f32 to vector<8x1xf32>
    %486 = arith.subf %485, %385 : vector<8x1xf32>
    %487 = vector.broadcast %486 : vector<8x1xf32> to vector<8x128xf32>
    %488 = arith.mulf %487, %366 : vector<8x128xf32>
    %489 = arith.addf %484, %488 : vector<8x128xf32>
    %490 = vector.broadcast %382 : vector<8x1xf32> to vector<8x128xf32>
    %491 = arith.mulf %468, %490 : vector<8x128xf32>
    %492 = arith.index_cast %c3_i32 : i32 to index
    %c0_167 = arith.constant 0 : index
    %c0_168 = arith.constant 0 : index
    %493 = vector.load %arg13[%492, %c0_167, %c0_168] : memref<8x8x128xf32, #tpu.memory_space<vmem>>, vector<1x8x128xf32>
    %494 = vector.shape_cast %493 : vector<1x8x128xf32> to vector<8x128xf32>
    %495 = vector.shape_cast %491 : vector<8x128xf32> to vector<1x8x128xf32>
    tpu.vector_store %arg13[%492, %c0_167, %c0_168], %495 {strides = array<i32>} : memref<8x8x128xf32, #tpu.memory_space<vmem>>, vector<1x8x128xf32>,
    %496 = vector.broadcast %385 : vector<8x1xf32> to vector<8x128xf32>
    %497 = arith.mulf %482, %496 : vector<8x128xf32>
    %498 = arith.index_cast %379 : i32 to index
    %c0_169 = arith.constant 0 : index
    %c0_170 = arith.constant 0 : index
    %499 = vector.load %arg14[%498, %c0_169, %c0_170] : memref<8x8x128xf32, #tpu.memory_space<vmem>>, vector<1x8x128xf32>
    %500 = vector.shape_cast %499 : vector<1x8x128xf32> to vector<8x128xf32>
    %501 = vector.shape_cast %497 : vector<8x128xf32> to vector<1x8x128xf32>
    tpu.vector_store %arg14[%498, %c0_169, %c0_170], %501 {strides = array<i32>} : memref<8x8x128xf32, #tpu.memory_space<vmem>>, vector<1x8x128xf32>,
    %c4_i32 = arith.constant 4 : i32
    %c7_i32_171 = arith.constant 7 : i32
    %502 = arith.subi %c7_i32_171, %c4_i32 : i32
    %503 = arith.index_cast %c4_i32 : i32 to index
    %c0_172 = arith.constant 0 : index
    %c0_173 = arith.constant 0 : index
    %504 = vector.load %arg1[%503, %c0_172, %c0_173] : memref<8x8x1xf32, #tpu.memory_space<vmem>>, vector<1x8x1xf32>
    %505 = vector.shape_cast %504 : vector<1x8x1xf32> to vector<8x1xf32>
    %506 = arith.index_cast %502 : i32 to index
    %c0_174 = arith.constant 0 : index
    %c0_175 = arith.constant 0 : index
    %507 = vector.load %arg1[%506, %c0_174, %c0_175] : memref<8x8x1xf32, #tpu.memory_space<vmem>>, vector<1x8x1xf32>
    %508 = vector.shape_cast %507 : vector<1x8x1xf32> to vector<8x1xf32>
    %509 = arith.index_cast %c4_i32 : i32 to index
    %c0_176 = arith.constant 0 : index
    %c0_177 = arith.constant 0 : index
    %510 = vector.load %arg12[%509, %c0_176, %c0_177] : memref<8x8x1024xf32, #tpu.memory_space<vmem>>, vector<1x8x512xf32>
    %511 = vector.shape_cast %510 : vector<1x8x512xf32> to vector<8x512xf32>
    %512 = arith.truncf %468 : vector<8x128xf32> to vector<8x128xbf16>
    %c0_178 = arith.constant 0 : index
    %c0_179 = arith.constant 0 : index
    %513 = vector.load %arg5[%c0_178, %c0_179] : memref<128x512xbf16, #tpu.memory_space<vmem>>, vector<128x512xbf16>
    %cst_180 = arith.constant dense<0.000000e+00> : vector<8x512xf32>
    %514 = tpu.matmul %512, %513, %cst_180 {dimension_numbers = #tpu.dot_dimension_numbers<[1], [0], [0], [1], [0, 0, 1, 1], [], []>} : vector<8x128xbf16>, vector<128x512xbf16>, vector<8x512xf32> -> vector<8x512xf32>
    %515 = arith.addf %511, %514 : vector<8x512xf32>
    %516 = vector.extract_strided_slice %515 {offsets = [0, 0], sizes = [8, 128], strides = [1, 1]} : vector<8x512xf32> to vector<8x128xf32>
    %cst_181 = arith.constant 5.000000e-01 : f32
    %517 = vector.broadcast %cst_181 : f32 to vector<8x128xf32>
    %518 = arith.mulf %517, %516 : vector<8x128xf32>
    %519 = math.tanh %518 : vector<8x128xf32>
    %cst_182 = arith.constant 5.000000e-01 : f32
    %520 = vector.broadcast %cst_182 : f32 to vector<8x128xf32>
    %521 = arith.mulf %520, %519 : vector<8x128xf32>
    %cst_183 = arith.constant 5.000000e-01 : f32
    %522 = vector.broadcast %cst_183 : f32 to vector<8x128xf32>
    %523 = arith.addf %521, %522 : vector<8x128xf32>
    %524 = vector.extract_strided_slice %515 {offsets = [0, 128], sizes = [8, 128], strides = [1, 1]} : vector<8x512xf32> to vector<8x128xf32>
    %cst_184 = arith.constant 5.000000e-01 : f32
    %525 = vector.broadcast %cst_184 : f32 to vector<8x128xf32>
    %526 = arith.mulf %525, %524 : vector<8x128xf32>
    %527 = math.tanh %526 : vector<8x128xf32>
    %cst_185 = arith.constant 5.000000e-01 : f32
    %528 = vector.broadcast %cst_185 : f32 to vector<8x128xf32>
    %529 = arith.mulf %528, %527 : vector<8x128xf32>
    %cst_186 = arith.constant 5.000000e-01 : f32
    %530 = vector.broadcast %cst_186 : f32 to vector<8x128xf32>
    %531 = arith.addf %529, %530 : vector<8x128xf32>
    %532 = vector.extract_strided_slice %515 {offsets = [0, 256], sizes = [8, 128], strides = [1, 1]} : vector<8x512xf32> to vector<8x128xf32>
    %533 = math.tanh %532 : vector<8x128xf32>
    %534 = vector.extract_strided_slice %515 {offsets = [0, 384], sizes = [8, 128], strides = [1, 1]} : vector<8x512xf32> to vector<8x128xf32>
    %cst_187 = arith.constant 5.000000e-01 : f32
    %535 = vector.broadcast %cst_187 : f32 to vector<8x128xf32>
    %536 = arith.mulf %535, %534 : vector<8x128xf32>
    %537 = math.tanh %536 : vector<8x128xf32>
    %cst_188 = arith.constant 5.000000e-01 : f32
    %538 = vector.broadcast %cst_188 : f32 to vector<8x128xf32>
    %539 = arith.mulf %538, %537 : vector<8x128xf32>
    %cst_189 = arith.constant 5.000000e-01 : f32
    %540 = vector.broadcast %cst_189 : f32 to vector<8x128xf32>
    %541 = arith.addf %539, %540 : vector<8x128xf32>
    %542 = arith.mulf %531, %475 : vector<8x128xf32>
    %543 = arith.mulf %523, %533 : vector<8x128xf32>
    %544 = arith.addf %542, %543 : vector<8x128xf32>
    %545 = math.tanh %544 : vector<8x128xf32>
    %546 = arith.mulf %541, %545 : vector<8x128xf32>
    %547 = arith.index_cast %502 : i32 to index
    %c0_190 = arith.constant 0 : index
    %c512_191 = arith.constant 512 : index
    %548 = vector.load %arg12[%547, %c0_190, %c512_191] : memref<8x8x1024xf32, #tpu.memory_space<vmem>>, vector<1x8x512xf32>
    %549 = vector.shape_cast %548 : vector<1x8x512xf32> to vector<8x512xf32>
    %550 = arith.truncf %482 : vector<8x128xf32> to vector<8x128xbf16>
    %c0_192 = arith.constant 0 : index
    %c0_193 = arith.constant 0 : index
    %551 = vector.load %arg6[%c0_192, %c0_193] : memref<128x512xbf16, #tpu.memory_space<vmem>>, vector<128x512xbf16>
    %cst_194 = arith.constant dense<0.000000e+00> : vector<8x512xf32>
    %552 = tpu.matmul %550, %551, %cst_194 {dimension_numbers = #tpu.dot_dimension_numbers<[1], [0], [0], [1], [0, 0, 1, 1], [], []>} : vector<8x128xbf16>, vector<128x512xbf16>, vector<8x512xf32> -> vector<8x512xf32>
    %553 = arith.addf %549, %552 : vector<8x512xf32>
    %554 = vector.extract_strided_slice %553 {offsets = [0, 0], sizes = [8, 128], strides = [1, 1]} : vector<8x512xf32> to vector<8x128xf32>
    %cst_195 = arith.constant 5.000000e-01 : f32
    %555 = vector.broadcast %cst_195 : f32 to vector<8x128xf32>
    %556 = arith.mulf %555, %554 : vector<8x128xf32>
    %557 = math.tanh %556 : vector<8x128xf32>
    %cst_196 = arith.constant 5.000000e-01 : f32
    %558 = vector.broadcast %cst_196 : f32 to vector<8x128xf32>
    %559 = arith.mulf %558, %557 : vector<8x128xf32>
    %cst_197 = arith.constant 5.000000e-01 : f32
    %560 = vector.broadcast %cst_197 : f32 to vector<8x128xf32>
    %561 = arith.addf %559, %560 : vector<8x128xf32>
    %562 = vector.extract_strided_slice %553 {offsets = [0, 128], sizes = [8, 128], strides = [1, 1]} : vector<8x512xf32> to vector<8x128xf32>
    %cst_198 = arith.constant 5.000000e-01 : f32
    %563 = vector.broadcast %cst_198 : f32 to vector<8x128xf32>
    %564 = arith.mulf %563, %562 : vector<8x128xf32>
    %565 = math.tanh %564 : vector<8x128xf32>
    %cst_199 = arith.constant 5.000000e-01 : f32
    %566 = vector.broadcast %cst_199 : f32 to vector<8x128xf32>
    %567 = arith.mulf %566, %565 : vector<8x128xf32>
    %cst_200 = arith.constant 5.000000e-01 : f32
    %568 = vector.broadcast %cst_200 : f32 to vector<8x128xf32>
    %569 = arith.addf %567, %568 : vector<8x128xf32>
    %570 = vector.extract_strided_slice %553 {offsets = [0, 256], sizes = [8, 128], strides = [1, 1]} : vector<8x512xf32> to vector<8x128xf32>
    %571 = math.tanh %570 : vector<8x128xf32>
    %572 = vector.extract_strided_slice %553 {offsets = [0, 384], sizes = [8, 128], strides = [1, 1]} : vector<8x512xf32> to vector<8x128xf32>
    %cst_201 = arith.constant 5.000000e-01 : f32
    %573 = vector.broadcast %cst_201 : f32 to vector<8x128xf32>
    %574 = arith.mulf %573, %572 : vector<8x128xf32>
    %575 = math.tanh %574 : vector<8x128xf32>
    %cst_202 = arith.constant 5.000000e-01 : f32
    %576 = vector.broadcast %cst_202 : f32 to vector<8x128xf32>
    %577 = arith.mulf %576, %575 : vector<8x128xf32>
    %cst_203 = arith.constant 5.000000e-01 : f32
    %578 = vector.broadcast %cst_203 : f32 to vector<8x128xf32>
    %579 = arith.addf %577, %578 : vector<8x128xf32>
    %580 = arith.mulf %569, %489 : vector<8x128xf32>
    %581 = arith.mulf %561, %571 : vector<8x128xf32>
    %582 = arith.addf %580, %581 : vector<8x128xf32>
    %583 = math.tanh %582 : vector<8x128xf32>
    %584 = arith.mulf %579, %583 : vector<8x128xf32>
    %585 = vector.broadcast %505 : vector<8x1xf32> to vector<8x128xf32>
    %586 = arith.mulf %585, %546 : vector<8x128xf32>
    %cst_204 = arith.constant 1.000000e+00 : f32
    %587 = vector.broadcast %cst_204 : f32 to vector<8x1xf32>
    %588 = arith.subf %587, %505 : vector<8x1xf32>
    %589 = vector.broadcast %588 : vector<8x1xf32> to vector<8x128xf32>
    %590 = arith.mulf %589, %468 : vector<8x128xf32>
    %591 = arith.addf %586, %590 : vector<8x128xf32>
    %592 = vector.broadcast %505 : vector<8x1xf32> to vector<8x128xf32>
    %593 = arith.mulf %592, %544 : vector<8x128xf32>
    %cst_205 = arith.constant 1.000000e+00 : f32
    %594 = vector.broadcast %cst_205 : f32 to vector<8x1xf32>
    %595 = arith.subf %594, %505 : vector<8x1xf32>
    %596 = vector.broadcast %595 : vector<8x1xf32> to vector<8x128xf32>
    %597 = arith.mulf %596, %475 : vector<8x128xf32>
    %598 = arith.addf %593, %597 : vector<8x128xf32>
    %599 = vector.broadcast %508 : vector<8x1xf32> to vector<8x128xf32>
    %600 = arith.mulf %599, %584 : vector<8x128xf32>
    %cst_206 = arith.constant 1.000000e+00 : f32
    %601 = vector.broadcast %cst_206 : f32 to vector<8x1xf32>
    %602 = arith.subf %601, %508 : vector<8x1xf32>
    %603 = vector.broadcast %602 : vector<8x1xf32> to vector<8x128xf32>
    %604 = arith.mulf %603, %482 : vector<8x128xf32>
    %605 = arith.addf %600, %604 : vector<8x128xf32>
    %606 = vector.broadcast %508 : vector<8x1xf32> to vector<8x128xf32>
    %607 = arith.mulf %606, %582 : vector<8x128xf32>
    %cst_207 = arith.constant 1.000000e+00 : f32
    %608 = vector.broadcast %cst_207 : f32 to vector<8x1xf32>
    %609 = arith.subf %608, %508 : vector<8x1xf32>
    %610 = vector.broadcast %609 : vector<8x1xf32> to vector<8x128xf32>
    %611 = arith.mulf %610, %489 : vector<8x128xf32>
    %612 = arith.addf %607, %611 : vector<8x128xf32>
    %613 = vector.broadcast %505 : vector<8x1xf32> to vector<8x128xf32>
    %614 = arith.mulf %591, %613 : vector<8x128xf32>
    %615 = arith.index_cast %c4_i32 : i32 to index
    %c0_208 = arith.constant 0 : index
    %c0_209 = arith.constant 0 : index
    %616 = vector.load %arg13[%615, %c0_208, %c0_209] : memref<8x8x128xf32, #tpu.memory_space<vmem>>, vector<1x8x128xf32>
    %617 = vector.shape_cast %616 : vector<1x8x128xf32> to vector<8x128xf32>
    %618 = vector.shape_cast %614 : vector<8x128xf32> to vector<1x8x128xf32>
    tpu.vector_store %arg13[%615, %c0_208, %c0_209], %618 {strides = array<i32>} : memref<8x8x128xf32, #tpu.memory_space<vmem>>, vector<1x8x128xf32>,
    %619 = vector.broadcast %508 : vector<8x1xf32> to vector<8x128xf32>
    %620 = arith.mulf %605, %619 : vector<8x128xf32>
    %621 = arith.index_cast %502 : i32 to index
    %c0_210 = arith.constant 0 : index
    %c0_211 = arith.constant 0 : index
    %622 = vector.load %arg14[%621, %c0_210, %c0_211] : memref<8x8x128xf32, #tpu.memory_space<vmem>>, vector<1x8x128xf32>
    %623 = vector.shape_cast %622 : vector<1x8x128xf32> to vector<8x128xf32>
    %624 = vector.shape_cast %620 : vector<8x128xf32> to vector<1x8x128xf32>
    tpu.vector_store %arg14[%621, %c0_210, %c0_211], %624 {strides = array<i32>} : memref<8x8x128xf32, #tpu.memory_space<vmem>>, vector<1x8x128xf32>,
    %c5_i32 = arith.constant 5 : i32
    %c7_i32_212 = arith.constant 7 : i32
    %625 = arith.subi %c7_i32_212, %c5_i32 : i32
    %626 = arith.index_cast %c5_i32 : i32 to index
    %c0_213 = arith.constant 0 : index
    %c0_214 = arith.constant 0 : index
    %627 = vector.load %arg1[%626, %c0_213, %c0_214] : memref<8x8x1xf32, #tpu.memory_space<vmem>>, vector<1x8x1xf32>
    %628 = vector.shape_cast %627 : vector<1x8x1xf32> to vector<8x1xf32>
    %629 = arith.index_cast %625 : i32 to index
    %c0_215 = arith.constant 0 : index
    %c0_216 = arith.constant 0 : index
    %630 = vector.load %arg1[%629, %c0_215, %c0_216] : memref<8x8x1xf32, #tpu.memory_space<vmem>>, vector<1x8x1xf32>
    %631 = vector.shape_cast %630 : vector<1x8x1xf32> to vector<8x1xf32>
    %632 = arith.index_cast %c5_i32 : i32 to index
    %c0_217 = arith.constant 0 : index
    %c0_218 = arith.constant 0 : index
    %633 = vector.load %arg12[%632, %c0_217, %c0_218] : memref<8x8x1024xf32, #tpu.memory_space<vmem>>, vector<1x8x512xf32>
    %634 = vector.shape_cast %633 : vector<1x8x512xf32> to vector<8x512xf32>
    %635 = arith.truncf %591 : vector<8x128xf32> to vector<8x128xbf16>
    %c0_219 = arith.constant 0 : index
    %c0_220 = arith.constant 0 : index
    %636 = vector.load %arg5[%c0_219, %c0_220] : memref<128x512xbf16, #tpu.memory_space<vmem>>, vector<128x512xbf16>
    %cst_221 = arith.constant dense<0.000000e+00> : vector<8x512xf32>
    %637 = tpu.matmul %635, %636, %cst_221 {dimension_numbers = #tpu.dot_dimension_numbers<[1], [0], [0], [1], [0, 0, 1, 1], [], []>} : vector<8x128xbf16>, vector<128x512xbf16>, vector<8x512xf32> -> vector<8x512xf32>
    %638 = arith.addf %634, %637 : vector<8x512xf32>
    %639 = vector.extract_strided_slice %638 {offsets = [0, 0], sizes = [8, 128], strides = [1, 1]} : vector<8x512xf32> to vector<8x128xf32>
    %cst_222 = arith.constant 5.000000e-01 : f32
    %640 = vector.broadcast %cst_222 : f32 to vector<8x128xf32>
    %641 = arith.mulf %640, %639 : vector<8x128xf32>
    %642 = math.tanh %641 : vector<8x128xf32>
    %cst_223 = arith.constant 5.000000e-01 : f32
    %643 = vector.broadcast %cst_223 : f32 to vector<8x128xf32>
    %644 = arith.mulf %643, %642 : vector<8x128xf32>
    %cst_224 = arith.constant 5.000000e-01 : f32
    %645 = vector.broadcast %cst_224 : f32 to vector<8x128xf32>
    %646 = arith.addf %644, %645 : vector<8x128xf32>
    %647 = vector.extract_strided_slice %638 {offsets = [0, 128], sizes = [8, 128], strides = [1, 1]} : vector<8x512xf32> to vector<8x128xf32>
    %cst_225 = arith.constant 5.000000e-01 : f32
    %648 = vector.broadcast %cst_225 : f32 to vector<8x128xf32>
    %649 = arith.mulf %648, %647 : vector<8x128xf32>
    %650 = math.tanh %649 : vector<8x128xf32>
    %cst_226 = arith.constant 5.000000e-01 : f32
    %651 = vector.broadcast %cst_226 : f32 to vector<8x128xf32>
    %652 = arith.mulf %651, %650 : vector<8x128xf32>
    %cst_227 = arith.constant 5.000000e-01 : f32
    %653 = vector.broadcast %cst_227 : f32 to vector<8x128xf32>
    %654 = arith.addf %652, %653 : vector<8x128xf32>
    %655 = vector.extract_strided_slice %638 {offsets = [0, 256], sizes = [8, 128], strides = [1, 1]} : vector<8x512xf32> to vector<8x128xf32>
    %656 = math.tanh %655 : vector<8x128xf32>
    %657 = vector.extract_strided_slice %638 {offsets = [0, 384], sizes = [8, 128], strides = [1, 1]} : vector<8x512xf32> to vector<8x128xf32>
    %cst_228 = arith.constant 5.000000e-01 : f32
    %658 = vector.broadcast %cst_228 : f32 to vector<8x128xf32>
    %659 = arith.mulf %658, %657 : vector<8x128xf32>
    %660 = math.tanh %659 : vector<8x128xf32>
    %cst_229 = arith.constant 5.000000e-01 : f32
    %661 = vector.broadcast %cst_229 : f32 to vector<8x128xf32>
    %662 = arith.mulf %661, %660 : vector<8x128xf32>
    %cst_230 = arith.constant 5.000000e-01 : f32
    %663 = vector.broadcast %cst_230 : f32 to vector<8x128xf32>
    %664 = arith.addf %662, %663 : vector<8x128xf32>
    %665 = arith.mulf %654, %598 : vector<8x128xf32>
    %666 = arith.mulf %646, %656 : vector<8x128xf32>
    %667 = arith.addf %665, %666 : vector<8x128xf32>
    %668 = math.tanh %667 : vector<8x128xf32>
    %669 = arith.mulf %664, %668 : vector<8x128xf32>
    %670 = arith.index_cast %625 : i32 to index
    %c0_231 = arith.constant 0 : index
    %c512_232 = arith.constant 512 : index
    %671 = vector.load %arg12[%670, %c0_231, %c512_232] : memref<8x8x1024xf32, #tpu.memory_space<vmem>>, vector<1x8x512xf32>
    %672 = vector.shape_cast %671 : vector<1x8x512xf32> to vector<8x512xf32>
    %673 = arith.truncf %605 : vector<8x128xf32> to vector<8x128xbf16>
    %c0_233 = arith.constant 0 : index
    %c0_234 = arith.constant 0 : index
    %674 = vector.load %arg6[%c0_233, %c0_234] : memref<128x512xbf16, #tpu.memory_space<vmem>>, vector<128x512xbf16>
    %cst_235 = arith.constant dense<0.000000e+00> : vector<8x512xf32>
    %675 = tpu.matmul %673, %674, %cst_235 {dimension_numbers = #tpu.dot_dimension_numbers<[1], [0], [0], [1], [0, 0, 1, 1], [], []>} : vector<8x128xbf16>, vector<128x512xbf16>, vector<8x512xf32> -> vector<8x512xf32>
    %676 = arith.addf %672, %675 : vector<8x512xf32>
    %677 = vector.extract_strided_slice %676 {offsets = [0, 0], sizes = [8, 128], strides = [1, 1]} : vector<8x512xf32> to vector<8x128xf32>
    %cst_236 = arith.constant 5.000000e-01 : f32
    %678 = vector.broadcast %cst_236 : f32 to vector<8x128xf32>
    %679 = arith.mulf %678, %677 : vector<8x128xf32>
    %680 = math.tanh %679 : vector<8x128xf32>
    %cst_237 = arith.constant 5.000000e-01 : f32
    %681 = vector.broadcast %cst_237 : f32 to vector<8x128xf32>
    %682 = arith.mulf %681, %680 : vector<8x128xf32>
    %cst_238 = arith.constant 5.000000e-01 : f32
    %683 = vector.broadcast %cst_238 : f32 to vector<8x128xf32>
    %684 = arith.addf %682, %683 : vector<8x128xf32>
    %685 = vector.extract_strided_slice %676 {offsets = [0, 128], sizes = [8, 128], strides = [1, 1]} : vector<8x512xf32> to vector<8x128xf32>
    %cst_239 = arith.constant 5.000000e-01 : f32
    %686 = vector.broadcast %cst_239 : f32 to vector<8x128xf32>
    %687 = arith.mulf %686, %685 : vector<8x128xf32>
    %688 = math.tanh %687 : vector<8x128xf32>
    %cst_240 = arith.constant 5.000000e-01 : f32
    %689 = vector.broadcast %cst_240 : f32 to vector<8x128xf32>
    %690 = arith.mulf %689, %688 : vector<8x128xf32>
    %cst_241 = arith.constant 5.000000e-01 : f32
    %691 = vector.broadcast %cst_241 : f32 to vector<8x128xf32>
    %692 = arith.addf %690, %691 : vector<8x128xf32>
    %693 = vector.extract_strided_slice %676 {offsets = [0, 256], sizes = [8, 128], strides = [1, 1]} : vector<8x512xf32> to vector<8x128xf32>
    %694 = math.tanh %693 : vector<8x128xf32>
    %695 = vector.extract_strided_slice %676 {offsets = [0, 384], sizes = [8, 128], strides = [1, 1]} : vector<8x512xf32> to vector<8x128xf32>
    %cst_242 = arith.constant 5.000000e-01 : f32
    %696 = vector.broadcast %cst_242 : f32 to vector<8x128xf32>
    %697 = arith.mulf %696, %695 : vector<8x128xf32>
    %698 = math.tanh %697 : vector<8x128xf32>
    %cst_243 = arith.constant 5.000000e-01 : f32
    %699 = vector.broadcast %cst_243 : f32 to vector<8x128xf32>
    %700 = arith.mulf %699, %698 : vector<8x128xf32>
    %cst_244 = arith.constant 5.000000e-01 : f32
    %701 = vector.broadcast %cst_244 : f32 to vector<8x128xf32>
    %702 = arith.addf %700, %701 : vector<8x128xf32>
    %703 = arith.mulf %692, %612 : vector<8x128xf32>
    %704 = arith.mulf %684, %694 : vector<8x128xf32>
    %705 = arith.addf %703, %704 : vector<8x128xf32>
    %706 = math.tanh %705 : vector<8x128xf32>
    %707 = arith.mulf %702, %706 : vector<8x128xf32>
    %708 = vector.broadcast %628 : vector<8x1xf32> to vector<8x128xf32>
    %709 = arith.mulf %708, %669 : vector<8x128xf32>
    %cst_245 = arith.constant 1.000000e+00 : f32
    %710 = vector.broadcast %cst_245 : f32 to vector<8x1xf32>
    %711 = arith.subf %710, %628 : vector<8x1xf32>
    %712 = vector.broadcast %711 : vector<8x1xf32> to vector<8x128xf32>
    %713 = arith.mulf %712, %591 : vector<8x128xf32>
    %714 = arith.addf %709, %713 : vector<8x128xf32>
    %715 = vector.broadcast %628 : vector<8x1xf32> to vector<8x128xf32>
    %716 = arith.mulf %715, %667 : vector<8x128xf32>
    %cst_246 = arith.constant 1.000000e+00 : f32
    %717 = vector.broadcast %cst_246 : f32 to vector<8x1xf32>
    %718 = arith.subf %717, %628 : vector<8x1xf32>
    %719 = vector.broadcast %718 : vector<8x1xf32> to vector<8x128xf32>
    %720 = arith.mulf %719, %598 : vector<8x128xf32>
    %721 = arith.addf %716, %720 : vector<8x128xf32>
    %722 = vector.broadcast %631 : vector<8x1xf32> to vector<8x128xf32>
    %723 = arith.mulf %722, %707 : vector<8x128xf32>
    %cst_247 = arith.constant 1.000000e+00 : f32
    %724 = vector.broadcast %cst_247 : f32 to vector<8x1xf32>
    %725 = arith.subf %724, %631 : vector<8x1xf32>
    %726 = vector.broadcast %725 : vector<8x1xf32> to vector<8x128xf32>
    %727 = arith.mulf %726, %605 : vector<8x128xf32>
    %728 = arith.addf %723, %727 : vector<8x128xf32>
    %729 = vector.broadcast %631 : vector<8x1xf32> to vector<8x128xf32>
    %730 = arith.mulf %729, %705 : vector<8x128xf32>
    %cst_248 = arith.constant 1.000000e+00 : f32
    %731 = vector.broadcast %cst_248 : f32 to vector<8x1xf32>
    %732 = arith.subf %731, %631 : vector<8x1xf32>
    %733 = vector.broadcast %732 : vector<8x1xf32> to vector<8x128xf32>
    %734 = arith.mulf %733, %612 : vector<8x128xf32>
    %735 = arith.addf %730, %734 : vector<8x128xf32>
    %736 = vector.broadcast %628 : vector<8x1xf32> to vector<8x128xf32>
    %737 = arith.mulf %714, %736 : vector<8x128xf32>
    %738 = arith.index_cast %c5_i32 : i32 to index
    %c0_249 = arith.constant 0 : index
    %c0_250 = arith.constant 0 : index
    %739 = vector.load %arg13[%738, %c0_249, %c0_250] : memref<8x8x128xf32, #tpu.memory_space<vmem>>, vector<1x8x128xf32>
    %740 = vector.shape_cast %739 : vector<1x8x128xf32> to vector<8x128xf32>
    %741 = vector.shape_cast %737 : vector<8x128xf32> to vector<1x8x128xf32>
    tpu.vector_store %arg13[%738, %c0_249, %c0_250], %741 {strides = array<i32>} : memref<8x8x128xf32, #tpu.memory_space<vmem>>, vector<1x8x128xf32>,
    %742 = vector.broadcast %631 : vector<8x1xf32> to vector<8x128xf32>
    %743 = arith.mulf %728, %742 : vector<8x128xf32>
    %744 = arith.index_cast %625 : i32 to index
    %c0_251 = arith.constant 0 : index
    %c0_252 = arith.constant 0 : index
    %745 = vector.load %arg14[%744, %c0_251, %c0_252] : memref<8x8x128xf32, #tpu.memory_space<vmem>>, vector<1x8x128xf32>
    %746 = vector.shape_cast %745 : vector<1x8x128xf32> to vector<8x128xf32>
    %747 = vector.shape_cast %743 : vector<8x128xf32> to vector<1x8x128xf32>
    tpu.vector_store %arg14[%744, %c0_251, %c0_252], %747 {strides = array<i32>} : memref<8x8x128xf32, #tpu.memory_space<vmem>>, vector<1x8x128xf32>,
    %c6_i32 = arith.constant 6 : i32
    %c7_i32_253 = arith.constant 7 : i32
    %748 = arith.subi %c7_i32_253, %c6_i32 : i32
    %749 = arith.index_cast %c6_i32 : i32 to index
    %c0_254 = arith.constant 0 : index
    %c0_255 = arith.constant 0 : index
    %750 = vector.load %arg1[%749, %c0_254, %c0_255] : memref<8x8x1xf32, #tpu.memory_space<vmem>>, vector<1x8x1xf32>
    %751 = vector.shape_cast %750 : vector<1x8x1xf32> to vector<8x1xf32>
    %752 = arith.index_cast %748 : i32 to index
    %c0_256 = arith.constant 0 : index
    %c0_257 = arith.constant 0 : index
    %753 = vector.load %arg1[%752, %c0_256, %c0_257] : memref<8x8x1xf32, #tpu.memory_space<vmem>>, vector<1x8x1xf32>
    %754 = vector.shape_cast %753 : vector<1x8x1xf32> to vector<8x1xf32>
    %755 = arith.index_cast %c6_i32 : i32 to index
    %c0_258 = arith.constant 0 : index
    %c0_259 = arith.constant 0 : index
    %756 = vector.load %arg12[%755, %c0_258, %c0_259] : memref<8x8x1024xf32, #tpu.memory_space<vmem>>, vector<1x8x512xf32>
    %757 = vector.shape_cast %756 : vector<1x8x512xf32> to vector<8x512xf32>
    %758 = arith.truncf %714 : vector<8x128xf32> to vector<8x128xbf16>
    %c0_260 = arith.constant 0 : index
    %c0_261 = arith.constant 0 : index
    %759 = vector.load %arg5[%c0_260, %c0_261] : memref<128x512xbf16, #tpu.memory_space<vmem>>, vector<128x512xbf16>
    %cst_262 = arith.constant dense<0.000000e+00> : vector<8x512xf32>
    %760 = tpu.matmul %758, %759, %cst_262 {dimension_numbers = #tpu.dot_dimension_numbers<[1], [0], [0], [1], [0, 0, 1, 1], [], []>} : vector<8x128xbf16>, vector<128x512xbf16>, vector<8x512xf32> -> vector<8x512xf32>
    %761 = arith.addf %757, %760 : vector<8x512xf32>
    %762 = vector.extract_strided_slice %761 {offsets = [0, 0], sizes = [8, 128], strides = [1, 1]} : vector<8x512xf32> to vector<8x128xf32>
    %cst_263 = arith.constant 5.000000e-01 : f32
    %763 = vector.broadcast %cst_263 : f32 to vector<8x128xf32>
    %764 = arith.mulf %763, %762 : vector<8x128xf32>
    %765 = math.tanh %764 : vector<8x128xf32>
    %cst_264 = arith.constant 5.000000e-01 : f32
    %766 = vector.broadcast %cst_264 : f32 to vector<8x128xf32>
    %767 = arith.mulf %766, %765 : vector<8x128xf32>
    %cst_265 = arith.constant 5.000000e-01 : f32
    %768 = vector.broadcast %cst_265 : f32 to vector<8x128xf32>
    %769 = arith.addf %767, %768 : vector<8x128xf32>
    %770 = vector.extract_strided_slice %761 {offsets = [0, 128], sizes = [8, 128], strides = [1, 1]} : vector<8x512xf32> to vector<8x128xf32>
    %cst_266 = arith.constant 5.000000e-01 : f32
    %771 = vector.broadcast %cst_266 : f32 to vector<8x128xf32>
    %772 = arith.mulf %771, %770 : vector<8x128xf32>
    %773 = math.tanh %772 : vector<8x128xf32>
    %cst_267 = arith.constant 5.000000e-01 : f32
    %774 = vector.broadcast %cst_267 : f32 to vector<8x128xf32>
    %775 = arith.mulf %774, %773 : vector<8x128xf32>
    %cst_268 = arith.constant 5.000000e-01 : f32
    %776 = vector.broadcast %cst_268 : f32 to vector<8x128xf32>
    %777 = arith.addf %775, %776 : vector<8x128xf32>
    %778 = vector.extract_strided_slice %761 {offsets = [0, 256], sizes = [8, 128], strides = [1, 1]} : vector<8x512xf32> to vector<8x128xf32>
    %779 = math.tanh %778 : vector<8x128xf32>
    %780 = vector.extract_strided_slice %761 {offsets = [0, 384], sizes = [8, 128], strides = [1, 1]} : vector<8x512xf32> to vector<8x128xf32>
    %cst_269 = arith.constant 5.000000e-01 : f32
    %781 = vector.broadcast %cst_269 : f32 to vector<8x128xf32>
    %782 = arith.mulf %781, %780 : vector<8x128xf32>
    %783 = math.tanh %782 : vector<8x128xf32>
    %cst_270 = arith.constant 5.000000e-01 : f32
    %784 = vector.broadcast %cst_270 : f32 to vector<8x128xf32>
    %785 = arith.mulf %784, %783 : vector<8x128xf32>
    %cst_271 = arith.constant 5.000000e-01 : f32
    %786 = vector.broadcast %cst_271 : f32 to vector<8x128xf32>
    %787 = arith.addf %785, %786 : vector<8x128xf32>
    %788 = arith.mulf %777, %721 : vector<8x128xf32>
    %789 = arith.mulf %769, %779 : vector<8x128xf32>
    %790 = arith.addf %788, %789 : vector<8x128xf32>
    %791 = math.tanh %790 : vector<8x128xf32>
    %792 = arith.mulf %787, %791 : vector<8x128xf32>
    %793 = arith.index_cast %748 : i32 to index
    %c0_272 = arith.constant 0 : index
    %c512_273 = arith.constant 512 : index
    %794 = vector.load %arg12[%793, %c0_272, %c512_273] : memref<8x8x1024xf32, #tpu.memory_space<vmem>>, vector<1x8x512xf32>
    %795 = vector.shape_cast %794 : vector<1x8x512xf32> to vector<8x512xf32>
    %796 = arith.truncf %728 : vector<8x128xf32> to vector<8x128xbf16>
    %c0_274 = arith.constant 0 : index
    %c0_275 = arith.constant 0 : index
    %797 = vector.load %arg6[%c0_274, %c0_275] : memref<128x512xbf16, #tpu.memory_space<vmem>>, vector<128x512xbf16>
    %cst_276 = arith.constant dense<0.000000e+00> : vector<8x512xf32>
    %798 = tpu.matmul %796, %797, %cst_276 {dimension_numbers = #tpu.dot_dimension_numbers<[1], [0], [0], [1], [0, 0, 1, 1], [], []>} : vector<8x128xbf16>, vector<128x512xbf16>, vector<8x512xf32> -> vector<8x512xf32>
    %799 = arith.addf %795, %798 : vector<8x512xf32>
    %800 = vector.extract_strided_slice %799 {offsets = [0, 0], sizes = [8, 128], strides = [1, 1]} : vector<8x512xf32> to vector<8x128xf32>
    %cst_277 = arith.constant 5.000000e-01 : f32
    %801 = vector.broadcast %cst_277 : f32 to vector<8x128xf32>
    %802 = arith.mulf %801, %800 : vector<8x128xf32>
    %803 = math.tanh %802 : vector<8x128xf32>
    %cst_278 = arith.constant 5.000000e-01 : f32
    %804 = vector.broadcast %cst_278 : f32 to vector<8x128xf32>
    %805 = arith.mulf %804, %803 : vector<8x128xf32>
    %cst_279 = arith.constant 5.000000e-01 : f32
    %806 = vector.broadcast %cst_279 : f32 to vector<8x128xf32>
    %807 = arith.addf %805, %806 : vector<8x128xf32>
    %808 = vector.extract_strided_slice %799 {offsets = [0, 128], sizes = [8, 128], strides = [1, 1]} : vector<8x512xf32> to vector<8x128xf32>
    %cst_280 = arith.constant 5.000000e-01 : f32
    %809 = vector.broadcast %cst_280 : f32 to vector<8x128xf32>
    %810 = arith.mulf %809, %808 : vector<8x128xf32>
    %811 = math.tanh %810 : vector<8x128xf32>
    %cst_281 = arith.constant 5.000000e-01 : f32
    %812 = vector.broadcast %cst_281 : f32 to vector<8x128xf32>
    %813 = arith.mulf %812, %811 : vector<8x128xf32>
    %cst_282 = arith.constant 5.000000e-01 : f32
    %814 = vector.broadcast %cst_282 : f32 to vector<8x128xf32>
    %815 = arith.addf %813, %814 : vector<8x128xf32>
    %816 = vector.extract_strided_slice %799 {offsets = [0, 256], sizes = [8, 128], strides = [1, 1]} : vector<8x512xf32> to vector<8x128xf32>
    %817 = math.tanh %816 : vector<8x128xf32>
    %818 = vector.extract_strided_slice %799 {offsets = [0, 384], sizes = [8, 128], strides = [1, 1]} : vector<8x512xf32> to vector<8x128xf32>
    %cst_283 = arith.constant 5.000000e-01 : f32
    %819 = vector.broadcast %cst_283 : f32 to vector<8x128xf32>
    %820 = arith.mulf %819, %818 : vector<8x128xf32>
    %821 = math.tanh %820 : vector<8x128xf32>
    %cst_284 = arith.constant 5.000000e-01 : f32
    %822 = vector.broadcast %cst_284 : f32 to vector<8x128xf32>
    %823 = arith.mulf %822, %821 : vector<8x128xf32>
    %cst_285 = arith.constant 5.000000e-01 : f32
    %824 = vector.broadcast %cst_285 : f32 to vector<8x128xf32>
    %825 = arith.addf %823, %824 : vector<8x128xf32>
    %826 = arith.mulf %815, %735 : vector<8x128xf32>
    %827 = arith.mulf %807, %817 : vector<8x128xf32>
    %828 = arith.addf %826, %827 : vector<8x128xf32>
    %829 = math.tanh %828 : vector<8x128xf32>
    %830 = arith.mulf %825, %829 : vector<8x128xf32>
    %831 = vector.broadcast %751 : vector<8x1xf32> to vector<8x128xf32>
    %832 = arith.mulf %831, %792 : vector<8x128xf32>
    %cst_286 = arith.constant 1.000000e+00 : f32
    %833 = vector.broadcast %cst_286 : f32 to vector<8x1xf32>
    %834 = arith.subf %833, %751 : vector<8x1xf32>
    %835 = vector.broadcast %834 : vector<8x1xf32> to vector<8x128xf32>
    %836 = arith.mulf %835, %714 : vector<8x128xf32>
    %837 = arith.addf %832, %836 : vector<8x128xf32>
    %838 = vector.broadcast %751 : vector<8x1xf32> to vector<8x128xf32>
    %839 = arith.mulf %838, %790 : vector<8x128xf32>
    %cst_287 = arith.constant 1.000000e+00 : f32
    %840 = vector.broadcast %cst_287 : f32 to vector<8x1xf32>
    %841 = arith.subf %840, %751 : vector<8x1xf32>
    %842 = vector.broadcast %841 : vector<8x1xf32> to vector<8x128xf32>
    %843 = arith.mulf %842, %721 : vector<8x128xf32>
    %844 = arith.addf %839, %843 : vector<8x128xf32>
    %845 = vector.broadcast %754 : vector<8x1xf32> to vector<8x128xf32>
    %846 = arith.mulf %845, %830 : vector<8x128xf32>
    %cst_288 = arith.constant 1.000000e+00 : f32
    %847 = vector.broadcast %cst_288 : f32 to vector<8x1xf32>
    %848 = arith.subf %847, %754 : vector<8x1xf32>
    %849 = vector.broadcast %848 : vector<8x1xf32> to vector<8x128xf32>
    %850 = arith.mulf %849, %728 : vector<8x128xf32>
    %851 = arith.addf %846, %850 : vector<8x128xf32>
    %852 = vector.broadcast %754 : vector<8x1xf32> to vector<8x128xf32>
    %853 = arith.mulf %852, %828 : vector<8x128xf32>
    %cst_289 = arith.constant 1.000000e+00 : f32
    %854 = vector.broadcast %cst_289 : f32 to vector<8x1xf32>
    %855 = arith.subf %854, %754 : vector<8x1xf32>
    %856 = vector.broadcast %855 : vector<8x1xf32> to vector<8x128xf32>
    %857 = arith.mulf %856, %735 : vector<8x128xf32>
    %858 = arith.addf %853, %857 : vector<8x128xf32>
    %859 = vector.broadcast %751 : vector<8x1xf32> to vector<8x128xf32>
    %860 = arith.mulf %837, %859 : vector<8x128xf32>
    %861 = arith.index_cast %c6_i32 : i32 to index
    %c0_290 = arith.constant 0 : index
    %c0_291 = arith.constant 0 : index
    %862 = vector.load %arg13[%861, %c0_290, %c0_291] : memref<8x8x128xf32, #tpu.memory_space<vmem>>, vector<1x8x128xf32>
    %863 = vector.shape_cast %862 : vector<1x8x128xf32> to vector<8x128xf32>
    %864 = vector.shape_cast %860 : vector<8x128xf32> to vector<1x8x128xf32>
    tpu.vector_store %arg13[%861, %c0_290, %c0_291], %864 {strides = array<i32>} : memref<8x8x128xf32, #tpu.memory_space<vmem>>, vector<1x8x128xf32>,
    %865 = vector.broadcast %754 : vector<8x1xf32> to vector<8x128xf32>
    %866 = arith.mulf %851, %865 : vector<8x128xf32>
    %867 = arith.index_cast %748 : i32 to index
    %c0_292 = arith.constant 0 : index
    %c0_293 = arith.constant 0 : index
    %868 = vector.load %arg14[%867, %c0_292, %c0_293] : memref<8x8x128xf32, #tpu.memory_space<vmem>>, vector<1x8x128xf32>
    %869 = vector.shape_cast %868 : vector<1x8x128xf32> to vector<8x128xf32>
    %870 = vector.shape_cast %866 : vector<8x128xf32> to vector<1x8x128xf32>
    tpu.vector_store %arg14[%867, %c0_292, %c0_293], %870 {strides = array<i32>} : memref<8x8x128xf32, #tpu.memory_space<vmem>>, vector<1x8x128xf32>,
    %c7_i32_294 = arith.constant 7 : i32
    %c7_i32_295 = arith.constant 7 : i32
    %871 = arith.subi %c7_i32_295, %c7_i32_294 : i32
    %872 = arith.index_cast %c7_i32_294 : i32 to index
    %c0_296 = arith.constant 0 : index
    %c0_297 = arith.constant 0 : index
    %873 = vector.load %arg1[%872, %c0_296, %c0_297] : memref<8x8x1xf32, #tpu.memory_space<vmem>>, vector<1x8x1xf32>
    %874 = vector.shape_cast %873 : vector<1x8x1xf32> to vector<8x1xf32>
    %875 = arith.index_cast %871 : i32 to index
    %c0_298 = arith.constant 0 : index
    %c0_299 = arith.constant 0 : index
    %876 = vector.load %arg1[%875, %c0_298, %c0_299] : memref<8x8x1xf32, #tpu.memory_space<vmem>>, vector<1x8x1xf32>
    %877 = vector.shape_cast %876 : vector<1x8x1xf32> to vector<8x1xf32>
    %878 = arith.index_cast %c7_i32_294 : i32 to index
    %c0_300 = arith.constant 0 : index
    %c0_301 = arith.constant 0 : index
    %879 = vector.load %arg12[%878, %c0_300, %c0_301] : memref<8x8x1024xf32, #tpu.memory_space<vmem>>, vector<1x8x512xf32>
    %880 = vector.shape_cast %879 : vector<1x8x512xf32> to vector<8x512xf32>
    %881 = arith.truncf %837 : vector<8x128xf32> to vector<8x128xbf16>
    %c0_302 = arith.constant 0 : index
    %c0_303 = arith.constant 0 : index
    %882 = vector.load %arg5[%c0_302, %c0_303] : memref<128x512xbf16, #tpu.memory_space<vmem>>, vector<128x512xbf16>
    %cst_304 = arith.constant dense<0.000000e+00> : vector<8x512xf32>
    %883 = tpu.matmul %881, %882, %cst_304 {dimension_numbers = #tpu.dot_dimension_numbers<[1], [0], [0], [1], [0, 0, 1, 1], [], []>} : vector<8x128xbf16>, vector<128x512xbf16>, vector<8x512xf32> -> vector<8x512xf32>
    %884 = arith.addf %880, %883 : vector<8x512xf32>
    %885 = vector.extract_strided_slice %884 {offsets = [0, 0], sizes = [8, 128], strides = [1, 1]} : vector<8x512xf32> to vector<8x128xf32>
    %cst_305 = arith.constant 5.000000e-01 : f32
    %886 = vector.broadcast %cst_305 : f32 to vector<8x128xf32>
    %887 = arith.mulf %886, %885 : vector<8x128xf32>
    %888 = math.tanh %887 : vector<8x128xf32>
    %cst_306 = arith.constant 5.000000e-01 : f32
    %889 = vector.broadcast %cst_306 : f32 to vector<8x128xf32>
    %890 = arith.mulf %889, %888 : vector<8x128xf32>
    %cst_307 = arith.constant 5.000000e-01 : f32
    %891 = vector.broadcast %cst_307 : f32 to vector<8x128xf32>
    %892 = arith.addf %890, %891 : vector<8x128xf32>
    %893 = vector.extract_strided_slice %884 {offsets = [0, 128], sizes = [8, 128], strides = [1, 1]} : vector<8x512xf32> to vector<8x128xf32>
    %cst_308 = arith.constant 5.000000e-01 : f32
    %894 = vector.broadcast %cst_308 : f32 to vector<8x128xf32>
    %895 = arith.mulf %894, %893 : vector<8x128xf32>
    %896 = math.tanh %895 : vector<8x128xf32>
    %cst_309 = arith.constant 5.000000e-01 : f32
    %897 = vector.broadcast %cst_309 : f32 to vector<8x128xf32>
    %898 = arith.mulf %897, %896 : vector<8x128xf32>
    %cst_310 = arith.constant 5.000000e-01 : f32
    %899 = vector.broadcast %cst_310 : f32 to vector<8x128xf32>
    %900 = arith.addf %898, %899 : vector<8x128xf32>
    %901 = vector.extract_strided_slice %884 {offsets = [0, 256], sizes = [8, 128], strides = [1, 1]} : vector<8x512xf32> to vector<8x128xf32>
    %902 = math.tanh %901 : vector<8x128xf32>
    %903 = vector.extract_strided_slice %884 {offsets = [0, 384], sizes = [8, 128], strides = [1, 1]} : vector<8x512xf32> to vector<8x128xf32>
    %cst_311 = arith.constant 5.000000e-01 : f32
    %904 = vector.broadcast %cst_311 : f32 to vector<8x128xf32>
    %905 = arith.mulf %904, %903 : vector<8x128xf32>
    %906 = math.tanh %905 : vector<8x128xf32>
    %cst_312 = arith.constant 5.000000e-01 : f32
    %907 = vector.broadcast %cst_312 : f32 to vector<8x128xf32>
    %908 = arith.mulf %907, %906 : vector<8x128xf32>
    %cst_313 = arith.constant 5.000000e-01 : f32
    %909 = vector.broadcast %cst_313 : f32 to vector<8x128xf32>
    %910 = arith.addf %908, %909 : vector<8x128xf32>
    %911 = arith.mulf %900, %844 : vector<8x128xf32>
    %912 = arith.mulf %892, %902 : vector<8x128xf32>
    %913 = arith.addf %911, %912 : vector<8x128xf32>
    %914 = math.tanh %913 : vector<8x128xf32>
    %915 = arith.mulf %910, %914 : vector<8x128xf32>
    %916 = arith.index_cast %871 : i32 to index
    %c0_314 = arith.constant 0 : index
    %c512_315 = arith.constant 512 : index
    %917 = vector.load %arg12[%916, %c0_314, %c512_315] : memref<8x8x1024xf32, #tpu.memory_space<vmem>>, vector<1x8x512xf32>
    %918 = vector.shape_cast %917 : vector<1x8x512xf32> to vector<8x512xf32>
    %919 = arith.truncf %851 : vector<8x128xf32> to vector<8x128xbf16>
    %c0_316 = arith.constant 0 : index
    %c0_317 = arith.constant 0 : index
    %920 = vector.load %arg6[%c0_316, %c0_317] : memref<128x512xbf16, #tpu.memory_space<vmem>>, vector<128x512xbf16>
    %cst_318 = arith.constant dense<0.000000e+00> : vector<8x512xf32>
    %921 = tpu.matmul %919, %920, %cst_318 {dimension_numbers = #tpu.dot_dimension_numbers<[1], [0], [0], [1], [0, 0, 1, 1], [], []>} : vector<8x128xbf16>, vector<128x512xbf16>, vector<8x512xf32> -> vector<8x512xf32>
    %922 = arith.addf %918, %921 : vector<8x512xf32>
    %923 = vector.extract_strided_slice %922 {offsets = [0, 0], sizes = [8, 128], strides = [1, 1]} : vector<8x512xf32> to vector<8x128xf32>
    %cst_319 = arith.constant 5.000000e-01 : f32
    %924 = vector.broadcast %cst_319 : f32 to vector<8x128xf32>
    %925 = arith.mulf %924, %923 : vector<8x128xf32>
    %926 = math.tanh %925 : vector<8x128xf32>
    %cst_320 = arith.constant 5.000000e-01 : f32
    %927 = vector.broadcast %cst_320 : f32 to vector<8x128xf32>
    %928 = arith.mulf %927, %926 : vector<8x128xf32>
    %cst_321 = arith.constant 5.000000e-01 : f32
    %929 = vector.broadcast %cst_321 : f32 to vector<8x128xf32>
    %930 = arith.addf %928, %929 : vector<8x128xf32>
    %931 = vector.extract_strided_slice %922 {offsets = [0, 128], sizes = [8, 128], strides = [1, 1]} : vector<8x512xf32> to vector<8x128xf32>
    %cst_322 = arith.constant 5.000000e-01 : f32
    %932 = vector.broadcast %cst_322 : f32 to vector<8x128xf32>
    %933 = arith.mulf %932, %931 : vector<8x128xf32>
    %934 = math.tanh %933 : vector<8x128xf32>
    %cst_323 = arith.constant 5.000000e-01 : f32
    %935 = vector.broadcast %cst_323 : f32 to vector<8x128xf32>
    %936 = arith.mulf %935, %934 : vector<8x128xf32>
    %cst_324 = arith.constant 5.000000e-01 : f32
    %937 = vector.broadcast %cst_324 : f32 to vector<8x128xf32>
    %938 = arith.addf %936, %937 : vector<8x128xf32>
    %939 = vector.extract_strided_slice %922 {offsets = [0, 256], sizes = [8, 128], strides = [1, 1]} : vector<8x512xf32> to vector<8x128xf32>
    %940 = math.tanh %939 : vector<8x128xf32>
    %941 = vector.extract_strided_slice %922 {offsets = [0, 384], sizes = [8, 128], strides = [1, 1]} : vector<8x512xf32> to vector<8x128xf32>
    %cst_325 = arith.constant 5.000000e-01 : f32
    %942 = vector.broadcast %cst_325 : f32 to vector<8x128xf32>
    %943 = arith.mulf %942, %941 : vector<8x128xf32>
    %944 = math.tanh %943 : vector<8x128xf32>
    %cst_326 = arith.constant 5.000000e-01 : f32
    %945 = vector.broadcast %cst_326 : f32 to vector<8x128xf32>
    %946 = arith.mulf %945, %944 : vector<8x128xf32>
    %cst_327 = arith.constant 5.000000e-01 : f32
    %947 = vector.broadcast %cst_327 : f32 to vector<8x128xf32>
    %948 = arith.addf %946, %947 : vector<8x128xf32>
    %949 = arith.mulf %938, %858 : vector<8x128xf32>
    %950 = arith.mulf %930, %940 : vector<8x128xf32>
    %951 = arith.addf %949, %950 : vector<8x128xf32>
    %952 = math.tanh %951 : vector<8x128xf32>
    %953 = arith.mulf %948, %952 : vector<8x128xf32>
    %954 = vector.broadcast %874 : vector<8x1xf32> to vector<8x128xf32>
    %955 = arith.mulf %954, %915 : vector<8x128xf32>
    %cst_328 = arith.constant 1.000000e+00 : f32
    %956 = vector.broadcast %cst_328 : f32 to vector<8x1xf32>
    %957 = arith.subf %956, %874 : vector<8x1xf32>
    %958 = vector.broadcast %957 : vector<8x1xf32> to vector<8x128xf32>
    %959 = arith.mulf %958, %837 : vector<8x128xf32>
    %960 = arith.addf %955, %959 : vector<8x128xf32>
    %961 = vector.broadcast %874 : vector<8x1xf32> to vector<8x128xf32>
    %962 = arith.mulf %961, %913 : vector<8x128xf32>
    %cst_329 = arith.constant 1.000000e+00 : f32
    %963 = vector.broadcast %cst_329 : f32 to vector<8x1xf32>
    %964 = arith.subf %963, %874 : vector<8x1xf32>
    %965 = vector.broadcast %964 : vector<8x1xf32> to vector<8x128xf32>
    %966 = arith.mulf %965, %844 : vector<8x128xf32>
    %967 = arith.addf %962, %966 : vector<8x128xf32>
    %968 = vector.broadcast %877 : vector<8x1xf32> to vector<8x128xf32>
    %969 = arith.mulf %968, %953 : vector<8x128xf32>
    %cst_330 = arith.constant 1.000000e+00 : f32
    %970 = vector.broadcast %cst_330 : f32 to vector<8x1xf32>
    %971 = arith.subf %970, %877 : vector<8x1xf32>
    %972 = vector.broadcast %971 : vector<8x1xf32> to vector<8x128xf32>
    %973 = arith.mulf %972, %851 : vector<8x128xf32>
    %974 = arith.addf %969, %973 : vector<8x128xf32>
    %975 = vector.broadcast %877 : vector<8x1xf32> to vector<8x128xf32>
    %976 = arith.mulf %975, %951 : vector<8x128xf32>
    %cst_331 = arith.constant 1.000000e+00 : f32
    %977 = vector.broadcast %cst_331 : f32 to vector<8x1xf32>
    %978 = arith.subf %977, %877 : vector<8x1xf32>
    %979 = vector.broadcast %978 : vector<8x1xf32> to vector<8x128xf32>
    %980 = arith.mulf %979, %858 : vector<8x128xf32>
    %981 = arith.addf %976, %980 : vector<8x128xf32>
    %982 = vector.broadcast %874 : vector<8x1xf32> to vector<8x128xf32>
    %983 = arith.mulf %960, %982 : vector<8x128xf32>
    %984 = arith.index_cast %c7_i32_294 : i32 to index
    %c0_332 = arith.constant 0 : index
    %c0_333 = arith.constant 0 : index
    %985 = vector.load %arg13[%984, %c0_332, %c0_333] : memref<8x8x128xf32, #tpu.memory_space<vmem>>, vector<1x8x128xf32>
    %986 = vector.shape_cast %985 : vector<1x8x128xf32> to vector<8x128xf32>
    %987 = vector.shape_cast %983 : vector<8x128xf32> to vector<1x8x128xf32>
    tpu.vector_store %arg13[%984, %c0_332, %c0_333], %987 {strides = array<i32>} : memref<8x8x128xf32, #tpu.memory_space<vmem>>, vector<1x8x128xf32>,
    %988 = vector.broadcast %877 : vector<8x1xf32> to vector<8x128xf32>
    %989 = arith.mulf %974, %988 : vector<8x128xf32>
    %990 = arith.index_cast %871 : i32 to index
    %c0_334 = arith.constant 0 : index
    %c0_335 = arith.constant 0 : index
    %991 = vector.load %arg14[%990, %c0_334, %c0_335] : memref<8x8x128xf32, #tpu.memory_space<vmem>>, vector<1x8x128xf32>
    %992 = vector.shape_cast %991 : vector<1x8x128xf32> to vector<8x128xf32>
    %993 = vector.shape_cast %989 : vector<8x128xf32> to vector<1x8x128xf32>
    tpu.vector_store %arg14[%990, %c0_334, %c0_335], %993 {strides = array<i32>} : memref<8x8x128xf32, #tpu.memory_space<vmem>>, vector<1x8x128xf32>,
    %c8_i32 = arith.constant 8 : i32
    %c0_336 = arith.constant 0 : index
    %c0_337 = arith.constant 0 : index
    %c0_338 = arith.constant 0 : index
    %994 = vector.load %arg13[%c0_336, %c0_337, %c0_338] : memref<8x8x128xf32, #tpu.memory_space<vmem>>, vector<8x8x128xf32>
    %995 = vector.shape_cast %994 : vector<8x8x128xf32> to vector<64x128xf32>
    %c0_339 = arith.constant 0 : index
    %c0_340 = arith.constant 0 : index
    %c0_341 = arith.constant 0 : index
    %996 = vector.load %arg14[%c0_339, %c0_340, %c0_341] : memref<8x8x128xf32, #tpu.memory_space<vmem>>, vector<8x8x128xf32>
    %997 = vector.shape_cast %996 : vector<8x8x128xf32> to vector<64x128xf32>
    %998 = arith.truncf %995 : vector<64x128xf32> to vector<64x128xbf16>
    %c0_342 = arith.constant 0 : index
    %c0_343 = arith.constant 0 : index
    %999 = vector.load %arg8[%c0_342, %c0_343] : memref<128x128xbf16, #tpu.memory_space<vmem>>, vector<128x128xbf16>
    %cst_344 = arith.constant dense<0.000000e+00> : vector<64x128xf32>
    %1000 = tpu.matmul %998, %999, %cst_344 {dimension_numbers = #tpu.dot_dimension_numbers<[1], [0], [0], [1], [0, 0, 1, 1], [], []>} : vector<64x128xbf16>, vector<128x128xbf16>, vector<64x128xf32> -> vector<64x128xf32>
    %1001 = arith.truncf %997 : vector<64x128xf32> to vector<64x128xbf16>
    %c0_345 = arith.constant 0 : index
    %c0_346 = arith.constant 0 : index
    %1002 = vector.load %arg9[%c0_345, %c0_346] : memref<128x128xbf16, #tpu.memory_space<vmem>>, vector<128x128xbf16>
    %cst_347 = arith.constant dense<0.000000e+00> : vector<64x128xf32>
    %1003 = tpu.matmul %1001, %1002, %cst_347 {dimension_numbers = #tpu.dot_dimension_numbers<[1], [0], [0], [1], [0, 0, 1, 1], [], []>} : vector<64x128xbf16>, vector<128x128xbf16>, vector<64x128xf32> -> vector<64x128xf32>
    %1004 = arith.addf %1000, %1003 : vector<64x128xf32>
    %c0_348 = arith.constant 0 : index
    %c0_349 = arith.constant 0 : index
    %1005 = vector.load %arg10[%c0_348, %c0_349] : memref<1x128xf32, #tpu.memory_space<vmem>>, vector<1x128xf32>
    %1006 = vector.broadcast %1005 : vector<1x128xf32> to vector<64x128xf32>
    %1007 = arith.addf %1004, %1006 : vector<64x128xf32>
    %cst_350 = arith.constant dense<0xFF800000> : vector<64xf32>
    %1008 = vector.multi_reduction <maximumf>, %1007, %cst_350 [1] : vector<64x128xf32> to vector<64xf32>
    %1009 = vector.shape_cast %1008 : vector<64xf32> to vector<64x1xf32>
    %1010 = vector.broadcast %1009 : vector<64x1xf32> to vector<64x128xf32>
    %1011 = arith.subf %1007, %1010 : vector<64x128xf32>
    %1012 = math.exp %1011 : vector<64x128xf32>
    %cst_351 = arith.constant dense<0.000000e+00> : vector<64xf32>
    %1013 = vector.multi_reduction <add>, %1012, %cst_351 [1] : vector<64x128xf32> to vector<64xf32>
    %1014 = vector.shape_cast %1013 : vector<64xf32> to vector<64x1xf32>
    %1015 = math.log %1014 : vector<64x1xf32>
    %1016 = arith.addf %1015, %1009 : vector<64x1xf32>
    %1017 = tpu.iota {dimensions = array<i32: 1>} : vector<64x128xi32>
    %c0_352 = arith.constant 0 : index
    %c0_353 = arith.constant 0 : index
    %1018 = vector.load %arg3[%c0_352, %c0_353] : memref<64x1xi32, #tpu.memory_space<vmem>>, vector<64x1xi32>
    %1019 = vector.broadcast %1018 : vector<64x1xi32> to vector<64x128xi32>
    %1020 = arith.cmpi eq, %1017, %1019 : vector<64x128xi32>
    %1021 = arith.extui %1020 : vector<64x128xi1> to vector<64x128xi32>
    %1022 = arith.sitofp %1021 : vector<64x128xi32> to vector<64x128xf32>
    %1023 = arith.mulf %1022, %1007 : vector<64x128xf32>
    %cst_354 = arith.constant dense<0.000000e+00> : vector<64xf32>
    %1024 = vector.multi_reduction <add>, %1023, %cst_354 [1] : vector<64x128xf32> to vector<64xf32>
    %1025 = vector.shape_cast %1024 : vector<64xf32> to vector<64x1xf32>
    %1026 = arith.subf %1016, %1025 : vector<64x1xf32>
    %c0_355 = arith.constant 0 : index
    %c0_356 = arith.constant 0 : index
    %1027 = vector.load %arg2[%c0_355, %c0_356] : memref<64x1xf32, #tpu.memory_space<vmem>>, vector<64x1xf32>
    %1028 = arith.mulf %1026, %1027 : vector<64x1xf32>
    %cst_357 = arith.constant dense<0.000000e+00> : vector<1xf32>
    %1029 = vector.multi_reduction <add>, %1028, %cst_357 [0] : vector<64x1xf32> to vector<1xf32>
    %1030 = vector.shape_cast %1029 : vector<1xf32> to vector<1x1xf32>
    %cst_358 = arith.constant 6.250000e-02 : f32
    %1031 = vector.broadcast %cst_358 : f32 to vector<1x1xf32>
    %1032 = arith.mulf %1030, %1031 : vector<1x1xf32>
    %c0_359 = arith.constant 0 : index
    %c0_360 = arith.constant 0 : index
    %1033 = vector.load %arg11[%c0_359, %c0_360] : memref<1x1xf32, #tpu.memory_space<vmem>>, vector<1x1xf32>
    tpu.vector_store %arg11[%c0_359, %c0_360], %1032 {strides = array<i32>} : memref<1x1xf32, #tpu.memory_space<vmem>>, vector<1x1xf32>,
    return
  }
}

</mosaic_0001>

<bundles_post_ra>
// kernel: tpu_custom_call.1
= control target key start
LH: loop header
LB: loop body
LE: loop exit
PB: predicated region body
PF: predicated region fallthrough
CT: control target
= control target key end

     0   :  { %16 = vsyncpa [#allocation6], 0  ;;  %s10007_s0 = inlined_call_operand.vmem [shape: f32[64,128], index: 0, kind: input, shape index: {}]   ;;  %s10008_s1 = inlined_call_operand.vmem [shape: f32[8,8,1], index: 1, kind: input, shape index: {}]   ;;  %s10009_s2 = inlined_call_operand.vmem [shape: f32[64,1], index: 2, kind: input, shape index: {}]   ;;  %s10010_s3 = inlined_call_operand.vmem [shape: s32[64,1], index: 3, kind: input, shape index: {}]   ;;  %s10011_s4 = inlined_call_operand.hbm [shape: bf16[128,1024], index: 4, kind: input, shape index: {}]   ;;  %s10012_s5 = inlined_call_operand.hbm [shape: bf16[128,512], index: 5, kind: input, shape index: {}]   ;;  %s10013_s6 = inlined_call_operand.hbm [shape: bf16[128,512], index: 6, kind: input, shape index: {}]   ;;  %s10014_s7 = inlined_call_operand.vmem [shape: f32[1,1024], index: 7, kind: input, shape index: {}]   ;;  %s10015_s8 = inlined_call_operand.vmem [shape: bf16[128,128], index: 8, kind: input, shape index: {}]   ;;  %s10016_s9 = inlined_call_operand.vmem [shape: bf16[128,128], index: 9, kind: input, shape index: {}]   ;;  %s10017_s10 = inlined_call_operand.vmem [shape: f32[1,128], index: 10, kind: input, shape index: {}]   ;;  %s10018_s11 = inlined_call_operand.hbm [shape: f32[1,1], index: 11, kind: output, shape index: {}]  }
   0x1   :  { %17 = vsyncpa [#allocation9], 0 }
   0x2   :  { %18 = vsyncpa [#allocation7], 0  ;;  %s8003_s17 = smov [#allocation8]   ;;  %s7909_s21 = scalar_lea.hbm %s10012_s5, 4096 }
   0x3   :  { %s44_s18 = sshll.u32 %s8003_s17, 4  ;;  %p7910_p0 = scmp.ne.s32.totalorder %s10012_s5, %s7909_s21  ;;  %s45_s18 = int_to_ptr.vmem [resolvable:$true] %s44_s18 }
   0x4   :  { %p7913_p1 = scmp.lt.u32.totalorder %s7909_s21, %s10012_s5 }
   0x6   :  { %p7915_p2 = pnand %p7913_p1, %p7910_p0 }
   0x8   :  { %7918 = shalt.err (!%p7915_p2)
}
   0x9   :  { %s7919_s26 = scalar_lea.vmem %s45_s18, 4096  ;;  %p7924_p4 = scmp.lt.s32.totalorder %s45_s18, %s45_s18 }
   0xa   :  { %p7920_p3 = scmp.ne.s32.totalorder %s45_s18, %s7919_s26  ;;  %p7925_p5 = scmp.lt.s32.totalorder %s7919_s26, %s7919_s26 }
   0xc   :  { %p7926_p6 = por %p7925_p5, %p7924_p4 }
   0xe   :  { %p7927_p7 = pnand %p7926_p6, %p7920_p3 }
  0x10   :  { %7930 = shalt.err (!%p7927_p7)
}
  0x11   :  { %s8004_s27 = smov 256   ;;  %s8005_s28 = smov 16  }
  0x12   :  { %50 = dma.hbm_to_vmem [thread:$0]  %s10012_s5, 4096, %s45_s18, [#allocation9], %s8004_s27, %s8004_s27, %s8005_s28  }
  0x13   :  { %s8006_s12 = smov [#allocation5]   ;;  %s7931_s16 = scalar_lea.hbm %s10011_s4, 8192 }
  0x14   :  { %s32_s13 = sshll.u32 %s8006_s12, 4  ;;  %p7932_p8 = scmp.ne.s32.totalorder %s10011_s4, %s7931_s16  ;;  %s33_s13 = int_to_ptr.vmem [resolvable:$true] %s32_s13 }
  0x15   :  { %p7935_p9 = scmp.lt.u32.totalorder %s7931_s16, %s10011_s4 }
  0x17   :  { %p7937_p10 = pnand %p7935_p9, %p7932_p8 }
  0x19   :  { %7940 = shalt.err (!%p7937_p10)
}
  0x1a   :  { %s7941_s22 = scalar_lea.vmem %s33_s13, 8192  ;;  %p7946_p12 = scmp.lt.s32.totalorder %s33_s13, %s33_s13 }
  0x1b   :  { %p7942_p11 = scmp.ne.s32.totalorder %s33_s13, %s7941_s22  ;;  %p7947_p13 = scmp.lt.s32.totalorder %s7941_s22, %s7941_s22 }
  0x1d   :  { %p7948_p0 = por %p7947_p13, %p7946_p12 }
  0x1f   :  { %p7949_p1 = pnand %p7948_p0, %p7942_p11 }
  0x21   :  { %7952 = shalt.err (!%p7949_p1)
}
  0x22   :  { %s8007_s5 = smov 512   ;;  %s8008_s18 = smov 32  }
  0x23   :  { %38 = dma.hbm_to_vmem [thread:$0]  %s10011_s4, 8192, %s33_s13, [#allocation6], %s8007_s5, %s8007_s5, %s8008_s18  }
  0x24   :  { %s8009_s25 = smov [#allocation10]   ;;  %s7953_s12 = scalar_lea.hbm %s10013_s6, 4096 }
  0x25   :  { %s56_s26 = sshll.u32 %s8009_s25, 4  ;;  %p7954_p2 = scmp.ne.s32.totalorder %s10013_s6, %s7953_s12  ;;  %s57_s26 = int_to_ptr.vmem [resolvable:$true] %s56_s26 }
  0x26   :  { %p7957_p3 = scmp.lt.u32.totalorder %s7953_s12, %s10013_s6 }
  0x28   :  { %p7959_p4 = pnand %p7957_p3, %p7954_p2 }
  0x2a   :  { %7962 = shalt.err (!%p7959_p4)
}
  0x2b   :  { %s7963_s19 = scalar_lea.vmem %s57_s26, 4096  ;;  %p7968_p6 = scmp.lt.s32.totalorder %s57_s26, %s57_s26 }
  0x2c   :  { %p7964_p5 = scmp.ne.s32.totalorder %s57_s26, %s7963_s19  ;;  %p7969_p7 = scmp.lt.s32.totalorder %s7963_s19, %s7963_s19 }
  0x2e   :  { %p7970_p8 = por %p7969_p7, %p7968_p6 }
  0x30   :  { %p7971_p9 = pnand %p7970_p8, %p7964_p5 }
  0x32   :  { %7974 = shalt.err (!%p7971_p9)
}
  0x33   :  { %62 = dma.hbm_to_vmem [thread:$0]  %s10013_s6, 4096, %s57_s26, [#allocation9], %s8004_s27, %s8004_s27, %s8005_s28  }
  0x34   :  { %7997 = dma.done.wait [#allocation6], 8192  }
  0x35   :  { %7998 = vsyncadd [#allocation6], 4294959104 }
  0x36   :  { %7999 = dma.done.wait [#allocation9], 8192  }
  0x37   :  { %8000 = vsyncadd [#allocation9], 4294959104  ;;  %v10020_v0 = vmov 0   ;;  %v93_v1 = vld [vmem:[#allocation5] sm:$0xff]  ;;  %v95_v3 = vld [vmem:[#allocation5 + $0x10] sm:$0xff]  ;;  %vm6512_vm8 = vcmask 7168  }
  0x38   :  { %551 = vmatprep.mubr.bf16.mxu1 %v10020_v0  ;;  %697 = vmatprep.mubr.bf16.mxu0 %v10020_v0  ;;  %v97_v2 = vld [vmem:[#allocation5 + $0x20] sm:$0xff]  ;;  %v99_v5 = vld [vmem:[#allocation5 + $0x30] sm:$0xff]  ;;  %v94_v62 = vld [vmem:[#allocation5 + $0x8] sm:$0xff]  ;;  %s8012_s19 = smov [#allocation11]   ;;  %vm6535_vm9 = vcmask 0  }
  0x39   :  { %7258 = vset.pattern.permute.xlu0 %v10020_v0  ;;  %7259 = vset.pattern.permute.xlu1 %v10020_v0  ;;  %v6554_v4 = vcombine.high %v93_v1, %v97_v2  ;;  %v6553_v6 = vcombine.low %v93_v1, %v97_v2  ;;  %v101_v7 = vld [vmem:[#allocation5 + $0x40] sm:$0xff]  ;;  %v6558_v9 = vcombine.high %v95_v3, %v99_v5  ;;  %v103_v12 = vld [vmem:[#allocation5 + $0x50] sm:$0xff]  ;;  %v98_v1 = vld [vmem:[#allocation5 + $0x28] sm:$0xff] }
  0x3a   :  { %v105_v8 = vld [vmem:[#allocation5 + $0x60] sm:$0xff]  ;;  %v6557_v10 = vcombine.low %v95_v3, %v99_v5  ;;  %v107_v13 = vld [vmem:[#allocation5 + $0x70] sm:$0xff] }
  0x3b   :  { %v6562_v11 = vcombine.high %v101_v7, %v105_v8  ;;  %v109_v14 = vld [vmem:[#allocation5 + $0x80] sm:$0xff]  ;;  %519 = vmatprep.subr.bf16.mxu1 %v6554_v4  ;;  %v6566_v15 = vcombine.high %v103_v12, %v107_v13  ;;  %v111_v17 = vld [vmem:[#allocation5 + $0x90] sm:$0xff]  ;;  %665 = vmatprep.subr.bf16.mxu0 %v6558_v9  ;;  %v6561_v19 = vcombine.low %v101_v7, %v105_v8  ;;  %v82_v4 = vld [vmem:[%s10007_s0 + $0x8] sm:$0xff] }
  0x3c   :  { %v113_v16 = vld [vmem:[#allocation5 + $0xa0] sm:$0xff]  ;;  %v115_v18 = vld [vmem:[#allocation5 + $0xb0] sm:$0xff]  ;;  %520 = vmatpush1.bf16.msra.mxu1 %v6553_v6  ;;  %666 = vmatpush1.bf16.msra.mxu0 %v6557_v10  ;;  %v6565_v20 = vcombine.low %v103_v12, %v107_v13  ;;  %v6556_v6 = vcombine.high %v94_v62, %v98_v1  ;;  %v102_v8 = vld [vmem:[#allocation5 + $0x48] sm:$0xff] }
  0x3d   :  { %521 = vmatprep.subr.bf16.mxu1 %v6562_v11  ;;  %v6570_v21 = vcombine.high %v109_v14, %v113_v16  ;;  %667 = vmatprep.subr.bf16.mxu0 %v6566_v15  ;;  %v6574_v22 = vcombine.high %v111_v17, %v115_v18  ;;  %v117_v23 = vld [vmem:[#allocation5 + $0xc0] sm:$0xff]  ;;  %v119_v25 = vld [vmem:[#allocation5 + $0xd0] sm:$0xff]  ;;  %v6569_v27 = vcombine.low %v109_v14, %v113_v16  ;;  %v106_v9 = vld [vmem:[#allocation5 + $0x68] sm:$0xff] }
  0x3e   :  { %v121_v24 = vld [vmem:[#allocation5 + $0xe0] sm:$0xff]  ;;  %v123_v26 = vld [vmem:[#allocation5 + $0xf0] sm:$0xff]  ;;  %v6573_v28 = vcombine.low %v111_v17, %v115_v18  ;;  %v6555_v11 = vcombine.low %v94_v62, %v98_v1  ;;  %v6564_v13 = vcombine.high %v102_v8, %v106_v9  ;;  %v110_v15 = vld [vmem:[#allocation5 + $0x88] sm:$0xff]  ;;  %v6563_v17 = vcombine.low %v102_v8, %v106_v9 }
  0x3f   :  { %v6578_v29 = vcombine.high %v117_v23, %v121_v24  ;;  %v6582_v30 = vcombine.high %v119_v25, %v123_v26  ;;  %v125_v31 = vld [vmem:[#allocation5 + $0x100] sm:$0xff]  ;;  %v127_v33 = vld [vmem:[#allocation5 + $0x110] sm:$0xff]  ;;  %v6577_v35 = vcombine.low %v117_v23, %v121_v24  ;;  %v6581_v36 = vcombine.low %v119_v25, %v123_v26  ;;  %v114_v16 = vld [vmem:[#allocation5 + $0xa8] sm:$0xff] }
  0x40   :  { %522 = vmatpush1.bf16.msra.mxu1 %v6561_v19  ;;  %668 = vmatpush1.bf16.msra.mxu0 %v6565_v20  ;;  %v129_v32 = vld [vmem:[#allocation5 + $0x120] sm:$0xff]  ;;  %v131_v34 = vld [vmem:[#allocation5 + $0x130] sm:$0xff]  ;;  %v84_v19 = vld [vmem:[%s10007_s0 + $0x18] sm:$0xff]  ;;  %v6571_v26 = vcombine.low %v110_v15, %v114_v16 }
  0x41   :  { %523 = vmatprep.subr.bf16.mxu1 %v6570_v21  ;;  %669 = vmatprep.subr.bf16.mxu0 %v6574_v22  ;;  %v6586_v37 = vcombine.high %v125_v31, %v129_v32  ;;  %v133_v38 = vld [vmem:[#allocation5 + $0x140] sm:$0xff]  ;;  %v6590_v39 = vcombine.high %v127_v33, %v131_v34  ;;  %v135_v41 = vld [vmem:[#allocation5 + $0x150] sm:$0xff]  ;;  %v6585_v43 = vcombine.low %v125_v31, %v129_v32  ;;  %v118_v23 = vld [vmem:[#allocation5 + $0xc8] sm:$0xff] }
  0x42   :  { %v137_v40 = vld [vmem:[#allocation5 + $0x160] sm:$0xff]  ;;  %v139_v42 = vld [vmem:[#allocation5 + $0x170] sm:$0xff]  ;;  %v6589_v44 = vcombine.low %v127_v33, %v131_v34  ;;  %v6572_v21 = vcombine.high %v110_v15, %v114_v16  ;;  %v122_v24 = vld [vmem:[#allocation5 + $0xe8] sm:$0xff] }
  0x43   :  { %v6594_v45 = vcombine.high %v133_v38, %v137_v40  ;;  %v6598_v46 = vcombine.high %v135_v41, %v139_v42  ;;  %v141_v47 = vld [vmem:[#allocation5 + $0x180] sm:$0xff]  ;;  %v143_v49 = vld [vmem:[#allocation5 + $0x190] sm:$0xff]  ;;  %v6593_v51 = vcombine.low %v133_v38, %v137_v40  ;;  %v6597_v52 = vcombine.low %v135_v41, %v139_v42  ;;  %v130_v31 = vld [vmem:[#allocation5 + $0x128] sm:$0xff] }
  0x44   :  { %524 = vmatpush1.bf16.msra.mxu1 %v6569_v27  ;;  %670 = vmatpush1.bf16.msra.mxu0 %v6573_v28  ;;  %v145_v48 = vld [vmem:[#allocation5 + $0x1a0] sm:$0xff]  ;;  %v147_v50 = vld [vmem:[#allocation5 + $0x1b0] sm:$0xff]  ;;  %v6580_v28 = vcombine.high %v118_v23, %v122_v24  ;;  %v6579_v34 = vcombine.low %v118_v23, %v122_v24  ;;  %v134_v38 = vld [vmem:[#allocation5 + $0x148] sm:$0xff] }
  0x45   :  { %525 = vmatprep.subr.bf16.mxu1 %v6578_v29  ;;  %671 = vmatprep.subr.bf16.mxu0 %v6582_v30  ;;  %v6602_v53 = vcombine.high %v141_v47, %v145_v48  ;;  %v6606_v54 = vcombine.high %v143_v49, %v147_v50  ;;  %v149_v55 = vld [vmem:[#allocation5 + $0x1c0] sm:$0xff]  ;;  %v151_v57 = vld [vmem:[#allocation5 + $0x1d0] sm:$0xff]  ;;  %v6601_v59 = vcombine.low %v141_v47, %v145_v48  ;;  %v126_v30 = vld [vmem:[#allocation5 + $0x108] sm:$0xff] }
  0x46   :  { %v153_v56 = vld [vmem:[#allocation5 + $0x1e0] sm:$0xff]  ;;  %v155_v58 = vld [vmem:[#allocation5 + $0x1f0] sm:$0xff]  ;;  %v6605_v60 = vcombine.low %v143_v49, %v147_v50  ;;  %v6587_v41 = vcombine.low %v126_v30, %v130_v31  ;;  %v88_v50 = vld [vmem:[%s10007_s0 + $0x38] sm:$0xff] }
  0x47   :  { %v6610_v61 = vcombine.high %v149_v55, %v153_v56  ;;  %v6614_v63 = vcombine.high %v151_v57, %v155_v58  ;;  %v81_v2 = vld [vmem:[%s10007_s0] sm:$0xff]  ;;  %v6609_v3 = vcombine.low %v149_v55, %v153_v56  ;;  %v6613_v5 = vcombine.low %v151_v57, %v155_v58  ;;  %v83_v18 = vld [vmem:[%s10007_s0 + $0x10] sm:$0xff]  ;;  %v116_v8 = vld [vmem:[#allocation5 + $0xb8] sm:$0xff] }
  0x48   :  { %526 = vmatpush1.bf16.msra.mxu1 %v6577_v35  ;;  %672 = vmatpush1.bf16.msra.mxu0 %v6581_v36  ;;  %v7262_v7 = vld [vmem:[#allocation8 + $0x4] ss:$16 sps:$4 sm:$0xff]   ;;  %v8125_v10 = vpack.c.bf16 %v82_v4, %v81_v2  ;;  %v7260_v12 = vld [vmem:[#allocation8] ss:$16 sps:$4 sm:$0xff]   ;;  %v8137_v25 = vpack.c.bf16 %v84_v19, %v83_v18  ;;  %v86_v35 = vld [vmem:[%s10007_s0 + $0x28] sm:$0xff]  ;;  %v6588_v36 = vcombine.high %v126_v30, %v130_v31 }
  0x49   :  { %527 = vmatprep.subr.bf16.mxu1 %v6586_v37  ;;  %673 = vmatprep.subr.bf16.mxu0 %v6590_v39  ;;  %v7265_v14 = vld [vmem:[#allocation8 + $0x24] ss:$16 sps:$4 sm:$0xff]   ;;  %v7263_v20 = vld [vmem:[#allocation8 + $0x20] ss:$16 sps:$4 sm:$0xff]   ;;  %v138_v39 = vld [vmem:[#allocation5 + $0x168] sm:$0xff] }
  0x4a   :  { %v7268_v22 = vld [vmem:[#allocation8 + $0x44] ss:$16 sps:$4 sm:$0xff]   ;;  %v7266_v27 = vld [vmem:[#allocation8 + $0x40] ss:$16 sps:$4 sm:$0xff]   ;;  %v6595_v49 = vcombine.low %v134_v38, %v138_v39  ;;  %v104_v2 = vld [vmem:[#allocation5 + $0x58] sm:$0xff] }
  0x4b   :  { %v7271_v29 = vld [vmem:[#allocation8 + $0x64] ss:$16 sps:$4 sm:$0xff]   ;;  %v7269_v32 = vld [vmem:[#allocation8 + $0x60] ss:$16 sps:$4 sm:$0xff]   ;;  %v120_v15 = vld [vmem:[#allocation5 + $0xd8] sm:$0xff] }
  0x4c   :  { %528 = vmatpush1.bf16.msra.mxu1 %v6585_v43  ;;  %674 = vmatpush1.bf16.msra.mxu0 %v6589_v44  ;;  %v85_v33 = vld [vmem:[%s10007_s0 + $0x20] sm:$0xff]  ;;  %v6596_v43 = vcombine.high %v134_v38, %v138_v39  ;;  %v87_v48 = vld [vmem:[%s10007_s0 + $0x30] sm:$0xff]  ;;  %v8180_v19 = vld [vmem:[%s10008_s1 + $0x38] sm:$0xff] }
  0x4d   :  { %529 = vmatprep.subr.bf16.mxu1 %v6594_v45  ;;  %675 = vmatprep.subr.bf16.mxu0 %v6598_v46  ;;  %v7274_v37 = vld [vmem:[#allocation8 + $0x84] ss:$16 sps:$4 sm:$0xff]   ;;  %v8149_v40 = vpack.c.bf16 %v86_v35, %v85_v33  ;;  %v7272_v42 = vld [vmem:[#allocation8 + $0x80] ss:$16 sps:$4 sm:$0xff]   ;;  %v142_v45 = vld [vmem:[#allocation5 + $0x188] sm:$0xff]  ;;  %v8161_v55 = vpack.c.bf16 %v88_v50, %v87_v48 }
  0x4e   :  { %v7277_v44 = vld [vmem:[#allocation8 + $0xa4] ss:$16 sps:$4 sm:$0xff]   ;;  %v146_v46 = vld [vmem:[#allocation5 + $0x1a8] sm:$0xff]  ;;  %v7275_v47 = vld [vmem:[#allocation8 + $0xa0] ss:$16 sps:$4 sm:$0xff]   ;;  %1497 = vperm.xlu1 %7259, %v8180_v19  }
  0x4f   :  { %v6603_v56 = vcombine.low %v142_v45, %v146_v46  ;;  %v7278_v57 = vld [vmem:[#allocation8 + $0xc0] ss:$16 sps:$4 sm:$0xff]   ;;  %v7286_v4 = vld [vmem:[#allocation10 + $0x4] ss:$16 sps:$4 sm:$0xff]   ;;  %v132_v23 = vld [vmem:[#allocation5 + $0x138] sm:$0xff] }
  0x50   :  { %530 = vmatpush1.bf16.msra.mxu1 %v6593_v51  ;;  %676 = vmatpush1.bf16.msra.mxu0 %v6597_v52  ;;  %v6604_v51 = vcombine.high %v142_v45, %v146_v46  ;;  %v7280_v52 = vld [vmem:[#allocation8 + $0xc4] ss:$16 sps:$4 sm:$0xff]   ;;  %v7284_v9 = vld [vmem:[#allocation10] ss:$16 sps:$4 sm:$0xff]   ;;  %v136_v31 = vld [vmem:[#allocation5 + $0x158] sm:$0xff] }
  0x51   :  { %531 = vmatprep.subr.bf16.mxu1 %v6602_v53  ;;  %677 = vmatprep.subr.bf16.mxu0 %v6606_v54  ;;  %v150_v53 = vld [vmem:[#allocation5 + $0x1c8] sm:$0xff]  ;;  %v7287_v18 = vld [vmem:[#allocation10 + $0x20] ss:$16 sps:$4 sm:$0xff]   ;;  %v144_v39 = vld [vmem:[#allocation5 + $0x198] sm:$0xff] }
  0x52   :  { %v154_v54 = vld [vmem:[#allocation5 + $0x1e8] sm:$0xff]  ;;  %v7290_v24 = vld [vmem:[#allocation10 + $0x40] ss:$16 sps:$4 sm:$0xff]   ;;  %v7307_v45 = vld [vmem:[#allocation10 + $0xa4] ss:$16 sps:$4 sm:$0xff]  }
  0x53   :  { %v6612_v58 = vcombine.high %v150_v53, %v154_v54  ;;  %v6611_v62 = vcombine.low %v150_v53, %v154_v54  ;;  %v7293_v33 = vld [vmem:[#allocation10 + $0x60] ss:$16 sps:$4 sm:$0xff]   ;;  %v152_v48 = vld [vmem:[#allocation5 + $0x1d8] sm:$0xff]  ;;  %v7313_v53 = vld [vmem:[#allocation10 + $0xc4] ss:$16 sps:$4 sm:$0xff]  }
  0x54   :  { %532 = vmatpush1.bf16.msra.mxu1 %v6601_v59  ;;  %678 = vmatpush1.bf16.msra.mxu0 %v6605_v60  ;;  %v7283_v59 = vld [vmem:[#allocation8 + $0xe4] ss:$16 sps:$4 sm:$0xff]   ;;  %v96_v60 = vld [vmem:[#allocation5 + $0x18] sm:$0xff]  ;;  %v7305_v50 = vld [vmem:[#allocation10 + $0xa0] ss:$16 sps:$4 sm:$0xff]  }
  0x55   :  { %533 = vmatprep.subr.bf16.mxu1 %v6610_v61  ;;  %679 = vmatprep.subr.bf16.mxu0 %v6614_v63  ;;  %v100_v61 = vld [vmem:[#allocation5 + $0x38] sm:$0xff]  ;;  %v7281_v63 = vld [vmem:[#allocation8 + $0xe0] ss:$16 sps:$4 sm:$0xff]  }
  0x56   :  { %v6560_v1 = vcombine.high %v96_v60, %v100_v61 }
  0x58   :  { %534 = vmatpush1.bf16.msra.mxu1 %v6609_v3  ;;  %680 = vmatpush1.bf16.msra.mxu0 %v6613_v5  ;;  %v108_v3 = vld [vmem:[#allocation5 + $0x78] sm:$0xff]  ;;  %v6559_v5 = vcombine.low %v96_v60, %v100_v61  ;;  %v7319_v60 = vld [vmem:[#allocation10 + $0xe4] ss:$16 sps:$4 sm:$0xff]  }
  0x59   :  { %592 = vmatprep.subr.bf16.mxu1 %v6556_v6  ;;  %1074 = vmatprep.subr.bf16.mxu0 %v7262_v7  ;;  %v6568_v6 = vcombine.high %v104_v2, %v108_v3  ;;  %v112_v7 = vld [vmem:[#allocation5 + $0x98] sm:$0xff] }
  0x5a   :  { %v6576_v16 = vcombine.high %v112_v7, %v116_v8 }
  0x5b   :  { %552 = vmatmul.mubr.bf16.vlgmr.msra.gmra.mrb[0].mxu1 %v8125_v10  ;;  %698 = vmatmul.mubr.bf16.vlgmr.msra.gmra.mrb[0].mxu0 %v8125_v10 }
  0x5c   :  { %593 = vmatpush1.bf16.msra.mxu1 %v6555_v11  ;;  %1075 = vmatpush1.bf16.msra.mxu0 %v7260_v12  ;;  %v8170_v11 = vld [vmem:[%s10008_s1] sm:$0xff] }
  0x5d   :  { %594 = vmatprep.subr.bf16.mxu1 %v6564_v13  ;;  %1076 = vmatprep.subr.bf16.mxu0 %v7265_v14  ;;  %v7289_v12 = vld [vmem:[#allocation10 + $0x24] ss:$16 sps:$4 sm:$0xff]   ;;  %v1485_v13 = vsub.f32 1.0, %v8170_v11  ;;  %v6567_v14 = vcombine.low %v104_v2, %v108_v3  ;;  %v8237_v3 = vld [vmem:[#allocation8 + $0x8] ss:$16 sps:$4 sm:$0xff]  }
  0x5e   :  { %561 = vmatprep.mubr.bf16.mxu1 %v10020_v0  ;;  %707 = vmatprep.mubr.bf16.mxu0 %v10020_v0  ;;  %v6815_v2 = vld [vmem:[%s10008_s1 + $0x20] sm:$0xff] }
  0x5f   :  { %1481 = vperm.xlu0 %7258, %v8170_v11  }
  0x60   :  { %595 = vmatpush1.bf16.msra.mxu1 %v6563_v17  ;;  %1077 = vmatpush1.bf16.msra.mxu0 %v7263_v20  ;;  %v124_v17 = vld [vmem:[#allocation5 + $0xf8] sm:$0xff]  ;;  %v7292_v20 = vld [vmem:[#allocation10 + $0x44] ss:$16 sps:$4 sm:$0xff]  }
  0x61   :  { %596 = vmatprep.subr.bf16.mxu1 %v6572_v21  ;;  %1078 = vmatprep.subr.bf16.mxu0 %v7268_v22  ;;  %v6575_v21 = vcombine.low %v112_v7, %v116_v8  ;;  %v128_v22 = vld [vmem:[#allocation5 + $0x118] sm:$0xff]  ;;  %v6583_v30 = vcombine.low %v120_v15, %v124_v17  ;;  %v3443_v7 = vsub.f32 1.0, %v6815_v2 }
  0x62   :  { %v6592_v35 = vcombine.high %v128_v22, %v132_v23  ;;  %v6591_v38 = vcombine.low %v128_v22, %v132_v23  ;;  %v8245_v8 = vld [vmem:[#allocation8 + $0x4c] ss:$16 sps:$4 sm:$0xff]   ;;  %v8302_v22 = vld [vmem:[#allocation10 + $0x8] ss:$16 sps:$4 sm:$0xff]  }
  0x63   :  { %562 = vmatmul.mubr.bf16.gmra.mrb[4].mxu1 %v8137_v25  ;;  %708 = vmatmul.mubr.bf16.gmra.mrb[4].mxu0 %v8137_v25  ;;  %v8307_v23 = vld [vmem:[#allocation10 + $0x2c] ss:$16 sps:$4 sm:$0xff]  }
  0x64   :  { %597 = vmatpush1.bf16.msra.mxu1 %v6571_v26  ;;  %1079 = vmatpush1.bf16.msra.mxu0 %v7266_v27  ;;  %v8188_v26 = vld [vmem:[%s10008_s1 + $0x8] sm:$0xff]  ;;  %v6584_v27 = vcombine.high %v120_v15, %v124_v17 }
  0x65   :  { %598 = vmatprep.subr.bf16.mxu1 %v6580_v28  ;;  %1080 = vmatprep.subr.bf16.mxu0 %v7271_v29  ;;  %v7295_v28 = vld [vmem:[#allocation10 + $0x64] ss:$16 sps:$4 sm:$0xff]   ;;  %v1501_v29 = vsub.f32 1.0, %v8180_v19  ;;  %v8266_v15 = vld [vmem:[#allocation8 + $0x88] ss:$16 sps:$4 sm:$0xff]  }
  0x66   :  { %571 = vmatprep.mubr.bf16.mxu1 %v10020_v0  ;;  %717 = vmatprep.mubr.bf16.mxu0 %v10020_v0  ;;  %v8277_v17 = vld [vmem:[#allocation8 + $0xcc] ss:$16 sps:$4 sm:$0xff]  }
  0x67   :  { %1488 = vperm.xlu0 %7258, %v1485_v13   ;;  %1504 = vperm.xlu1 %7259, %v1501_v29  }
  0x68   :  { %599 = vmatpush1.bf16.msra.mxu1 %v6579_v34  ;;  %1081 = vmatpush1.bf16.msra.mxu0 %v7269_v32  ;;  %v140_v32 = vld [vmem:[#allocation5 + $0x178] sm:$0xff]  ;;  %v8197_v34 = vld [vmem:[%s10008_s1 + $0x30] sm:$0xff] }
  0x69   :  { %600 = vmatprep.subr.bf16.mxu1 %v6588_v36  ;;  %1082 = vmatprep.subr.bf16.mxu0 %v7274_v37  ;;  %v7301_v36 = vld [vmem:[#allocation10 + $0x84] ss:$16 sps:$4 sm:$0xff]   ;;  %v2130_v37 = vsub.f32 1.0, %v8188_v26  ;;  %v2147_v46 = vsub.f32 1.0, %v8197_v34 }
  0x6b   :  { %572 = vmatmul.mubr.bf16.gmra.mrb[8].mxu1 %v8149_v40  ;;  %718 = vmatmul.mubr.bf16.gmra.mrb[8].mxu0 %v8149_v40 }
  0x6c   :  { %601 = vmatpush1.bf16.msra.mxu1 %v6587_v41  ;;  %1083 = vmatpush1.bf16.msra.mxu0 %v7272_v42  ;;  %v148_v41 = vld [vmem:[#allocation5 + $0x1b8] sm:$0xff]  ;;  %v7299_v42 = vld [vmem:[#allocation10 + $0x80] ss:$16 sps:$4 sm:$0xff]  }
  0x6d   :  { %602 = vmatprep.subr.bf16.mxu1 %v6596_v43  ;;  %1084 = vmatprep.subr.bf16.mxu0 %v7277_v44  ;;  %v8206_v43 = vld [vmem:[%s10008_s1 + $0x10] sm:$0xff]  ;;  %v6600_v44 = vcombine.high %v136_v31, %v140_v32 }
  0x6e   :  { %581 = vmatprep.mubr.bf16.mxu1 %v10020_v0  ;;  %727 = vmatprep.mubr.bf16.mxu0 %v10020_v0  ;;  %v2778_v54 = vsub.f32 1.0, %v8206_v43 }
  0x6f   :  { %2126 = vperm.xlu0 %7258, %v8188_v26   ;;  %2133 = vperm.xlu1 %7259, %v2130_v37  }
  0x70   :  { %603 = vmatpush1.bf16.msra.mxu1 %v6595_v49  ;;  %1085 = vmatpush1.bf16.msra.mxu0 %v7275_v47  ;;  %v6599_v47 = vcombine.low %v136_v31, %v140_v32  ;;  %v156_v49 = vld [vmem:[#allocation5 + $0x1f8] sm:$0xff]  ;;  %v6410_v31 = vld [vmem:[%s10010_s3 + $0x10] sm:$0xff] }
  0x71   :  { %604 = vmatprep.subr.bf16.mxu1 %v6604_v51  ;;  %1086 = vmatprep.subr.bf16.mxu0 %v7280_v52  ;;  %v8217_v51 = vld [vmem:[%s10008_s1 + $0x28] sm:$0xff]  ;;  %v6608_v52 = vcombine.high %v144_v39, %v148_v41 }
  0x72   :  { %v2795_v61 = vsub.f32 1.0, %v8217_v51  ;;  %v7349_v32 = vld [vmem:[#allocation10 + $0xac] ss:$16 sps:$4 sm:$0xff]  }
  0x73   :  { %582 = vmatmul.mubr.bf16.gmra.mrb[12].mxu1 %v8161_v55  ;;  %728 = vmatmul.mubr.bf16.gmra.mrb[12].mxu0 %v8161_v55 }
  0x74   :  { %605 = vmatpush1.bf16.msra.mxu1 %v6603_v56  ;;  %1087 = vmatpush1.bf16.msra.mxu0 %v7278_v57  ;;  %v6607_v56 = vcombine.low %v144_v39, %v148_v41  ;;  %v7311_v57 = vld [vmem:[#allocation10 + $0xc0] ss:$16 sps:$4 sm:$0xff]   ;;  %v8375_v39 = vld [vmem:[#allocation8 + $0x4] ss:$16 sps:$4 sm:$0xff]  }
  0x75   :  { %606 = vmatprep.subr.bf16.mxu1 %v6612_v58  ;;  %1088 = vmatprep.subr.bf16.mxu0 %v7283_v59  ;;  %v6814_v58 = vld [vmem:[%s10008_s1 + $0x18] sm:$0xff]  ;;  %v6616_v59 = vcombine.high %v152_v48, %v156_v49  ;;  %v8377_v41 = vld [vmem:[#allocation8] ss:$16 sps:$4 sm:$0xff]  }
  0x76   :  { %624 = vmatprep.mubr.bf16.mxu1 %v10020_v0  ;;  %1106 = vmatprep.mubr.bf16.mxu0 %v10020_v0 }
  0x77   :  { %2143 = vperm.xlu0 %7258, %v8197_v34   ;;  %2150 = vperm.xlu1 %7259, %v2147_v46  }
  0x78   :  { %607 = vmatpush1.bf16.msra.mxu1 %v6611_v62  ;;  %1089 = vmatpush1.bf16.msra.mxu0 %v7281_v63  ;;  %v8231_v62 = vld [vmem:[#allocation8 + $0xc] ss:$16 sps:$4 sm:$0xff]   ;;  %v6615_v63 = vcombine.low %v152_v48, %v156_v49  ;;  %v10019_v48 = vlaneseq  ;;  %v8399_v49 = vld [vmem:[#allocation8 + $0x84] ss:$16 sps:$4 sm:$0xff]  }
  0x79   :  { %738 = vmatprep.subr.bf16.mxu1 %v6560_v1  ;;  %1375 = vmatprep.subr.bf16.mxu0 %v7286_v4  ;;  %v7317_v1 = vld [vmem:[#allocation10 + $0xe0] ss:$16 sps:$4 sm:$0xff]   ;;  %v3426_v4 = vsub.f32 1.0, %v6814_v58 }
  0x7b   :  { %625 = vmatmul.mubr.bf16.vlgmr.msra.gmra.mrb[16].mxu1 %v8125_v10  ;;  %1107 = vmatmul.mubr.bf16.vlgmr.msra.gmra.mrb[16].mxu0 %v10020_v0 }
  0x7c   :  { %739 = vmatpush1.bf16.msra.mxu1 %v6559_v5  ;;  %634 = vmatprep.mubr.bf16.mxu1 %v10020_v0  ;;  %v8239_v5 = vld [vmem:[#allocation8 + $0x2c] ss:$16 sps:$4 sm:$0xff]  }
  0x7d   :  { %740 = vmatprep.subr.bf16.mxu1 %v6568_v6  ;;  %1376 = vmatpush1.bf16.msra.mxu0 %v7284_v9  ;;  %v8242_v6 = vld [vmem:[#allocation8 + $0x28] ss:$16 sps:$4 sm:$0xff]  }
  0x7e   :  { %1407 = vmatprep.mubr.bf16.mxu0 %v10020_v0  ;;  %1377 = vmatprep.subr.bf16.mxu0 %v7289_v12  ;;  %v8251_v9 = vld [vmem:[#allocation8 + $0x48] ss:$16 sps:$4 sm:$0xff]   ;;  %v8253_v12 = vld [vmem:[#allocation8 + $0x6c] ss:$16 sps:$4 sm:$0xff]  }
  0x7f   :  { %2774 = vperm.xlu0 %7258, %v8206_v43   ;;  %2781 = vperm.xlu1 %7259, %v2778_v54  }
  0x80   :  { %741 = vmatpush1.bf16.msra.mxu1 %v6567_v14  ;;  %v8261_v14 = vld [vmem:[#allocation8 + $0x8c] ss:$16 sps:$4 sm:$0xff]  }
  0x81   :  { %742 = vmatprep.subr.bf16.mxu1 %v6576_v16  ;;  %1378 = vmatpush1.bf16.msra.mxu0 %v7287_v18  ;;  %v8269_v16 = vld [vmem:[#allocation8 + $0xac] ss:$16 sps:$4 sm:$0xff]   ;;  %v8282_v18 = vld [vmem:[#allocation8 + $0xc8] ss:$16 sps:$4 sm:$0xff]  }
  0x82   :  { %1379 = vmatprep.subr.bf16.mxu0 %v7292_v20  ;;  %v8287_v20 = vld [vmem:[#allocation8 + $0xec] ss:$16 sps:$4 sm:$0xff]  }
  0x83   :  { %635 = vmatmul.mubr.bf16.gmra.mrb[20].mxu1 %v8137_v25  ;;  %2791 = vperm.xlu0 %7258, %v8217_v51  }
  0x84   :  { %743 = vmatpush1.bf16.msra.mxu1 %v6575_v21  ;;  %644 = vmatprep.mubr.bf16.mxu1 %v10020_v0  ;;  %v8297_v21 = vld [vmem:[#allocation10 + $0xc] ss:$16 sps:$4 sm:$0xff]  }
  0x85   :  { %744 = vmatprep.subr.bf16.mxu1 %v6584_v27  ;;  %1380 = vmatpush1.bf16.msra.mxu0 %v7290_v24  ;;  %v8314_v24 = vld [vmem:[#allocation10 + $0x28] ss:$16 sps:$4 sm:$0xff]   ;;  %v6412_v27 = vld [vmem:[%s10010_s3 + $0x20] sm:$0xff] }
  0x86   :  { %1381 = vmatprep.subr.bf16.mxu0 %v7295_v28  ;;  %2798 = vperm.xlu1 %7259, %v2795_v61   ;;  %v8328_v28 = vld [vmem:[#allocation10 + $0x48] ss:$16 sps:$4 sm:$0xff]  }
  0x87   :  { %3422 = vperm.xlu0 %7258, %v6814_v58  }
  0x88   :  { %745 = vmatpush1.bf16.msra.mxu1 %v6583_v30  ;;  %v8339_v30 = vld [vmem:[#allocation10 + $0x68] ss:$16 sps:$4 sm:$0xff]  }
  0x89   :  { %746 = vmatprep.subr.bf16.mxu1 %v6592_v35  ;;  %1382 = vmatpush1.bf16.msra.mxu0 %v7293_v33  ;;  %v6411_v33 = vld [vmem:[%s10010_s3 + $0x18] sm:$0xff] }
  0x8a   :  { %1383 = vmatprep.subr.bf16.mxu0 %v7301_v36  ;;  %3429 = vperm.xlu1 %7259, %v3426_v4   ;;  %v7352_v35 = vld [vmem:[#allocation10 + $0xcc] ss:$16 sps:$4 sm:$0xff]   ;;  %v7350_v36 = vld [vmem:[#allocation10 + $0xc8] ss:$16 sps:$4 sm:$0xff]  }
  0x8b   :  { %645 = vmatmul.mubr.bf16.gmra.mrb[24].mxu1 %v8149_v40  ;;  %3439 = vperm.xlu0 %7258, %v6815_v2  }
  0x8c   :  { %747 = vmatpush1.bf16.msra.mxu1 %v6591_v38  ;;  %654 = vmatprep.mubr.bf16.mxu1 %v10020_v0  ;;  %v7353_v38 = vld [vmem:[#allocation10 + $0xe8] ss:$16 sps:$4 sm:$0xff]  }
  0x8d   :  { %748 = vmatprep.subr.bf16.mxu1 %v6600_v44  ;;  %1384 = vmatpush1.bf16.msra.mxu0 %v7299_v42  ;;  %v8381_v42 = vld [vmem:[#allocation8 + $0x24] ss:$16 sps:$4 sm:$0xff]  }
  0x8e   :  { %1385 = vmatprep.subr.bf16.mxu0 %v7307_v45  ;;  %3446 = vperm.xlu1 %7259, %v3443_v7   ;;  %v8387_v44 = vld [vmem:[#allocation8 + $0x44] ss:$16 sps:$4 sm:$0xff]   ;;  %v8389_v45 = vld [vmem:[#allocation8 + $0x40] ss:$16 sps:$4 sm:$0xff]  }
  0x8f   :  { %4066 = vperm.xlu0 %7258, %v6815_v2  }
  0x90   :  { %749 = vmatpush1.bf16.msra.mxu1 %v6599_v47  ;;  %v8395_v47 = vld [vmem:[#allocation8 + $0x60] ss:$16 sps:$4 sm:$0xff]  }
  0x91   :  { %750 = vmatprep.subr.bf16.mxu1 %v6608_v52  ;;  %1386 = vmatpush1.bf16.msra.mxu0 %v7305_v50  ;;  %v8401_v50 = vld [vmem:[#allocation8 + $0x80] ss:$16 sps:$4 sm:$0xff]   ;;  %v8408_v52 = vld [vmem:[#allocation8 + $0xa4] ss:$16 sps:$4 sm:$0xff]  }
  0x92   :  { %1387 = vmatprep.subr.bf16.mxu0 %v7313_v53  ;;  %4073 = vperm.xlu1 %7259, %v3443_v7   ;;  %v8410_v53 = vld [vmem:[#allocation8 + $0xa0] ss:$16 sps:$4 sm:$0xff]  }
  0x93   :  { %655 = vmatmul.mubr.bf16.gmra.mrb[28].mxu1 %v8161_v55  ;;  %4083 = vperm.xlu0 %7258, %v6814_v58   ;;  %v8420_v58 = vld [vmem:[%s10014_s7] sm:$0xff] }
  0x94   :  { %751 = vmatpush1.bf16.msra.mxu1 %v6607_v56  ;;  %770 = vmatprep.mubr.bf16.mxu1 %v10020_v0 }
  0x95   :  { %752 = vmatprep.subr.bf16.mxu1 %v6616_v59  ;;  %1388 = vmatpush1.bf16.msra.mxu0 %v7311_v57  ;;  %v8422_v59 = vld [vmem:[#allocation8 + $0xc4] ss:$16 sps:$4 sm:$0xff]  }
  0x96   :  { %1389 = vmatprep.subr.bf16.mxu0 %v7319_v60  ;;  %4090 = vperm.xlu1 %7259, %v3426_v4   ;;  %v8424_v60 = vld [vmem:[#allocation8 + $0xc0] ss:$16 sps:$4 sm:$0xff]  }
  0x97   :  { %4710 = vperm.xlu0 %7258, %v8217_v51   ;;  %v8405_v51 = vshrl.u32 %v10019_v48, 7 }
  0x98   :  { %753 = vmatpush1.bf16.msra.mxu1 %v6615_v63 }
  0x99   :  { %1115 = vmatprep.subr.bf16.mxu1 %v8231_v62  ;;  %1390 = vmatpush1.bf16.msra.mxu0 %v7317_v1  ;;  %v161_v56 = vsub.s32 0, %v8405_v51  ;;  %v181_v57 = vsub.s32 5, %v8405_v51 }
  0x9a   :  { %4717 = vperm.xlu1 %7259, %v2795_v61   ;;  %1718 = vmatprep.subr.bf16.mxu0 %v8375_v39  ;;  %v165_v61 = vsub.s32 1, %v8405_v51 }
  0x9b   :  { %771 = vmatmul.mubr.bf16.vlgmr.msra.gmra.mrb[32].mxu1 %v8125_v10  ;;  %v8258_v10 = vld [vmem:[#allocation8 + $0x68] ss:$16 sps:$4 sm:$0xff]   ;;  %4727 = vperm.xlu0 %7258, %v8206_v43   ;;  %v8383_v43 = vld [vmem:[#allocation8 + $0x20] ss:$16 sps:$4 sm:$0xff]   ;;  %v8432_v63 = vrot.slane %v8420_v58, %v161_v56  ;;  %v8435_v1 = vrot.slane %v8420_v58, %v181_v57 }
  0x9c   :  { %1116 = vmatpush1.bf16.msra.mxu1 %v8237_v3  ;;  %780 = vmatprep.mubr.bf16.mxu1 %v10020_v0  ;;  %v8447_v7 = vrot.slane %v8420_v58, %v165_v61 }
  0x9d   :  { %1117 = vmatprep.subr.bf16.mxu1 %v8239_v5  ;;  %1408 = vmatmul.mubr.bf16.vlgmr.msra.gmra.mrb[20].mxu0 %v10020_v0 }
  0x9e   :  { %1750 = vmatprep.mubr.bf16.mxu0 %v10020_v0  ;;  %4734 = vperm.xlu1 %7259, %v2778_v54   ;;  %v177_v54 = vsub.s32 4, %v8405_v51 }
  0x9f   :  { %5354 = vperm.xlu0 %7258, %v8197_v34   ;;  %v7347_v34 = vld [vmem:[#allocation10 + $0xa8] ss:$16 sps:$4 sm:$0xff]   ;;  %1719 = vmatpush1.bf16.msra.mxu0 %v8377_v41 }
  0xa0   :  { %1118 = vmatpush1.bf16.msra.mxu1 %v8242_v6  ;;  %1720 = vmatprep.subr.bf16.mxu0 %v8381_v42 }
  0xa1   :  { %1119 = vmatprep.subr.bf16.mxu1 %v8245_v8 }
  0xa2   :  { %5361 = vperm.xlu1 %7259, %v2147_v46   ;;  %v8393_v46 = vld [vmem:[#allocation8 + $0x64] ss:$16 sps:$4 sm:$0xff]  }
  0xa3   :  { %781 = vmatmul.mubr.bf16.gmra.mrb[36].mxu1 %v8137_v25  ;;  %v8273_v25 = vld [vmem:[#allocation8 + $0xa8] ss:$16 sps:$4 sm:$0xff]   ;;  %5371 = vperm.xlu0 %7258, %v8188_v26   ;;  %v8320_v26 = vld [vmem:[#allocation10 + $0x4c] ss:$16 sps:$4 sm:$0xff]  }
  0xa4   :  { %1120 = vmatpush1.bf16.msra.mxu1 %v8251_v9  ;;  %790 = vmatprep.mubr.bf16.mxu1 %v10020_v0 }
  0xa5   :  { %1121 = vmatprep.subr.bf16.mxu1 %v8253_v12  ;;  %1721 = vmatpush1.bf16.msra.mxu0 %v8383_v43 }
  0xa6   :  { %5378 = vperm.xlu1 %7259, %v2130_v37   ;;  %v7355_v37 = vld [vmem:[#allocation10 + $0xec] ss:$16 sps:$4 sm:$0xff]   ;;  %1722 = vmatprep.subr.bf16.mxu0 %v8387_v44 }
  0xa7   :  { %6012 = vperm.xlu0 %7258, %v8170_v11   ;;  %v8332_v11 = vld [vmem:[#allocation10 + $0x6c] ss:$16 sps:$4 sm:$0xff]  }
  0xa8   :  { %1122 = vmatpush1.bf16.msra.mxu1 %v8258_v10 }
  0xa9   :  { %1123 = vmatprep.subr.bf16.mxu1 %v8261_v14  ;;  %1723 = vmatpush1.bf16.msra.mxu0 %v8389_v45 }
  0xaa   :  { %6019 = vperm.xlu1 %7259, %v1485_v13   ;;  %v6408_v13 = vld [vmem:[%s10010_s3] sm:$0xff]  ;;  %1724 = vmatprep.subr.bf16.mxu0 %v8393_v46 }
  0xab   :  { %791 = vmatmul.mubr.bf16.gmra.mrb[40].mxu1 %v8149_v40  ;;  %v8291_v40 = vld [vmem:[#allocation8 + $0xe8] ss:$16 sps:$4 sm:$0xff]   ;;  %5998 = vperm.xlu0 %7258, %v8180_v19   ;;  %v8344_v19 = vld [vmem:[#allocation10 + $0x8c] ss:$16 sps:$4 sm:$0xff]  }
  0xac   :  { %1124 = vmatpush1.bf16.msra.mxu1 %v8266_v15  ;;  %800 = vmatprep.mubr.bf16.mxu1 %v10020_v0 }
  0xad   :  { %1125 = vmatprep.subr.bf16.mxu1 %v8269_v16  ;;  %1725 = vmatpush1.bf16.msra.mxu0 %v8395_v47 }
  0xae   :  { %6005 = vperm.xlu1 %7259, %v1501_v29   ;;  %v8348_v29 = vld [vmem:[#allocation10 + $0x88] ss:$16 sps:$4 sm:$0xff]   ;;  %1726 = vmatprep.subr.bf16.mxu0 %v8399_v49 }
  0xb0   :  { %1126 = vmatpush1.bf16.msra.mxu1 %v8273_v25 }
  0xb1   :  { %1127 = vmatprep.subr.bf16.mxu1 %v8277_v17  ;;  %1727 = vmatpush1.bf16.msra.mxu0 %v8401_v50 }
  0xb2   :  { %6417 = vperm.xlu1 %7259, %v6408_v13   ;;  %1728 = vmatprep.subr.bf16.mxu0 %v8408_v52 }
  0xb3   :  { %801 = vmatmul.mubr.bf16.gmra.mrb[44].mxu1 %v8161_v55  ;;  %v6409_v55 = vld [vmem:[%s10010_s3 + $0x8] sm:$0xff] }
  0xb4   :  { %1128 = vmatpush1.bf16.msra.mxu1 %v8282_v18  ;;  %1147 = vmatprep.mubr.bf16.mxu1 %v10020_v0 }
  0xb5   :  { %1129 = vmatprep.subr.bf16.mxu1 %v8287_v20  ;;  %6420 = vperm.xlu0 %7258, %v6409_v55  }
  0xb6   :  { %6423 = vperm.xlu1 %7259, %v6410_v31   ;;  %1729 = vmatpush1.bf16.msra.mxu0 %v8410_v53 }
  0xb7   :  { %1730 = vmatprep.subr.bf16.mxu0 %v8422_v59 }
  0xb8   :  { %1130 = vmatpush1.bf16.msra.mxu1 %v8291_v40 }
  0xb9   :  { %1416 = vmatprep.subr.bf16.mxu1 %v8297_v21  ;;  %6429 = vperm.xlu0 %7258, %v6412_v27  }
  0xba   :  { %6426 = vperm.xlu1 %7259, %v6411_v33   ;;  %1731 = vmatpush1.bf16.msra.mxu0 %v8424_v60 }
  0xbb   :  { %1148 = vmatmul.mubr.bf16.vlgmr.msra.gmra.mrb[48].mxu1 %v10020_v0 }
  0xbc   :  { %1417 = vmatpush1.bf16.msra.mxu1 %v8302_v22  ;;  %1448 = vmatprep.mubr.bf16.mxu1 %v10020_v0 }
  0xbd   :  { %1418 = vmatprep.subr.bf16.mxu1 %v8307_v23 }
  0xc0   :  { %1419 = vmatpush1.bf16.msra.mxu1 %v8314_v24 }
  0xc1   :  { %1420 = vmatprep.subr.bf16.mxu1 %v8320_v26 }
  0xc4   :  { %1421 = vmatpush1.bf16.msra.mxu1 %v8328_v28 }
  0xc5   :  { %1422 = vmatprep.subr.bf16.mxu1 %v8332_v11 }
  0xc8   :  { %1423 = vmatpush1.bf16.msra.mxu1 %v8339_v30 }
  0xc9   :  { %1424 = vmatprep.subr.bf16.mxu1 %v8344_v19 }
  0xcc   :  { %1425 = vmatpush1.bf16.msra.mxu1 %v8348_v29 }
  0xcd   :  { %1426 = vmatprep.subr.bf16.mxu1 %v7349_v32 }
  0xd0   :  { %1427 = vmatpush1.bf16.msra.mxu1 %v7347_v34 }
  0xd1   :  { %1428 = vmatprep.subr.bf16.mxu1 %v7352_v35 }
  0xd4   :  { %1429 = vmatpush1.bf16.msra.mxu1 %v7350_v36 }
  0xd5   :  { %1430 = vmatprep.subr.bf16.mxu1 %v7355_v37 }
  0xd8   :  { %1431 = vmatpush1.bf16.msra.mxu1 %v7353_v38 }
  0xd9   :  { %1759 = vmatprep.subr.bf16.mxu1 %v8231_v62  ;;  %v8428_v62 = vrot.slane %v8420_v58, %v177_v54 }
  0xdb   :  { %1449 = vmatmul.mubr.bf16.vlgmr.msra.gmra.mrb[52].mxu1 %v10020_v0 }
  0xdc   :  { %1760 = vmatpush1.bf16.msra.mxu1 %v8237_v3  ;;  %1791 = vmatprep.mubr.bf16.mxu1 %v10020_v0  ;;  %v8440_v3 = vld [vmem:[#allocation8 + $0xe4] ss:$16 sps:$4 sm:$0xff]  }
  0xdd   :  { %1761 = vmatprep.subr.bf16.mxu1 %v8239_v5  ;;  %1732 = vmatprep.subr.bf16.mxu0 %v8440_v3 }
  0xe0   :  { %1762 = vmatpush1.bf16.msra.mxu1 %v8242_v6  ;;  %v8444_v6 = vld [vmem:[#allocation8 + $0xe0] ss:$16 sps:$4 sm:$0xff]  }
  0xe1   :  { %1763 = vmatprep.subr.bf16.mxu1 %v8245_v8  ;;  %1733 = vmatpush1.bf16.msra.mxu0 %v8444_v6 }
  0xe4   :  { %1764 = vmatpush1.bf16.msra.mxu1 %v8251_v9 }
  0xe5   :  { %1765 = vmatprep.subr.bf16.mxu1 %v8253_v12 }
  0xe8   :  { %1766 = vmatpush1.bf16.msra.mxu1 %v8258_v10 }
  0xe9   :  { %1767 = vmatprep.subr.bf16.mxu1 %v8261_v14 }
  0xec   :  { %1768 = vmatpush1.bf16.msra.mxu1 %v8266_v15 }
  0xed   :  { %1769 = vmatprep.subr.bf16.mxu1 %v8269_v16 }
  0xf0   :  { %1770 = vmatpush1.bf16.msra.mxu1 %v8273_v25 }
  0xf1   :  { %1771 = vmatprep.subr.bf16.mxu1 %v8277_v17 }
  0xf4   :  { %1772 = vmatpush1.bf16.msra.mxu1 %v8282_v18 }
  0xf5   :  { %1773 = vmatprep.subr.bf16.mxu1 %v8287_v20  ;;  %v8466_v20 = vld [vmem:[#allocation10 + $0x4] ss:$16 sps:$4 sm:$0xff]  }
  0xf6   :  { %2020 = vmatprep.subr.bf16.mxu0 %v8466_v20 }
  0xf8   :  { %1774 = vmatpush1.bf16.msra.mxu1 %v8291_v40 }
  0xf9   :  { %2061 = vmatprep.subr.bf16.mxu1 %v8297_v21 }
 0x12e   :  { %v8438_v2 = vpop.f32.mrb[0].mxu1  ;;  %v699_v5 = vpop.f32.mrb[0].mxu0 }
 0x12f   :  { %v8442_v4 = vpop.f32.mrb[1].mxu1  ;;  %v8450_v9 = vadd.f32 %v699_v5, %v8428_v62  ;;  %v701_v12 = vpop.f32.mrb[1].mxu0 }
 0x130   :  { %v557_v8 = vpop.f32.mrb[2].mxu1  ;;  %v8457_v15 = vadd.f32 %v701_v12, %v8435_v1  ;;  %v703_v16 = vpop.f32.mrb[2].mxu0 }
 0x131   :  { %10050 = vst [vmem:[#allocation15_spill] sm:$0xff] %v8450_v9  ;;  %v8454_v10 = vadd.f32 %v557_v8, %v8432_v63  ;;  %v559_v14 = vpop.f32.mrb[3].mxu1  ;;  %v8464_v17 = vadd.f32 %v703_v16, %v8428_v62  ;;  %v705_v18 = vpop.f32.mrb[3].mxu0 }
 0x132   :  { %10051 = vst [vmem:[#allocation16_spill] sm:$0xff] %v8457_v15  ;;  %v8461_v25 = vadd.f32 %v559_v14, %v8447_v7  ;;  %v8469_v40 = vadd.f32 %v705_v18, %v8435_v1 }
 0x133   :  { %10052 = vst [vmem:[#allocation17_spill] sm:$0xff] %v8464_v17 }
 0x134   :  { %10053 = vst [vmem:[#allocation18_spill] sm:$0xff] %v8469_v40 }
 0x136   :  { %v563_v21 = vpop.f32.mrb[4].mxu1  ;;  %v709_v13 = vpop.f32.mrb[4].mxu0 }
 0x137   :  { %v8473_v55 = vadd.f32 %v563_v21, %v8432_v63  ;;  %v565_v27 = vpop.f32.mrb[5].mxu1  ;;  %v8479_v33 = vadd.f32 %v709_v13, %v8428_v62  ;;  %v711_v34 = vpop.f32.mrb[5].mxu0 }
 0x138   :  { %v8476_v31 = vadd.f32 %v565_v27, %v8447_v7  ;;  %v567_v32 = vpop.f32.mrb[6].mxu1  ;;  %v8485_v37 = vadd.f32 %v711_v34, %v8435_v1  ;;  %v713_v38 = vpop.f32.mrb[6].mxu0 }
 0x139   :  { %10054 = vst [vmem:[#allocation19_spill] sm:$0xff] %v8473_v55  ;;  %10056 = vst [vmem:[#allocation21_spill] sm:$0xff] %v8479_v33  ;;  %v8482_v35 = vadd.f32 %v567_v32, %v8432_v63  ;;  %v569_v36 = vpop.f32.mrb[7].mxu1  ;;  %v8491_v56 = vadd.f32 %v713_v38, %v8428_v62  ;;  %v715_v57 = vpop.f32.mrb[7].mxu0 }
 0x13a   :  { %10055 = vst [vmem:[#allocation20_spill] sm:$0xff] %v8476_v31  ;;  %10058 = vst [vmem:[#allocation23_spill] sm:$0xff] %v8485_v37  ;;  %v8488_v54 = vadd.f32 %v569_v36, %v8447_v7  ;;  %v8494_v61 = vadd.f32 %v715_v57, %v8435_v1 }
 0x13b   :  { %10057 = vst [vmem:[#allocation22_spill] sm:$0xff] %v8482_v35  ;;  %10060 = vst [vmem:[#allocation25_spill] sm:$0xff] %v8491_v56 }
 0x13c   :  { %10059 = vst [vmem:[#allocation24_spill] sm:$0xff] %v8488_v54  ;;  %10061 = vst [vmem:[#allocation26_spill] sm:$0xff] %v8494_v61 }
 0x13e   :  { %v573_v5 = vpop.f32.mrb[8].mxu1  ;;  %v719_v14 = vpop.f32.mrb[8].mxu0 }
 0x13f   :  { %v8497_v8 = vadd.f32 %v573_v5, %v8432_v63  ;;  %v575_v12 = vpop.f32.mrb[9].mxu1  ;;  %v8503_v21 = vadd.f32 %v719_v14, %v8428_v62  ;;  %v721_v27 = vpop.f32.mrb[9].mxu0 }
 0x140   :  { %v8500_v16 = vadd.f32 %v575_v12, %v8447_v7  ;;  %v577_v18 = vpop.f32.mrb[10].mxu1  ;;  %v8509_v34 = vadd.f32 %v721_v27, %v8435_v1  ;;  %v723_v36 = vpop.f32.mrb[10].mxu0 }
 0x141   :  { %10062 = vst [vmem:[#allocation27_spill] sm:$0xff] %v8497_v8  ;;  %10064 = vst [vmem:[#allocation29_spill] sm:$0xff] %v8503_v21  ;;  %v8506_v13 = vadd.f32 %v577_v18, %v8432_v63  ;;  %v579_v32 = vpop.f32.mrb[11].mxu1  ;;  %v8515_v57 = vadd.f32 %v723_v36, %v8428_v62  ;;  %v725_v5 = vpop.f32.mrb[11].mxu0 }
 0x142   :  { %10063 = vst [vmem:[#allocation28_spill] sm:$0xff] %v8500_v16  ;;  %10066 = vst [vmem:[#allocation31_spill] sm:$0xff] %v8509_v34  ;;  %v8512_v38 = vadd.f32 %v579_v32, %v8447_v7  ;;  %v8518_v12 = vadd.f32 %v725_v5, %v8435_v1 }
 0x143   :  { %10065 = vst [vmem:[#allocation30_spill] sm:$0xff] %v8506_v13  ;;  %10068 = vst [vmem:[#allocation33_spill] sm:$0xff] %v8515_v57 }
 0x144   :  { %10067 = vst [vmem:[#allocation32_spill] sm:$0xff] %v8512_v38  ;;  %10069 = vst [vmem:[#allocation34_spill] sm:$0xff] %v8518_v12 }
 0x146   :  { %v583_v14 = vpop.f32.mrb[12].mxu1  ;;  %v729_v0 = vpop.f32.mrb[12].mxu0 }
 0x147   :  { %v8521_v48 = vadd.f32 %v583_v14, %v8432_v63  ;;  %v585_v18 = vpop.f32.mrb[13].mxu1  ;;  %v8527_v32 = vadd.f32 %v729_v0, %v8428_v62  ;;  %v731_v9 = vpop.f32.mrb[13].mxu0  ;;  %v169_v14 = vsub.s32 2, %v8405_v51 }
 0x148   :  { %v8524_v27 = vadd.f32 %v585_v18, %v8447_v7  ;;  %v587_v15 = vpop.f32.mrb[14].mxu1  ;;  %v8533_v5 = vadd.f32 %v731_v9, %v8435_v1  ;;  %v733_v17 = vpop.f32.mrb[14].mxu0  ;;  %v556_v9 = vadd.f32 %v8442_v4, %v8447_v7 }
 0x149   :  { %10070 = vst [vmem:[#allocation35_spill] sm:$0xff] %v8521_v48  ;;  %v8530_v36 = vadd.f32 %v587_v15, %v8432_v63  ;;  %v589_v40 = vpop.f32.mrb[15].mxu1  ;;  %v735_v18 = vpop.f32.mrb[15].mxu0  ;;  %v8541_v0 = vrot.slane %v8420_v58, %v169_v14  ;;  %v554_v15 = vadd.f32 %v8438_v2, %v8432_v63 }
 0x14a   :  { %10071 = vst [vmem:[#allocation36_spill] sm:$0xff] %v8524_v27  ;;  %v8537_v48 = vadd.f32 %v589_v40, %v8447_v7  ;;  %v173_v27 = vsub.s32 3, %v8405_v51 }
 0x14b   :  { %10072 = vst [vmem:[#allocation37_spill] sm:$0xff] %v8530_v36 }
 0x14c   :  { %10073 = vst [vmem:[#allocation38_spill] sm:$0xff] %v8537_v48  ;;  %v8554_v40 = vrot.slane %v8420_v58, %v173_v27 }
 0x14e   :  { %v8545_v36 = vpop.f32.mrb[16].mxu1  ;;  %v1108_v37 = vpop.f32.mrb[16].mxu0 }
 0x14f   :  { %v8549_v33 = vpop.f32.mrb[17].mxu1  ;;  %v8551_v38 = vadd.f32 %v1108_v37, %v554_v15  ;;  %v1110_v48 = vpop.f32.mrb[17].mxu0 }
 0x150   :  { %v630_v13 = vpop.f32.mrb[18].mxu1  ;;  %v8556_v14 = vadd.f32 %v1110_v48, %v556_v9  ;;  %v1112_v2 = vpop.f32.mrb[18].mxu0 }
 0x151   :  { %v8559_v61 = vadd.f32 %v630_v13, %v8541_v0  ;;  %v632_v63 = vpop.f32.mrb[19].mxu1  ;;  %v1113_v4 = vpop.f32.mrb[19].mxu0 }
 0x152   :  { %v8562_v56 = vadd.f32 %v632_v63, %v8554_v40 }
 0x156   :  { %v636_v7 = vpop.f32.mrb[20].mxu1 }
 0x157   :  { %v8565_v37 = vadd.f32 %v636_v7, %v8541_v0  ;;  %v638_v15 = vpop.f32.mrb[21].mxu1 }
 0x158   :  { %v8568_v27 = vadd.f32 %v638_v15, %v8554_v40  ;;  %v640_v16 = vpop.f32.mrb[22].mxu1 }
 0x159   :  { %10074 = vst [vmem:[#allocation39_spill] sm:$0xff] %v8565_v37  ;;  %v8571_v48 = vadd.f32 %v640_v16, %v8541_v0  ;;  %v642_v13 = vpop.f32.mrb[23].mxu1 }
 0x15a   :  { %10075 = vst [vmem:[#allocation40_spill] sm:$0xff] %v8568_v27  ;;  %v8574_v9 = vadd.f32 %v642_v13, %v8554_v40 }
 0x15b   :  { %10076 = vst [vmem:[#allocation41_spill] sm:$0xff] %v8571_v48 }
 0x15c   :  { %10077 = vst [vmem:[#allocation42_spill] sm:$0xff] %v8574_v9 }
 0x15e   :  { %v646_v2 = vpop.f32.mrb[24].mxu1 }
 0x15f   :  { %v8577_v63 = vadd.f32 %v646_v2, %v8541_v0  ;;  %v648_v4 = vpop.f32.mrb[25].mxu1  ;;  %v185_v2 = vsub.s32 6, %v8405_v51 }
 0x160   :  { %v8580_v7 = vadd.f32 %v648_v4, %v8554_v40  ;;  %v650_v8 = vpop.f32.mrb[26].mxu1 }
 0x161   :  { %10078 = vst [vmem:[#allocation43_spill] sm:$0xff] %v8577_v63  ;;  %v8583_v15 = vadd.f32 %v650_v8, %v8541_v0  ;;  %v652_v34 = vpop.f32.mrb[27].mxu1 }
 0x162   :  { %10079 = vst [vmem:[#allocation44_spill] sm:$0xff] %v8580_v7  ;;  %v8586_v16 = vadd.f32 %v652_v34, %v8554_v40  ;;  %v189_v7 = vsub.s32 7, %v8405_v51 }
 0x163   :  { %10080 = vst [vmem:[#allocation45_spill] sm:$0xff] %v8583_v15 }
 0x164   :  { %10081 = vst [vmem:[#allocation46_spill] sm:$0xff] %v8586_v16  ;;  %v8603_v16 = vrot.slane %v8420_v58, %v185_v2 }
 0x166   :  { %v656_v21 = vpop.f32.mrb[28].mxu1 }
 0x167   :  { %v8589_v13 = vadd.f32 %v656_v21, %v8541_v0  ;;  %v658_v9 = vpop.f32.mrb[29].mxu1  ;;  %v8606_v21 = vrot.slane %v8420_v58, %v189_v7 }
 0x168   :  { %v8593_v63 = vadd.f32 %v658_v9, %v8554_v40  ;;  %v660_v4 = vpop.f32.mrb[30].mxu1  ;;  %v736_v9 = vadd.f32 %v735_v18, %v8435_v1 }
 0x169   :  { %10082 = vst [vmem:[#allocation47_spill] sm:$0xff] %v8589_v13  ;;  %v8597_v8 = vadd.f32 %v660_v4, %v8541_v0  ;;  %v662_v15 = vpop.f32.mrb[31].mxu1  ;;  %v734_v13 = vadd.f32 %v733_v17, %v8428_v62 }
 0x16a   :  { %10083 = vst [vmem:[#allocation48_spill] sm:$0xff] %v8593_v63  ;;  %v8600_v34 = vadd.f32 %v662_v15, %v8554_v40 }
 0x16b   :  { %10084 = vst [vmem:[#allocation49_spill] sm:$0xff] %v8597_v8 }
 0x16c   :  { %10085 = vst [vmem:[#allocation50_spill] sm:$0xff] %v8600_v34 }
 0x16e   :  { %v772_v63 = vpop.f32.mrb[32].mxu1 }
 0x16f   :  { %v8611_v51 = vadd.f32 %v772_v63, %v8603_v16  ;;  %v774_v4 = vpop.f32.mrb[33].mxu1 }
 0x170   :  { %v8614_v8 = vadd.f32 %v774_v4, %v8606_v21  ;;  %v776_v15 = vpop.f32.mrb[34].mxu1  ;;  %v1409_v34 = vpop.f32.mrb[20].mxu0 }
 0x171   :  { %10086 = vst [vmem:[#allocation51_spill] sm:$0xff] %v8611_v51  ;;  %v8617_v2 = vadd.f32 %v776_v15, %v8603_v16  ;;  %v778_v54 = vpop.f32.mrb[35].mxu1  ;;  %v1457_v58 = vadd.f32 %v1409_v34, %v734_v13  ;;  %v1411_v7 = vpop.f32.mrb[21].mxu0 }
 0x172   :  { %10087 = vst [vmem:[#allocation52_spill] sm:$0xff] %v8614_v8  ;;  %v8620_v62 = vadd.f32 %v778_v54, %v8606_v21  ;;  %v1458_v1 = vadd.f32 %v1411_v7, %v736_v9  ;;  %v1413_v17 = vpop.f32.mrb[22].mxu0 }
 0x173   :  { %10088 = vst [vmem:[#allocation53_spill] sm:$0xff] %v8617_v2  ;;  %v1414_v18 = vpop.f32.mrb[23].mxu0 }
 0x174   :  { %10089 = vst [vmem:[#allocation54_spill] sm:$0xff] %v8620_v62  ;;  %v1164_v62 = vmul.f32 0.5, %v8556_v14  ;;  %v629_v14 = vadd.f32 %v8549_v33, %v8554_v40 }
 0x176   :  { %v782_v63 = vpop.f32.mrb[36].mxu1  ;;  %7717 = vtanh.f32 %v1164_v62 }
 0x177   :  { %v8623_v51 = vadd.f32 %v782_v63, %v8603_v16  ;;  %v784_v4 = vpop.f32.mrb[37].mxu1 }
 0x178   :  { %v8626_v8 = vadd.f32 %v784_v4, %v8606_v21  ;;  %v786_v48 = vpop.f32.mrb[38].mxu1 }
 0x179   :  { %10090 = vst [vmem:[#allocation55_spill] sm:$0xff] %v8623_v51  ;;  %v8629_v15 = vadd.f32 %v786_v48, %v8603_v16  ;;  %v788_v13 = vpop.f32.mrb[39].mxu1 }
 0x17a   :  { %10091 = vst [vmem:[#allocation56_spill] sm:$0xff] %v8626_v8  ;;  %v8632_v34 = vadd.f32 %v788_v13, %v8606_v21  ;;  %v1160_v13 = vmul.f32 0.5, %v8551_v38 }
 0x17b   :  { %10092 = vst [vmem:[#allocation57_spill] sm:$0xff] %v8629_v15 }
 0x17c   :  { %10093 = vst [vmem:[#allocation58_spill] sm:$0xff] %v8632_v34  ;;  %7719 = vtanh.f32 %v1160_v13  ;;  %v8658_v13 = vpop.permute.xlu0 %1481 }
 0x17e   :  { %v792_v54 = vpop.f32.mrb[40].mxu1 }
 0x17f   :  { %v8635_v9 = vadd.f32 %v792_v54, %v8603_v16  ;;  %v794_v7 = vpop.f32.mrb[41].mxu1 }
 0x180   :  { %v8638_v17 = vadd.f32 %v794_v7, %v8606_v21  ;;  %v796_v18 = vpop.f32.mrb[42].mxu1  ;;  %v1489_v40 = vpop.permute.xlu0 %1488 }
 0x181   :  { %10094 = vst [vmem:[#allocation59_spill] sm:$0xff] %v8635_v9  ;;  %v8641_v63 = vadd.f32 %v796_v18, %v8603_v16  ;;  %v798_v4 = vpop.f32.mrb[43].mxu1 }
 0x182   :  { %10095 = vst [vmem:[#allocation60_spill] sm:$0xff] %v8638_v17  ;;  %v8644_v48 = vadd.f32 %v798_v4, %v8606_v21  ;;  %v627_v4 = vadd.f32 %v8545_v36, %v8541_v0 }
 0x183   :  { %10096 = vst [vmem:[#allocation61_spill] sm:$0xff] %v8641_v63 }
 0x184   :  { %10097 = vst [vmem:[#allocation62_spill] sm:$0xff] %v8644_v48 }
 0x186   :  { %v802_v2 = vpop.f32.mrb[44].mxu1 }
 0x187   :  { %v8649_v54 = vadd.f32 %v802_v2, %v8603_v16  ;;  %v804_v8 = vpop.f32.mrb[45].mxu1  ;;  %v7718_v2 = vpop.eup %7717 }
 0x188   :  { %v8652_v7 = vadd.f32 %v804_v8, %v8606_v21  ;;  %v806_v51 = vpop.f32.mrb[46].mxu1  ;;  %v7720_v35 = vpop.eup %7719  ;;  %v1166_v8 = vmul.f32 0.5, %v7718_v2 }
 0x189   :  { %v808_v18 = vpop.f32.mrb[47].mxu1  ;;  %v1162_v12 = vmul.f32 0.5, %v7720_v35 }
 0x18a   :  { %v1167_v63 = vadd.f32 0.5, %v1166_v8 }
 0x18b   :  { %v1163_v36 = vadd.f32 0.5, %v1162_v12 }
 0x18c   :  { %v1173_v57 = vmul.f32 0.0, %v1167_v63  ;;  %v807_v63 = vadd.f32 %v806_v51, %v8603_v16  ;;  %v8672_v16 = vld [vmem:[#allocation10 + $0x24] ss:$16 sps:$4 sm:$0xff]  }
 0x18e   :  { %v1149_v34 = vpop.f32.mrb[48].mxu1 }
 0x18f   :  { %v1158_v38 = vadd.f32 %v1149_v34, %v627_v4  ;;  %v1151_v15 = vpop.f32.mrb[49].mxu1  ;;  %v1491_v34 = vmul.f32 0.0, %v1489_v40 }
 0x190   :  { %v1159_v62 = vadd.f32 %v1151_v15, %v629_v14  ;;  %v1153_v17 = vpop.f32.mrb[50].mxu1  ;;  %v1465_v14 = vmul.f32 0.5, %v1458_v1 }
 0x191   :  { %7721 = vtanh.f32 %v1158_v38  ;;  %v1154_v9 = vpop.f32.mrb[51].mxu1  ;;  %v1461_v38 = vmul.f32 0.5, %v1457_v58  ;;  %v8668_v58 = vld [vmem:[#allocation10] ss:$16 sps:$4 sm:$0xff]  }
 0x192   :  { %v1169_v48 = vmul.f32 0.5, %v1159_v62 }
 0x194   :  { %7723 = vtanh.f32 %v1169_v48 }
 0x19b   :  { %v7722_v0 = vpop.eup %7721 }
 0x19c   :  { %v1174_v33 = vmul.f32 %v7722_v0, %v1163_v36 }
 0x19e   :  { %v1175_v4 = vadd.f32 %v1174_v33, %v1173_v57  ;;  %v7724_v17 = vpop.eup %7723  ;;  %v809_v57 = vadd.f32 %v808_v18, %v8606_v21 }
 0x19f   :  { %v1171_v35 = vmul.f32 0.5, %v7724_v17 }
 0x1a0   :  { %7725 = vtanh.f32 %v1175_v4  ;;  %v1493_v15 = vmul.f32 %v8658_v13, %v1175_v4 }
 0x1a1   :  { %7727 = vtanh.f32 %v1465_v14  ;;  %v1172_v62 = vadd.f32 0.5, %v1171_v35  ;;  %v8680_v14 = vld [vmem:[#allocation10 + $0x44] ss:$16 sps:$4 sm:$0xff]   ;;  %v10098_v35 = vmov 0  }
 0x1a2   :  { %v8661_v9 = vadd.f32 %v1493_v15, %v1491_v34  ;;  %7729 = vtanh.f32 %v1461_v38 }
 0x1aa   :  { %v7726_v48 = vpop.eup %7725 }
 0x1ab   :  { %v1177_v12 = vmul.f32 %v7726_v48, %v1172_v62  ;;  %v7728_v4 = vpop.eup %7727  ;;  %v8684_v62 = vpop.permute.xlu1 %1497 }
 0x1ac   :  { %v7730_v51 = vpop.eup %7729  ;;  %v1467_v21 = vmul.f32 0.5, %v7728_v4 }
 0x1ad   :  { %v1484_v2 = vmul.f32 %v8658_v13, %v1177_v12  ;;  %v1463_v38 = vmul.f32 0.5, %v7730_v51 }
 0x1ae   :  { %v1450_v8 = vpop.f32.mrb[52].mxu1  ;;  %v1468_v48 = vadd.f32 0.5, %v1467_v21  ;;  %v8725_v21 = vld [vmem:[#allocation10 + $0xcc] ss:$16 sps:$4 sm:$0xff]  }
 0x1af   :  { %v8666_v36 = vadd.f32 %v1491_v34, %v1484_v2  ;;  %v1459_v0 = vadd.f32 %v1450_v8, %v807_v63  ;;  %v1452_v33 = vpop.f32.mrb[53].mxu1  ;;  %v8676_v34 = vld [vmem:[#allocation10 + $0x20] ss:$16 sps:$4 sm:$0xff]   ;;  %v1464_v12 = vadd.f32 0.5, %v1463_v38 }
 0x1b0   :  { %v1460_v40 = vadd.f32 %v1452_v33, %v809_v57  ;;  %v1454_v1 = vpop.f32.mrb[54].mxu1  ;;  %v1474_v2 = vmul.f32 0.0, %v1468_v48  ;;  %v8696_v8 = vld [vmem:[#allocation10 + $0x60] ss:$16 sps:$4 sm:$0xff]   ;;  %v8735_v48 = vld [vmem:[#allocation10 + $0xe4] ss:$16 sps:$4 sm:$0xff]  }
 0x1b1   :  { %7731 = vtanh.f32 %v1459_v0  ;;  %v1455_v15 = vpop.f32.mrb[55].mxu1  ;;  %v1525_v17 = vpack.c.bf16 %v8666_v36, %v8666_v36  ;;  %v1505_v0 = vpop.permute.xlu1 %1504  ;;  %v8709_v1 = vld [vmem:[#allocation10 + $0xa4] ss:$16 sps:$4 sm:$0xff]  }
 0x1b2   :  { %v1470_v18 = vmul.f32 0.5, %v1460_v40  ;;  %v8704_v40 = vld [vmem:[#allocation10 + $0x80] ss:$16 sps:$4 sm:$0xff]  }
 0x1b3   :  { %1751 = vmatmul.mubr.bf16.vlgmr.msra.gmra.mrb[24].mxu0 %v1525_v17  ;;  %1792 = vmatmul.mubr.bf16.vlgmr.msra.gmra.mrb[56].mxu1 %v1525_v17  ;;  %v8719_v17 = vld [vmem:[#allocation10 + $0xa8] ss:$16 sps:$4 sm:$0xff]  }
 0x1b4   :  { %2021 = vmatpush1.bf16.msra.mxu0 %v8668_v58  ;;  %2062 = vmatpush1.bf16.msra.mxu1 %v8302_v22  ;;  %7733 = vtanh.f32 %v1470_v18  ;;  %v8688_v22 = vld [vmem:[#allocation10 + $0x40] ss:$16 sps:$4 sm:$0xff]  }
 0x1b5   :  { %2022 = vmatprep.subr.bf16.mxu0 %v8672_v16  ;;  %2063 = vmatprep.subr.bf16.mxu1 %v8307_v23  ;;  %v8692_v23 = vld [vmem:[#allocation10 + $0x64] ss:$16 sps:$4 sm:$0xff]   ;;  %v8729_v18 = vld [vmem:[#allocation10 + $0xc0] ss:$16 sps:$4 sm:$0xff]  }
 0x1b6   :  { %2052 = vmatprep.mubr.bf16.mxu0 %v10098_v35  ;;  %2093 = vmatprep.mubr.bf16.mxu1 %v10098_v35 }
 0x1b8   :  { %2023 = vmatpush1.bf16.msra.mxu0 %v8676_v34  ;;  %2064 = vmatpush1.bf16.msra.mxu1 %v8314_v24  ;;  %v8700_v24 = vld [vmem:[#allocation10 + $0x84] ss:$16 sps:$4 sm:$0xff]  }
 0x1b9   :  { %2024 = vmatprep.subr.bf16.mxu0 %v8680_v14  ;;  %2065 = vmatprep.subr.bf16.mxu1 %v8320_v26  ;;  %v1507_v26 = vmul.f32 0.0, %v1505_v0  ;;  %v8743_v0 = vld [vmem:[#allocation10 + $0xe8] ss:$16 sps:$4 sm:$0xff]  }
 0x1bb   :  { %v7732_v63 = vpop.eup %7731 }
 0x1bc   :  { %v1475_v57 = vmul.f32 %v7732_v63, %v1464_v12  ;;  %2025 = vmatpush1.bf16.msra.mxu0 %v8688_v22  ;;  %2066 = vmatpush1.bf16.msra.mxu1 %v8328_v28  ;;  %v8737_v12 = vld [vmem:[#allocation10 + $0xec] ss:$16 sps:$4 sm:$0xff]  }
 0x1bd   :  { %2026 = vmatprep.subr.bf16.mxu0 %v8692_v23  ;;  %2067 = vmatprep.subr.bf16.mxu1 %v8332_v11  ;;  %v8711_v11 = vld [vmem:[#allocation10 + $0xac] ss:$16 sps:$4 sm:$0xff]  }
 0x1be   :  { %v1476_v33 = vadd.f32 %v1475_v57, %v1474_v2  ;;  %v7734_v4 = vpop.eup %7733  ;;  %v8741_v57 = vld [vmem:[#allocation10 + $0xe0] ss:$16 sps:$4 sm:$0xff]  }
 0x1bf   :  { %v1472_v51 = vmul.f32 0.5, %v7734_v4 }
 0x1c0   :  { %7735 = vtanh.f32 %v1476_v33  ;;  %2027 = vmatpush1.bf16.msra.mxu0 %v8696_v8  ;;  %2068 = vmatpush1.bf16.msra.mxu1 %v8339_v30  ;;  %v1509_v28 = vmul.f32 %v8684_v62, %v1476_v33  ;;  %v8717_v30 = vld [vmem:[#allocation10 + $0xa0] ss:$16 sps:$4 sm:$0xff]  }
 0x1c1   :  { %2028 = vmatprep.subr.bf16.mxu0 %v8700_v24  ;;  %2069 = vmatprep.subr.bf16.mxu1 %v8344_v19  ;;  %v8723_v19 = vld [vmem:[#allocation10 + $0xc4] ss:$16 sps:$4 sm:$0xff]   ;;  %v1473_v38 = vadd.f32 0.5, %v1472_v51 }
 0x1c2   :  { %v8713_v15 = vadd.f32 %v1509_v28, %v1507_v26 }
 0x1c4   :  { %2029 = vmatpush1.bf16.msra.mxu0 %v8704_v40  ;;  %2070 = vmatpush1.bf16.msra.mxu1 %v8348_v29  ;;  %v8731_v29 = vld [vmem:[#allocation10 + $0xc8] ss:$16 sps:$4 sm:$0xff]  }
 0x1c5   :  { %2030 = vmatprep.subr.bf16.mxu0 %v8709_v1  ;;  %2071 = vmatprep.subr.bf16.mxu1 %v8711_v11 }
 0x1c8   :  { %2031 = vmatpush1.bf16.msra.mxu0 %v8717_v30  ;;  %2072 = vmatpush1.bf16.msra.mxu1 %v8719_v17 }
 0x1c9   :  { %2032 = vmatprep.subr.bf16.mxu0 %v8723_v19  ;;  %2073 = vmatprep.subr.bf16.mxu1 %v8725_v21 }
 0x1ca   :  { %v7736_v63 = vpop.eup %7735 }
 0x1cb   :  { %v1478_v2 = vmul.f32 %v7736_v63, %v1473_v38 }
 0x1cc   :  { %2033 = vmatpush1.bf16.msra.mxu0 %v8729_v18  ;;  %2074 = vmatpush1.bf16.msra.mxu1 %v8731_v29 }
 0x1cd   :  { %v1500_v33 = vmul.f32 %v8684_v62, %v1478_v2  ;;  %2034 = vmatprep.subr.bf16.mxu0 %v8735_v48  ;;  %2075 = vmatprep.subr.bf16.mxu1 %v8737_v12 }
 0x1cf   :  { %v8748_v28 = vadd.f32 %v1507_v26, %v1500_v33 }
 0x1d0   :  { %2035 = vmatpush1.bf16.msra.mxu0 %v8741_v57  ;;  %2076 = vmatpush1.bf16.msra.mxu1 %v8743_v0 }
 0x1d1   :  { %v1827_v4 = vpack.c.bf16 %v8748_v28, %v8748_v28  ;;  %2366 = vmatprep.subr.bf16.mxu0 %v8375_v39  ;;  %v8773_v39 = vld [vmem:[#allocation8 + $0xc] ss:$16 sps:$4 sm:$0xff]  }
 0x1d2   :  { %2407 = vmatprep.subr.bf16.mxu1 %v8773_v39 }
 0x1d3   :  { %2053 = vmatmul.mubr.bf16.vlgmr.msra.gmra.mrb[28].mxu0 %v1827_v4  ;;  %2094 = vmatmul.mubr.bf16.vlgmr.msra.gmra.mrb[60].mxu1 %v1827_v4 }
 0x1d4   :  { %2367 = vmatpush1.bf16.msra.mxu0 %v8377_v41  ;;  %2398 = vmatprep.mubr.bf16.mxu0 %v10098_v35  ;;  %v8775_v41 = vld [vmem:[#allocation8 + $0x8] ss:$16 sps:$4 sm:$0xff]  }
 0x1d5   :  { %2368 = vmatprep.subr.bf16.mxu0 %v8381_v42  ;;  %2439 = vmatprep.mubr.bf16.mxu1 %v10098_v35  ;;  %v8779_v42 = vld [vmem:[#allocation8 + $0x2c] ss:$16 sps:$4 sm:$0xff]  }
 0x1d6   :  { %2408 = vmatpush1.bf16.msra.mxu1 %v8775_v41 }
 0x1d7   :  { %2409 = vmatprep.subr.bf16.mxu1 %v8779_v42 }
 0x1d8   :  { %2369 = vmatpush1.bf16.msra.mxu0 %v8383_v43  ;;  %v8781_v43 = vld [vmem:[#allocation8 + $0x28] ss:$16 sps:$4 sm:$0xff]  }
 0x1d9   :  { %2370 = vmatprep.subr.bf16.mxu0 %v8387_v44  ;;  %v8785_v44 = vld [vmem:[#allocation8 + $0x4c] ss:$16 sps:$4 sm:$0xff]  }
 0x1da   :  { %2410 = vmatpush1.bf16.msra.mxu1 %v8781_v43 }
 0x1db   :  { %2411 = vmatprep.subr.bf16.mxu1 %v8785_v44 }
 0x1dc   :  { %2371 = vmatpush1.bf16.msra.mxu0 %v8389_v45  ;;  %v8787_v45 = vld [vmem:[#allocation8 + $0x48] ss:$16 sps:$4 sm:$0xff]  }
 0x1dd   :  { %2372 = vmatprep.subr.bf16.mxu0 %v8393_v46  ;;  %v8791_v46 = vld [vmem:[#allocation8 + $0x6c] ss:$16 sps:$4 sm:$0xff]  }
 0x1de   :  { %2412 = vmatpush1.bf16.msra.mxu1 %v8787_v45 }
 0x1df   :  { %2413 = vmatprep.subr.bf16.mxu1 %v8791_v46 }
 0x1e0   :  { %2373 = vmatpush1.bf16.msra.mxu0 %v8395_v47  ;;  %v8793_v47 = vld [vmem:[#allocation8 + $0x68] ss:$16 sps:$4 sm:$0xff]  }
 0x1e1   :  { %2374 = vmatprep.subr.bf16.mxu0 %v8399_v49  ;;  %v8797_v49 = vld [vmem:[#allocation8 + $0x8c] ss:$16 sps:$4 sm:$0xff]  }
 0x1e2   :  { %2414 = vmatpush1.bf16.msra.mxu1 %v8793_v47 }
 0x1e3   :  { %2415 = vmatprep.subr.bf16.mxu1 %v8797_v49 }
 0x1e4   :  { %2375 = vmatpush1.bf16.msra.mxu0 %v8401_v50  ;;  %v8799_v50 = vld [vmem:[#allocation8 + $0x88] ss:$16 sps:$4 sm:$0xff]  }
 0x1e5   :  { %2376 = vmatprep.subr.bf16.mxu0 %v8408_v52  ;;  %v8803_v52 = vld [vmem:[#allocation8 + $0xac] ss:$16 sps:$4 sm:$0xff]  }
 0x1e6   :  { %2416 = vmatpush1.bf16.msra.mxu1 %v8799_v50 }
 0x1e7   :  { %2417 = vmatprep.subr.bf16.mxu1 %v8803_v52 }
 0x1e8   :  { %2377 = vmatpush1.bf16.msra.mxu0 %v8410_v53  ;;  %v8805_v53 = vld [vmem:[#allocation8 + $0xa8] ss:$16 sps:$4 sm:$0xff]  }
 0x1e9   :  { %2378 = vmatprep.subr.bf16.mxu0 %v8422_v59  ;;  %10099 = vst [vmem:[#allocation63_spill] sm:$0xff] %v8805_v53  ;;  %v8809_v59 = vld [vmem:[#allocation8 + $0xcc] ss:$16 sps:$4 sm:$0xff]  }
 0x1ea   :  { %2418 = vmatpush1.bf16.msra.mxu1 %v8805_v53  ;;  %10100 = vst [vmem:[#allocation64_spill] sm:$0xff] %v8809_v59 }
 0x1eb   :  { %2419 = vmatprep.subr.bf16.mxu1 %v8809_v59 }
 0x1ec   :  { %2379 = vmatpush1.bf16.msra.mxu0 %v8424_v60  ;;  %v8811_v60 = vld [vmem:[#allocation8 + $0xc8] ss:$16 sps:$4 sm:$0xff]  }
 0x1ed   :  { %2380 = vmatprep.subr.bf16.mxu0 %v8440_v3  ;;  %10101 = vst [vmem:[#allocation65_spill] sm:$0xff] %v8811_v60  ;;  %v8815_v3 = vld [vmem:[#allocation8 + $0xec] ss:$16 sps:$4 sm:$0xff]  }
 0x1ee   :  { %2420 = vmatpush1.bf16.msra.mxu1 %v8811_v60  ;;  %10102 = vst [vmem:[#allocation66_spill] sm:$0xff] %v8815_v3 }
 0x1ef   :  { %2421 = vmatprep.subr.bf16.mxu1 %v8815_v3 }
 0x1f0   :  { %2381 = vmatpush1.bf16.msra.mxu0 %v8444_v6  ;;  %v8817_v6 = vld [vmem:[#allocation8 + $0xe8] ss:$16 sps:$4 sm:$0xff]  }
 0x1f1   :  { %2668 = vmatprep.subr.bf16.mxu0 %v8466_v20  ;;  %10103 = vst [vmem:[#allocation67_spill] sm:$0xff] %v8817_v6  ;;  %v8821_v20 = vld [vmem:[#allocation10 + $0xc] ss:$16 sps:$4 sm:$0xff]  }
 0x1f2   :  { %2422 = vmatpush1.bf16.msra.mxu1 %v8817_v6  ;;  %10104 = vst [vmem:[#allocation68_spill] sm:$0xff] %v8821_v20 }
 0x1f3   :  { %2709 = vmatprep.subr.bf16.mxu1 %v8821_v20 }
 0x286   :  { %v1752_v26 = vpop.f32.mrb[24].mxu0  ;;  %v1793_v51 = vpop.f32.mrb[56].mxu1 }
 0x287   :  { %v1800_v38 = vadd.f32 %v1752_v26, %v8454_v10  ;;  %v1802_v63 = vadd.f32 %v1793_v51, %v8559_v61  ;;  %v1754_v2 = vpop.f32.mrb[25].mxu0  ;;  %v1795_v33 = vpop.f32.mrb[57].mxu1 }
 0x288   :  { %v1801_v4 = vadd.f32 %v1754_v2, %v8461_v25  ;;  %v1803_v27 = vadd.f32 %v1795_v33, %v8562_v56  ;;  %v1756_v31 = vpop.f32.mrb[26].mxu0  ;;  %v1797_v37 = vpop.f32.mrb[58].mxu1 }
 0x289   :  { %v1804_v55 = vmul.f32 0.5, %v1800_v38  ;;  %v1757_v6 = vpop.f32.mrb[27].mxu0  ;;  %v1798_v3 = vpop.f32.mrb[59].mxu1 }
 0x28a   :  { %v1808_v60 = vmul.f32 0.5, %v1801_v4  ;;  %v1813_v20 = vmul.f32 0.5, %v1803_v27 }
 0x28b   :  { %7737 = vtanh.f32 %v1804_v55 }
 0x28c   :  { %7739 = vtanh.f32 %v1808_v60 }
 0x28d   :  { %7741 = vtanh.f32 %v1802_v63 }
 0x28e   :  { %7743 = vtanh.f32 %v1813_v20 }
 0x295   :  { %v7738_v59 = vpop.eup %7737 }
 0x296   :  { %v7740_v10 = vpop.eup %7739  ;;  %v1806_v26 = vmul.f32 0.5, %v7738_v59 }
 0x297   :  { %v1810_v61 = vmul.f32 0.5, %v7740_v10  ;;  %v7742_v53 = vpop.eup %7741 }
 0x298   :  { %v1807_v51 = vadd.f32 0.5, %v1806_v26  ;;  %v7744_v37 = vpop.eup %7743 }
 0x299   :  { %v1811_v25 = vadd.f32 0.5, %v1810_v61  ;;  %v1815_v55 = vmul.f32 0.5, %v7744_v37  ;;  %v8845_v37 = vld [vmem:[#allocation10 + $0x8] ss:$16 sps:$4 sm:$0xff]  }
 0x29a   :  { %v1818_v2 = vmul.f32 %v7742_v53, %v1807_v51 }
 0x29b   :  { %v1817_v31 = vmul.f32 %v1811_v25, %v8661_v9  ;;  %v1816_v38 = vadd.f32 0.5, %v1815_v55 }
 0x29d   :  { %v8829_v56 = vadd.f32 %v1818_v2, %v1817_v31  ;;  %v8836_v31 = vpop.permute.xlu0 %2126 }
 0x29f   :  { %7745 = vtanh.f32 %v8829_v56 }
 0x2a6   :  { %v2054_v60 = vpop.f32.mrb[28].mxu0  ;;  %v2095_v3 = vpop.f32.mrb[60].mxu1 }
 0x2a7   :  { %v2102_v27 = vadd.f32 %v2054_v60, %v8527_v32  ;;  %v2104_v59 = vadd.f32 %v2095_v3, %v8649_v54  ;;  %v2056_v6 = vpop.f32.mrb[29].mxu0  ;;  %v2097_v20 = vpop.f32.mrb[61].mxu1  ;;  %v8849_v60 = vld [vmem:[#allocation10 + $0x2c] ss:$16 sps:$4 sm:$0xff]   ;;  %v8853_v3 = vmul.f32 %v8666_v36, %v8658_v13 }
 0x2a8   :  { %v2103_v63 = vadd.f32 %v2056_v6, %v8533_v5  ;;  %v2105_v53 = vadd.f32 %v2097_v20, %v8652_v7  ;;  %v2058_v33 = vpop.f32.mrb[30].mxu0  ;;  %v2099_v4 = vpop.f32.mrb[62].mxu1  ;;  %v8863_v20 = vld [vmem:[#allocation10 + $0x28] ss:$16 sps:$4 sm:$0xff]   ;;  %v8867_v13 = vld [vmem:[#allocation10 + $0x4c] ss:$16 sps:$4 sm:$0xff]  }
 0x2a9   :  { %v7746_v10 = vpop.eup %7745  ;;  %v2106_v26 = vmul.f32 0.5, %v2102_v27  ;;  %v2059_v61 = vpop.f32.mrb[31].mxu0  ;;  %10105 = vst [vmem:[#allocation69_spill] sm:$0xff] %v8853_v3  ;;  %v8877_v33 = vld [vmem:[#allocation10 + $0x6c] ss:$16 sps:$4 sm:$0xff]  }
 0x2aa   :  { %v2100_v51 = vpop.f32.mrb[63].mxu1  ;;  %v1821_v25 = vmul.f32 %v7746_v10, %v1816_v38  ;;  %v2110_v2 = vmul.f32 0.5, %v2103_v63  ;;  %v8838_v32 = vpop.permute.xlu1 %2133  ;;  %v2115_v6 = vmul.f32 0.5, %v2105_v53 }
 0x2ab   :  { %7747 = vtanh.f32 %v2106_v26  ;;  %v2136_v5 = vmul.f32 %v8838_v32, %v8666_v36 }
 0x2ac   :  { %v2129_v54 = vmul.f32 %v8836_v31, %v1821_v25  ;;  %7749 = vtanh.f32 %v2110_v2  ;;  %v8893_v25 = vld [vmem:[#allocation10 + $0x88] ss:$16 sps:$4 sm:$0xff]  }
 0x2ad   :  { %7751 = vtanh.f32 %v2104_v59 }
 0x2ae   :  { %v8843_v7 = vadd.f32 %v2136_v5, %v2129_v54  ;;  %7753 = vtanh.f32 %v2115_v6  ;;  %v8905_v54 = vpop.permute.xlu0 %2143  ;;  %v8987_v5 = vld [vmem:[#allocation8 + $0xc4] ss:$16 sps:$4 sm:$0xff]  }
 0x2af   :  { %v8993_v6 = vld [vmem:[#allocation8 + $0xe4] ss:$16 sps:$4 sm:$0xff]  }
 0x2b0   :  { %v2173_v55 = vpack.c.bf16 %v8843_v7, %v8843_v7  ;;  %v8857_v27 = vmul.f32 %v8843_v7, %v8836_v31 }
 0x2b2   :  { %10106 = vst [vmem:[#allocation70_spill] sm:$0xff] %v8857_v27  ;;  %2399 = vmatmul.mubr.bf16.vlgmr.msra.gmra.mrb[32].mxu0 %v2173_v55  ;;  %2440 = vmatmul.mubr.bf16.vlgmr.msra.gmra.mrb[64].mxu1 %v2173_v55  ;;  %v8989_v55 = vld [vmem:[#allocation8 + $0xc0] ss:$16 sps:$4 sm:$0xff]  }
 0x2b3   :  { %2669 = vmatpush1.bf16.msra.mxu0 %v8668_v58  ;;  %2710 = vmatpush1.bf16.msra.mxu1 %v8845_v37  ;;  %v8873_v58 = vld [vmem:[#allocation10 + $0x48] ss:$16 sps:$4 sm:$0xff]  }
 0x2b4   :  { %2670 = vmatprep.subr.bf16.mxu0 %v8672_v16  ;;  %2711 = vmatprep.subr.bf16.mxu1 %v8849_v60 }
 0x2b5   :  { %v7748_v36 = vpop.eup %7747  ;;  %2700 = vmatprep.mubr.bf16.mxu0 %v10098_v35  ;;  %2741 = vmatprep.mubr.bf16.mxu1 %v10098_v35 }
 0x2b6   :  { %v7750_v38 = vpop.eup %7749  ;;  %v2108_v63 = vmul.f32 0.5, %v7748_v36  ;;  %v8995_v36 = vld [vmem:[#allocation8 + $0xe0] ss:$16 sps:$4 sm:$0xff]  }
 0x2b7   :  { %v2112_v53 = vmul.f32 0.5, %v7750_v38  ;;  %2671 = vmatpush1.bf16.msra.mxu0 %v8676_v34  ;;  %2712 = vmatpush1.bf16.msra.mxu1 %v8863_v20  ;;  %v7752_v4 = vpop.eup %7751  ;;  %v8882_v34 = vld [vmem:[#allocation10 + $0x68] ss:$16 sps:$4 sm:$0xff]   ;;  %v8999_v38 = vld [vmem:[#allocation10 + $0x4] ss:$16 sps:$4 sm:$0xff]  }
 0x2b8   :  { %v2109_v16 = vadd.f32 0.5, %v2108_v63  ;;  %2672 = vmatprep.subr.bf16.mxu0 %v8680_v14  ;;  %2713 = vmatprep.subr.bf16.mxu1 %v8867_v13  ;;  %v8886_v14 = vld [vmem:[#allocation10 + $0x8c] ss:$16 sps:$4 sm:$0xff]  }
 0x2b9   :  { %v2113_v10 = vadd.f32 0.5, %v2112_v53 }
 0x2ba   :  { %v2120_v26 = vmul.f32 %v7752_v4, %v2109_v16  ;;  %v10115_v16 = vld [vmem:[#allocation19_spill] sm:$0xff] }
 0x2bb   :  { %v2119_v61 = vmul.f32 %v2113_v10, %v8713_v15  ;;  %2673 = vmatpush1.bf16.msra.mxu0 %v8688_v22  ;;  %2714 = vmatpush1.bf16.msra.mxu1 %v8873_v58  ;;  %v7754_v22 = vpop.eup %7753  ;;  %v10116_v10 = vld [vmem:[#allocation39_spill] sm:$0xff] }
 0x2bc   :  { %2674 = vmatprep.subr.bf16.mxu0 %v8692_v23  ;;  %2715 = vmatprep.subr.bf16.mxu1 %v8877_v33  ;;  %v2117_v23 = vmul.f32 0.5, %v7754_v22 }
 0x2bd   :  { %v8888_v51 = vadd.f32 %v2120_v26, %v2119_v61 }
 0x2bf   :  { %7755 = vtanh.f32 %v8888_v51  ;;  %2675 = vmatpush1.bf16.msra.mxu0 %v8696_v8  ;;  %2716 = vmatpush1.bf16.msra.mxu1 %v8882_v34  ;;  %v2118_v8 = vadd.f32 0.5, %v2117_v23  ;;  %v10117_v23 = vld [vmem:[#allocation20_spill] sm:$0xff] }
 0x2c0   :  { %2676 = vmatprep.subr.bf16.mxu0 %v8700_v24  ;;  %2717 = vmatprep.subr.bf16.mxu1 %v8886_v14 }
 0x2c3   :  { %2677 = vmatpush1.bf16.msra.mxu0 %v8704_v40  ;;  %2718 = vmatpush1.bf16.msra.mxu1 %v8893_v25  ;;  %v8907_v40 = vpop.permute.xlu1 %2150 }
 0x2c4   :  { %2678 = vmatprep.subr.bf16.mxu0 %v8709_v1  ;;  %2719 = vmatprep.subr.bf16.mxu1 %v8711_v11  ;;  %v2153_v11 = vmul.f32 %v8907_v40, %v8748_v28 }
 0x2c7   :  { %2679 = vmatpush1.bf16.msra.mxu0 %v8717_v30  ;;  %2720 = vmatpush1.bf16.msra.mxu1 %v8719_v17 }
 0x2c8   :  { %2680 = vmatprep.subr.bf16.mxu0 %v8723_v19  ;;  %2721 = vmatprep.subr.bf16.mxu1 %v8725_v21  ;;  %v8925_v19 = vmul.f32 %v8748_v28, %v8684_v62  ;;  %v10109_v62 = vld [vmem:[#allocation63_spill] sm:$0xff] }
 0x2c9   :  { %v7756_v24 = vpop.eup %7755  ;;  %v8951_v28 = vld [vmem:[#allocation8 + $0x4] ss:$16 sps:$4 sm:$0xff]  }
 0x2ca   :  { %v2123_v2 = vmul.f32 %v7756_v24, %v2118_v8  ;;  %10107 = vst [vmem:[#allocation71_spill] sm:$0xff] %v8925_v19  ;;  %v10118_v24 = vld [vmem:[#allocation40_spill] sm:$0xff] }
 0x2cb   :  { %2681 = vmatpush1.bf16.msra.mxu0 %v8729_v18  ;;  %2722 = vmatpush1.bf16.msra.mxu1 %v8731_v29  ;;  %v10110_v29 = vld [vmem:[#allocation64_spill] sm:$0xff]  ;;  %v10131_v18 = vld [vmem:[#allocation42_spill] sm:$0xff] }
 0x2cc   :  { %v2146_v1 = vmul.f32 %v8905_v54, %v2123_v2  ;;  %2682 = vmatprep.subr.bf16.mxu0 %v8735_v48  ;;  %2723 = vmatprep.subr.bf16.mxu1 %v8737_v12  ;;  %v10111_v48 = vld [vmem:[#allocation65_spill] sm:$0xff]  ;;  %v10112_v12 = vld [vmem:[#allocation66_spill] sm:$0xff] }
 0x2ce   :  { %v8916_v30 = vadd.f32 %v2153_v11, %v2146_v1 }
 0x2cf   :  { %2683 = vmatpush1.bf16.msra.mxu0 %v8741_v57  ;;  %2724 = vmatpush1.bf16.msra.mxu1 %v8743_v0  ;;  %v10113_v57 = vld [vmem:[#allocation67_spill] sm:$0xff]  ;;  %v10114_v0 = vld [vmem:[#allocation68_spill] sm:$0xff] }
 0x2d0   :  { %v2475_v17 = vpack.c.bf16 %v8916_v30, %v8916_v30  ;;  %3055 = vmatprep.subr.bf16.mxu1 %v8773_v39  ;;  %v8929_v21 = vmul.f32 %v8916_v30, %v8905_v54  ;;  %v8953_v39 = vld [vmem:[#allocation8] ss:$16 sps:$4 sm:$0xff]   ;;  %3014 = vmatprep.subr.bf16.mxu0 %v8951_v28 }
 0x2d2   :  { %10108 = vst [vmem:[#allocation72_spill] sm:$0xff] %v8929_v21  ;;  %2701 = vmatmul.mubr.bf16.vlgmr.msra.gmra.mrb[36].mxu0 %v2475_v17  ;;  %2742 = vmatmul.mubr.bf16.vlgmr.msra.gmra.mrb[68].mxu1 %v2475_v17 }
 0x2d3   :  { %3056 = vmatpush1.bf16.msra.mxu1 %v8775_v41  ;;  %3046 = vmatprep.mubr.bf16.mxu0 %v10098_v35  ;;  %v8957_v41 = vld [vmem:[#allocation8 + $0x24] ss:$16 sps:$4 sm:$0xff]  }
 0x2d4   :  { %3057 = vmatprep.subr.bf16.mxu1 %v8779_v42  ;;  %3087 = vmatprep.mubr.bf16.mxu1 %v10098_v35  ;;  %v8959_v42 = vld [vmem:[#allocation8 + $0x20] ss:$16 sps:$4 sm:$0xff]  }
 0x2d5   :  { %3015 = vmatpush1.bf16.msra.mxu0 %v8953_v39 }
 0x2d6   :  { %3016 = vmatprep.subr.bf16.mxu0 %v8957_v41 }
 0x2d7   :  { %3058 = vmatpush1.bf16.msra.mxu1 %v8781_v43  ;;  %v8963_v43 = vld [vmem:[#allocation8 + $0x44] ss:$16 sps:$4 sm:$0xff]  }
 0x2d8   :  { %3059 = vmatprep.subr.bf16.mxu1 %v8785_v44  ;;  %v8965_v44 = vld [vmem:[#allocation8 + $0x40] ss:$16 sps:$4 sm:$0xff]  }
 0x2d9   :  { %3017 = vmatpush1.bf16.msra.mxu0 %v8959_v42 }
 0x2da   :  { %3018 = vmatprep.subr.bf16.mxu0 %v8963_v43 }
 0x2db   :  { %3060 = vmatpush1.bf16.msra.mxu1 %v8787_v45  ;;  %v8969_v45 = vld [vmem:[#allocation8 + $0x64] ss:$16 sps:$4 sm:$0xff]  }
 0x2dc   :  { %3061 = vmatprep.subr.bf16.mxu1 %v8791_v46  ;;  %v8971_v46 = vld [vmem:[#allocation8 + $0x60] ss:$16 sps:$4 sm:$0xff]  }
 0x2dd   :  { %3019 = vmatpush1.bf16.msra.mxu0 %v8965_v44 }
 0x2de   :  { %3020 = vmatprep.subr.bf16.mxu0 %v8969_v45 }
 0x2df   :  { %3062 = vmatpush1.bf16.msra.mxu1 %v8793_v47  ;;  %v8975_v47 = vld [vmem:[#allocation8 + $0x84] ss:$16 sps:$4 sm:$0xff]  }
 0x2e0   :  { %3063 = vmatprep.subr.bf16.mxu1 %v8797_v49  ;;  %v8977_v49 = vld [vmem:[#allocation8 + $0x80] ss:$16 sps:$4 sm:$0xff]  }
 0x2e1   :  { %3021 = vmatpush1.bf16.msra.mxu0 %v8971_v46 }
 0x2e2   :  { %3022 = vmatprep.subr.bf16.mxu0 %v8975_v47 }
 0x2e3   :  { %3064 = vmatpush1.bf16.msra.mxu1 %v8799_v50  ;;  %v8981_v50 = vld [vmem:[#allocation8 + $0xa4] ss:$16 sps:$4 sm:$0xff]  }
 0x2e4   :  { %3065 = vmatprep.subr.bf16.mxu1 %v8803_v52  ;;  %v8983_v52 = vld [vmem:[#allocation8 + $0xa0] ss:$16 sps:$4 sm:$0xff]  }
 0x2e5   :  { %3023 = vmatpush1.bf16.msra.mxu0 %v8977_v49 }
 0x2e6   :  { %3024 = vmatprep.subr.bf16.mxu0 %v8981_v50 }
 0x2e7   :  { %3066 = vmatpush1.bf16.msra.mxu1 %v10109_v62 }
 0x2e8   :  { %3067 = vmatprep.subr.bf16.mxu1 %v10110_v29 }
 0x2e9   :  { %3025 = vmatpush1.bf16.msra.mxu0 %v8983_v52 }
 0x2ea   :  { %3026 = vmatprep.subr.bf16.mxu0 %v8987_v5 }
 0x2eb   :  { %3068 = vmatpush1.bf16.msra.mxu1 %v10111_v48 }
 0x2ec   :  { %3069 = vmatprep.subr.bf16.mxu1 %v10112_v12 }
 0x2ed   :  { %3027 = vmatpush1.bf16.msra.mxu0 %v8989_v55 }
 0x2ee   :  { %3028 = vmatprep.subr.bf16.mxu0 %v8993_v6 }
 0x2ef   :  { %3070 = vmatpush1.bf16.msra.mxu1 %v10113_v57 }
 0x2f0   :  { %3357 = vmatprep.subr.bf16.mxu1 %v10114_v0  ;;  %v2138_v0 = vmul.f32 %v8836_v31, %v8829_v56 }
 0x2f1   :  { %3029 = vmatpush1.bf16.msra.mxu0 %v8995_v36 }
 0x2f2   :  { %3316 = vmatprep.subr.bf16.mxu0 %v8999_v38 }
 0x385   :  { %v2400_v63 = vpop.f32.mrb[32].mxu0  ;;  %v2441_v53 = vpop.f32.mrb[64].mxu1 }
 0x386   :  { %v2448_v4 = vadd.f32 %v2400_v63, %v10115_v16  ;;  %v2450_v26 = vadd.f32 %v2441_v53, %v10116_v10  ;;  %v2402_v61 = vpop.f32.mrb[33].mxu0  ;;  %v2443_v22 = vpop.f32.mrb[65].mxu1  ;;  %v2139_v16 = vmul.f32 %v8838_v32, %v8661_v9  ;;  %v10120_v32 = vld [vmem:[#allocation61_spill] sm:$0xff] }
 0x387   :  { %v2449_v8 = vadd.f32 %v2402_v61, %v10117_v23  ;;  %v2451_v2 = vadd.f32 %v2443_v22, %v10118_v24  ;;  %v2404_v1 = vpop.f32.mrb[34].mxu0  ;;  %v2445_v11 = vpop.f32.mrb[66].mxu1 }
 0x388   :  { %v2452_v17 = vmul.f32 0.5, %v2448_v4  ;;  %v2405_v62 = vpop.f32.mrb[35].mxu0  ;;  %v2446_v29 = vpop.f32.mrb[67].mxu1  ;;  %v9010_v22 = vadd.f32 %v2139_v16, %v2138_v0  ;;  %v10119_v11 = vld [vmem:[#allocation33_spill] sm:$0xff]  ;;  %v10122_v0 = vld [vmem:[#allocation62_spill] sm:$0xff] }
 0x389   :  { %v2456_v48 = vmul.f32 0.5, %v2449_v8  ;;  %v2461_v12 = vmul.f32 0.5, %v2451_v2 }
 0x38a   :  { %7757 = vtanh.f32 %v2452_v17 }
 0x38b   :  { %7759 = vtanh.f32 %v2456_v48 }
 0x38c   :  { %7761 = vtanh.f32 %v2450_v26 }
 0x38d   :  { %7763 = vtanh.f32 %v2461_v12  ;;  %v10121_v12 = vld [vmem:[#allocation34_spill] sm:$0xff] }
 0x394   :  { %v7758_v57 = vpop.eup %7757 }
 0x395   :  { %v7760_v63 = vpop.eup %7759  ;;  %v2454_v53 = vmul.f32 0.5, %v7758_v57 }
 0x396   :  { %v2458_v10 = vmul.f32 0.5, %v7760_v63  ;;  %v7762_v4 = vpop.eup %7761 }
 0x397   :  { %v2455_v61 = vadd.f32 0.5, %v2454_v53  ;;  %v7764_v56 = vpop.eup %7763 }
 0x398   :  { %v2459_v23 = vadd.f32 0.5, %v2458_v10  ;;  %v2463_v31 = vmul.f32 0.5, %v7764_v56  ;;  %v9020_v56 = vpop.permute.xlu0 %2774 }
 0x399   :  { %v2466_v8 = vmul.f32 %v7762_v4, %v2455_v61 }
 0x39a   :  { %v2465_v26 = vmul.f32 %v2459_v23, %v9010_v22  ;;  %v2464_v48 = vadd.f32 0.5, %v2463_v31 }
 0x39c   :  { %v9013_v24 = vadd.f32 %v2466_v8, %v2465_v26 }
 0x39e   :  { %7765 = vtanh.f32 %v9013_v24 }
 0x3a5   :  { %v2702_v2 = vpop.f32.mrb[36].mxu0  ;;  %v2743_v1 = vpop.f32.mrb[68].mxu1 }
 0x3a6   :  { %v2750_v9 = vadd.f32 %v2702_v2, %v10119_v11  ;;  %v2752_v17 = vadd.f32 %v2743_v1, %v10120_v32  ;;  %v2704_v62 = vpop.f32.mrb[37].mxu0  ;;  %v2745_v29 = vpop.f32.mrb[69].mxu1  ;;  %v9029_v32 = vld [vmem:[#allocation10] ss:$16 sps:$4 sm:$0xff]  }
 0x3a7   :  { %v2751_v57 = vadd.f32 %v2704_v62, %v10121_v12  ;;  %v2753_v63 = vadd.f32 %v2745_v29, %v10122_v0  ;;  %v2706_v53 = vpop.f32.mrb[38].mxu0  ;;  %v2747_v16 = vpop.f32.mrb[70].mxu1  ;;  %v9033_v62 = vld [vmem:[#allocation10 + $0x24] ss:$16 sps:$4 sm:$0xff]   ;;  %v2155_v12 = vmul.f32 %v8905_v54, %v8888_v51 }
 0x3a8   :  { %v7766_v10 = vpop.eup %7765  ;;  %v2754_v61 = vmul.f32 0.5, %v2750_v9  ;;  %v2707_v4 = vpop.f32.mrb[39].mxu0  ;;  %v9055_v51 = vld [vmem:[#allocation10 + $0x64] ss:$16 sps:$4 sm:$0xff]  }
 0x3a9   :  { %v2748_v23 = vpop.f32.mrb[71].mxu1  ;;  %v2469_v8 = vmul.f32 %v7766_v10, %v2464_v48  ;;  %v2758_v26 = vmul.f32 0.5, %v2751_v57  ;;  %v9022_v2 = vpop.permute.xlu1 %2781  ;;  %v2763_v29 = vmul.f32 0.5, %v2753_v63  ;;  %v9037_v48 = vld [vmem:[#allocation10 + $0x20] ss:$16 sps:$4 sm:$0xff]  }
 0x3aa   :  { %7767 = vtanh.f32 %v2754_v61  ;;  %v2784_v31 = vmul.f32 %v9022_v2, %v8843_v7  ;;  %v9041_v7 = vld [vmem:[#allocation10 + $0x44] ss:$16 sps:$4 sm:$0xff]   ;;  %v9073_v4 = vld [vmem:[#allocation10 + $0x80] ss:$16 sps:$4 sm:$0xff]   ;;  %v9079_v23 = vld [vmem:[#allocation10 + $0xac] ss:$16 sps:$4 sm:$0xff]  }
 0x3ab   :  { %v2777_v1 = vmul.f32 %v9020_v56, %v2469_v8  ;;  %7769 = vtanh.f32 %v2758_v26  ;;  %v9083_v8 = vld [vmem:[#allocation10 + $0xa0] ss:$16 sps:$4 sm:$0xff]   ;;  %v9085_v26 = vld [vmem:[#allocation10 + $0xa8] ss:$16 sps:$4 sm:$0xff]  }
 0x3ac   :  { %7771 = vtanh.f32 %v2752_v17 }
 0x3ad   :  { %v9027_v11 = vadd.f32 %v2784_v31, %v2777_v1  ;;  %7773 = vtanh.f32 %v2763_v29  ;;  %v9089_v1 = vld [vmem:[#allocation10 + $0xc4] ss:$16 sps:$4 sm:$0xff]   ;;  %v9095_v31 = vld [vmem:[#allocation10 + $0xc0] ss:$16 sps:$4 sm:$0xff]  }
 0x3ae   :  { %v9101_v29 = vld [vmem:[#allocation10 + $0xe4] ss:$16 sps:$4 sm:$0xff]  }
 0x3af   :  { %v2821_v9 = vpack.c.bf16 %v9027_v11, %v9027_v11 }
 0x3b1   :  { %3047 = vmatmul.mubr.bf16.vlgmr.msra.gmra.mrb[40].mxu0 %v2821_v9  ;;  %3088 = vmatmul.mubr.bf16.vlgmr.msra.gmra.mrb[72].mxu1 %v2821_v9 }
 0x3b2   :  { %3317 = vmatpush1.bf16.msra.mxu0 %v9029_v32  ;;  %3358 = vmatpush1.bf16.msra.mxu1 %v8845_v37  ;;  %v2156_v37 = vmul.f32 %v8907_v40, %v8713_v15 }
 0x3b3   :  { %3318 = vmatprep.subr.bf16.mxu0 %v9033_v62  ;;  %3359 = vmatprep.subr.bf16.mxu1 %v8849_v60  ;;  %v9051_v60 = vld [vmem:[#allocation10 + $0x40] ss:$16 sps:$4 sm:$0xff]  }
 0x3b4   :  { %v7768_v17 = vpop.eup %7767  ;;  %3348 = vmatprep.mubr.bf16.mxu0 %v10098_v35  ;;  %3389 = vmatprep.mubr.bf16.mxu1 %v10098_v35  ;;  %v9057_v16 = vadd.f32 %v2156_v37, %v2155_v12  ;;  %v9107_v37 = vpop.permute.xlu1 %2798 }
 0x3b5   :  { %v7770_v57 = vpop.eup %7769  ;;  %v2756_v0 = vmul.f32 0.5, %v7768_v17  ;;  %v9103_v17 = vld [vmem:[#allocation10 + $0xec] ss:$16 sps:$4 sm:$0xff]  }
 0x3b6   :  { %v2760_v63 = vmul.f32 0.5, %v7770_v57  ;;  %3319 = vmatpush1.bf16.msra.mxu0 %v9037_v48  ;;  %3360 = vmatpush1.bf16.msra.mxu1 %v8863_v20  ;;  %v7772_v54 = vpop.eup %7771  ;;  %v9062_v20 = vld [vmem:[#allocation10 + $0x60] ss:$16 sps:$4 sm:$0xff]  }
 0x3b7   :  { %v2757_v53 = vadd.f32 0.5, %v2756_v0  ;;  %3320 = vmatprep.subr.bf16.mxu0 %v9041_v7  ;;  %3361 = vmatprep.subr.bf16.mxu1 %v8867_v13  ;;  %v9066_v13 = vld [vmem:[#allocation10 + $0x84] ss:$16 sps:$4 sm:$0xff]   ;;  %v9105_v0 = vpop.permute.xlu0 %2791 }
 0x3b8   :  { %v2761_v10 = vadd.f32 0.5, %v2760_v63  ;;  %v9111_v63 = vld [vmem:[#allocation10 + $0xe0] ss:$16 sps:$4 sm:$0xff]  }
 0x3b9   :  { %v2768_v15 = vmul.f32 %v7772_v54, %v2757_v53  ;;  %v9113_v53 = vld [vmem:[#allocation10 + $0xe8] ss:$16 sps:$4 sm:$0xff]  }
 0x3ba   :  { %v2767_v40 = vmul.f32 %v2761_v10, %v9057_v16  ;;  %3321 = vmatpush1.bf16.msra.mxu0 %v9051_v60  ;;  %3362 = vmatpush1.bf16.msra.mxu1 %v8873_v58  ;;  %v9077_v58 = vld [vmem:[#allocation10 + $0xa4] ss:$16 sps:$4 sm:$0xff]   ;;  %v2801_v10 = vmul.f32 %v9107_v37, %v8916_v30  ;;  %v9145_v30 = vld [vmem:[#allocation8 + $0xc] ss:$16 sps:$4 sm:$0xff]  }
 0x3bb   :  { %3322 = vmatprep.subr.bf16.mxu0 %v9055_v51  ;;  %3363 = vmatprep.subr.bf16.mxu1 %v8877_v33  ;;  %v7774_v33 = vpop.eup %7773 }
 0x3bc   :  { %v9068_v61 = vadd.f32 %v2768_v15, %v2767_v40 }
 0x3be   :  { %7775 = vtanh.f32 %v9068_v61  ;;  %3323 = vmatpush1.bf16.msra.mxu0 %v9062_v20  ;;  %3364 = vmatpush1.bf16.msra.mxu1 %v8882_v34  ;;  %v2765_v34 = vmul.f32 0.5, %v7774_v33 }
 0x3bf   :  { %3324 = vmatprep.subr.bf16.mxu0 %v9066_v13  ;;  %3365 = vmatprep.subr.bf16.mxu1 %v8886_v14  ;;  %v9091_v14 = vld [vmem:[#allocation10 + $0xcc] ss:$16 sps:$4 sm:$0xff]  }
 0x3c0   :  { %v2766_v9 = vadd.f32 0.5, %v2765_v34  ;;  %v10128_v34 = vld [vmem:[#allocation22_spill] sm:$0xff] }
 0x3c2   :  { %3325 = vmatpush1.bf16.msra.mxu0 %v9073_v4  ;;  %3366 = vmatpush1.bf16.msra.mxu1 %v8893_v25  ;;  %v9097_v25 = vld [vmem:[#allocation10 + $0xc8] ss:$16 sps:$4 sm:$0xff]  }
 0x3c3   :  { %3326 = vmatprep.subr.bf16.mxu0 %v9077_v58  ;;  %3367 = vmatprep.subr.bf16.mxu1 %v9079_v23 }
 0x3c6   :  { %3327 = vmatpush1.bf16.msra.mxu0 %v9083_v8  ;;  %3368 = vmatpush1.bf16.msra.mxu1 %v9085_v26 }
 0x3c7   :  { %3328 = vmatprep.subr.bf16.mxu0 %v9089_v1  ;;  %3369 = vmatprep.subr.bf16.mxu1 %v9091_v14 }
 0x3c8   :  { %v7776_v12 = vpop.eup %7775 }
 0x3c9   :  { %v2771_v57 = vmul.f32 %v7776_v12, %v2766_v9  ;;  %v10129_v12 = vld [vmem:[#allocation41_spill] sm:$0xff] }
 0x3ca   :  { %3329 = vmatpush1.bf16.msra.mxu0 %v9095_v31  ;;  %3370 = vmatpush1.bf16.msra.mxu1 %v9097_v25 }
 0x3cb   :  { %v2794_v54 = vmul.f32 %v9105_v0, %v2771_v57  ;;  %3330 = vmatprep.subr.bf16.mxu0 %v9101_v29  ;;  %3371 = vmatprep.subr.bf16.mxu1 %v9103_v17 }
 0x3cd   :  { %v9120_v15 = vadd.f32 %v2801_v10, %v2794_v54 }
 0x3ce   :  { %3331 = vmatpush1.bf16.msra.mxu0 %v9111_v63  ;;  %3372 = vmatpush1.bf16.msra.mxu1 %v9113_v53 }
 0x3cf   :  { %v3123_v40 = vpack.c.bf16 %v9120_v15, %v9120_v15  ;;  %3659 = vmatprep.subr.bf16.mxu0 %v8951_v28  ;;  %v9147_v28 = vld [vmem:[#allocation8 + $0x8] ss:$16 sps:$4 sm:$0xff]   ;;  %3700 = vmatprep.subr.bf16.mxu1 %v9145_v30 }
 0x3d1   :  { %3349 = vmatmul.mubr.bf16.vlgmr.msra.gmra.mrb[44].mxu0 %v3123_v40  ;;  %3390 = vmatmul.mubr.bf16.vlgmr.msra.gmra.mrb[76].mxu1 %v3123_v40  ;;  %v10130_v40 = vld [vmem:[#allocation24_spill] sm:$0xff] }
 0x3d2   :  { %3660 = vmatpush1.bf16.msra.mxu0 %v8953_v39  ;;  %3691 = vmatprep.mubr.bf16.mxu0 %v10098_v35  ;;  %v9151_v39 = vld [vmem:[#allocation8 + $0x2c] ss:$16 sps:$4 sm:$0xff]  }
 0x3d3   :  { %3661 = vmatprep.subr.bf16.mxu0 %v8957_v41  ;;  %3732 = vmatprep.mubr.bf16.mxu1 %v10098_v35  ;;  %v9153_v41 = vld [vmem:[#allocation8 + $0x28] ss:$16 sps:$4 sm:$0xff]  }
 0x3d4   :  { %3701 = vmatpush1.bf16.msra.mxu1 %v9147_v28 }
 0x3d5   :  { %3702 = vmatprep.subr.bf16.mxu1 %v9151_v39 }
 0x3d6   :  { %3662 = vmatpush1.bf16.msra.mxu0 %v8959_v42  ;;  %v9157_v42 = vld [vmem:[#allocation8 + $0x4c] ss:$16 sps:$4 sm:$0xff]  }
 0x3d7   :  { %3663 = vmatprep.subr.bf16.mxu0 %v8963_v43  ;;  %v9159_v43 = vld [vmem:[#allocation8 + $0x48] ss:$16 sps:$4 sm:$0xff]  }
 0x3d8   :  { %3703 = vmatpush1.bf16.msra.mxu1 %v9153_v41 }
 0x3d9   :  { %3704 = vmatprep.subr.bf16.mxu1 %v9157_v42 }
 0x3da   :  { %3664 = vmatpush1.bf16.msra.mxu0 %v8965_v44  ;;  %v9163_v44 = vld [vmem:[#allocation8 + $0x6c] ss:$16 sps:$4 sm:$0xff]  }
 0x3db   :  { %3665 = vmatprep.subr.bf16.mxu0 %v8969_v45  ;;  %v9165_v45 = vld [vmem:[#allocation8 + $0x68] ss:$16 sps:$4 sm:$0xff]  }
 0x3dc   :  { %3705 = vmatpush1.bf16.msra.mxu1 %v9159_v43 }
 0x3dd   :  { %3706 = vmatprep.subr.bf16.mxu1 %v9163_v44 }
 0x3de   :  { %3666 = vmatpush1.bf16.msra.mxu0 %v8971_v46  ;;  %v9169_v46 = vld [vmem:[#allocation8 + $0x8c] ss:$16 sps:$4 sm:$0xff]  }
 0x3df   :  { %3667 = vmatprep.subr.bf16.mxu0 %v8975_v47  ;;  %v9171_v47 = vld [vmem:[#allocation8 + $0x88] ss:$16 sps:$4 sm:$0xff]  }
 0x3e0   :  { %3707 = vmatpush1.bf16.msra.mxu1 %v9165_v45 }
 0x3e1   :  { %3708 = vmatprep.subr.bf16.mxu1 %v9169_v46 }
 0x3e2   :  { %3668 = vmatpush1.bf16.msra.mxu0 %v8977_v49  ;;  %v9175_v49 = vld [vmem:[#allocation8 + $0xac] ss:$16 sps:$4 sm:$0xff]  }
 0x3e3   :  { %3669 = vmatprep.subr.bf16.mxu0 %v8981_v50  ;;  %v9177_v50 = vld [vmem:[#allocation8 + $0xa8] ss:$16 sps:$4 sm:$0xff]  }
 0x3e4   :  { %3709 = vmatpush1.bf16.msra.mxu1 %v9171_v47 }
 0x3e5   :  { %3710 = vmatprep.subr.bf16.mxu1 %v9175_v49 }
 0x3e6   :  { %3670 = vmatpush1.bf16.msra.mxu0 %v8983_v52  ;;  %v9181_v52 = vld [vmem:[#allocation8 + $0xcc] ss:$16 sps:$4 sm:$0xff]  }
 0x3e7   :  { %3671 = vmatprep.subr.bf16.mxu0 %v8987_v5  ;;  %10123 = vst [vmem:[#allocation63_spill] sm:$0xff] %v9181_v52  ;;  %v9183_v5 = vld [vmem:[#allocation8 + $0xc8] ss:$16 sps:$4 sm:$0xff]  }
 0x3e8   :  { %3711 = vmatpush1.bf16.msra.mxu1 %v9177_v50  ;;  %10124 = vst [vmem:[#allocation64_spill] sm:$0xff] %v9183_v5 }
 0x3e9   :  { %3712 = vmatprep.subr.bf16.mxu1 %v9181_v52 }
 0x3ea   :  { %3672 = vmatpush1.bf16.msra.mxu0 %v8989_v55  ;;  %v9187_v55 = vld [vmem:[#allocation8 + $0xec] ss:$16 sps:$4 sm:$0xff]  }
 0x3eb   :  { %3673 = vmatprep.subr.bf16.mxu0 %v8993_v6  ;;  %10125 = vst [vmem:[#allocation65_spill] sm:$0xff] %v9187_v55  ;;  %v9189_v6 = vld [vmem:[#allocation8 + $0xe8] ss:$16 sps:$4 sm:$0xff]  }
 0x3ec   :  { %3713 = vmatpush1.bf16.msra.mxu1 %v9183_v5  ;;  %10126 = vst [vmem:[#allocation66_spill] sm:$0xff] %v9189_v6 }
 0x3ed   :  { %3714 = vmatprep.subr.bf16.mxu1 %v9187_v55 }
 0x3ee   :  { %3674 = vmatpush1.bf16.msra.mxu0 %v8995_v36  ;;  %v9193_v36 = vld [vmem:[#allocation10 + $0xc] ss:$16 sps:$4 sm:$0xff]  }
 0x3ef   :  { %3960 = vmatprep.subr.bf16.mxu0 %v8999_v38  ;;  %10127 = vst [vmem:[#allocation67_spill] sm:$0xff] %v9193_v36 }
 0x3f0   :  { %3715 = vmatpush1.bf16.msra.mxu1 %v9189_v6 }
 0x3f1   :  { %4001 = vmatprep.subr.bf16.mxu1 %v9193_v36 }
 0x484   :  { %v3048_v38 = vpop.f32.mrb[40].mxu0  ;;  %v3089_v33 = vpop.f32.mrb[72].mxu1 }
 0x485   :  { %v3096_v9 = vadd.f32 %v3048_v38, %v10128_v34  ;;  %v3098_v57 = vadd.f32 %v3089_v33, %v10129_v12  ;;  %v3050_v54 = vpop.f32.mrb[41].mxu0  ;;  %v3091_v10 = vpop.f32.mrb[73].mxu1  ;;  %v2786_v38 = vmul.f32 %v9020_v56, %v9013_v24  ;;  %v2787_v12 = vmul.f32 %v9022_v2, %v9010_v22  ;;  %v10135_v2 = vld [vmem:[#allocation59_spill] sm:$0xff] }
 0x486   :  { %v3097_v59 = vadd.f32 %v3050_v54, %v10130_v40  ;;  %v3099_v3 = vadd.f32 %v3091_v10, %v10131_v18  ;;  %v3052_v27 = vpop.f32.mrb[42].mxu0  ;;  %v3093_v21 = vpop.f32.mrb[74].mxu1 }
 0x487   :  { %v3100_v19 = vmul.f32 0.5, %v3096_v9  ;;  %v3053_v6 = vpop.f32.mrb[43].mxu0  ;;  %v3094_v55 = vpop.f32.mrb[75].mxu1 }
 0x488   :  { %v3104_v5 = vmul.f32 0.5, %v3097_v59  ;;  %v3109_v36 = vmul.f32 0.5, %v3099_v3  ;;  %v9204_v6 = vadd.f32 %v2787_v12, %v2786_v38  ;;  %v10136_v38 = vld [vmem:[#allocation31_spill] sm:$0xff] }
 0x489   :  { %7777 = vtanh.f32 %v3100_v19 }
 0x48a   :  { %7779 = vtanh.f32 %v3104_v5  ;;  %10132 = vst [vmem:[#allocation68_spill] sm:$0xff] %v9204_v6 }
 0x48b   :  { %7781 = vtanh.f32 %v3098_v57  ;;  %v10134_v57 = vld [vmem:[#allocation29_spill] sm:$0xff] }
 0x48c   :  { %7783 = vtanh.f32 %v3109_v36 }
 0x493   :  { %v7778_v52 = vpop.eup %7777 }
 0x494   :  { %v7780_v33 = vpop.eup %7779  ;;  %v3102_v34 = vmul.f32 0.5, %v7778_v52 }
 0x495   :  { %v3106_v18 = vmul.f32 0.5, %v7780_v33  ;;  %v7782_v21 = vpop.eup %7781 }
 0x496   :  { %v3103_v27 = vadd.f32 0.5, %v3102_v34  ;;  %v7784_v24 = vpop.eup %7783  ;;  %v10137_v34 = vld [vmem:[#allocation60_spill] sm:$0xff] }
 0x497   :  { %v3107_v59 = vadd.f32 0.5, %v3106_v18  ;;  %v3111_v55 = vmul.f32 0.5, %v7784_v24 }
 0x498   :  { %v3114_v19 = vmul.f32 %v7782_v21, %v3103_v27 }
 0x499   :  { %v3113_v5 = vmul.f32 %v3107_v59, %v9204_v6  ;;  %v3112_v40 = vadd.f32 0.5, %v3111_v55 }
 0x49b   :  { %v9207_v3 = vadd.f32 %v3114_v19, %v3113_v5 }
 0x49d   :  { %10133 = vst [vmem:[#allocation19_spill] sm:$0xff] %v9207_v3  ;;  %7785 = vtanh.f32 %v9207_v3  ;;  %v9214_v3 = vpop.permute.xlu0 %3422 }
 0x4a4   :  { %v3350_v52 = vpop.f32.mrb[44].mxu0  ;;  %v3391_v9 = vpop.f32.mrb[76].mxu1 }
 0x4a5   :  { %v3398_v22 = vadd.f32 %v3350_v52, %v10134_v57  ;;  %v3400_v36 = vadd.f32 %v3391_v9, %v10135_v2  ;;  %v3352_v54 = vpop.f32.mrb[45].mxu0  ;;  %v3393_v10 = vpop.f32.mrb[77].mxu1  ;;  %v9223_v2 = vld [vmem:[#allocation10 + $0x8] ss:$16 sps:$4 sm:$0xff]  }
 0x4a6   :  { %v3399_v33 = vadd.f32 %v3352_v54, %v10136_v38  ;;  %v3401_v12 = vadd.f32 %v3393_v10, %v10137_v34  ;;  %v3354_v18 = vpop.f32.mrb[46].mxu0  ;;  %v3395_v27 = vpop.f32.mrb[78].mxu1  ;;  %v9227_v54 = vld [vmem:[#allocation10 + $0x2c] ss:$16 sps:$4 sm:$0xff]   ;;  %v9231_v10 = vmul.f32 %v9027_v11, %v9020_v56  ;;  %v9241_v38 = vld [vmem:[#allocation10 + $0x28] ss:$16 sps:$4 sm:$0xff]  }
 0x4a7   :  { %v7786_v21 = vpop.eup %7785  ;;  %v3402_v59 = vmul.f32 0.5, %v3398_v22  ;;  %v3355_v19 = vpop.f32.mrb[47].mxu0  ;;  %v9245_v56 = vld [vmem:[#allocation10 + $0x4c] ss:$16 sps:$4 sm:$0xff]  }
 0x4a8   :  { %v3396_v5 = vpop.f32.mrb[79].mxu1  ;;  %v3117_v24 = vmul.f32 %v7786_v21, %v3112_v40  ;;  %v3406_v6 = vmul.f32 0.5, %v3399_v33  ;;  %v9216_v52 = vpop.permute.xlu1 %3429  ;;  %10138 = vst [vmem:[#allocation39_spill] sm:$0xff] %v9231_v10  ;;  %v2803_v33 = vmul.f32 %v9105_v0, %v9068_v61  ;;  %v9259_v61 = vld [vmem:[#allocation10 + $0x6c] ss:$16 sps:$4 sm:$0xff]  }
 0x4a9   :  { %7787 = vtanh.f32 %v3402_v59  ;;  %v3432_v55 = vmul.f32 %v9216_v52, %v9027_v11 }
 0x4aa   :  { %v3425_v9 = vmul.f32 %v9214_v3, %v3117_v24  ;;  %7789 = vtanh.f32 %v3406_v6  ;;  %v9277_v24 = vld [vmem:[#allocation10 + $0x88] ss:$16 sps:$4 sm:$0xff]  }
 0x4ab   :  { %7791 = vtanh.f32 %v3400_v36  ;;  %v3411_v36 = vmul.f32 0.5, %v3401_v12  ;;  %v2804_v12 = vmul.f32 %v9107_v37, %v9057_v16 }
 0x4ac   :  { %v9221_v57 = vadd.f32 %v3432_v55, %v3425_v9  ;;  %v9289_v55 = vpop.permute.xlu0 %3439 }
 0x4ad   :  { %7793 = vtanh.f32 %v3411_v36  ;;  %v9261_v59 = vadd.f32 %v2804_v12, %v2803_v33  ;;  %v9379_v36 = vld [vmem:[#allocation8 + $0xe0] ss:$16 sps:$4 sm:$0xff]  }
 0x4ae   :  { %v3466_v22 = vpack.c.bf16 %v9221_v57, %v9221_v57  ;;  %v9235_v40 = vmul.f32 %v9221_v57, %v9214_v3 }
 0x4b0   :  { %10139 = vst [vmem:[#allocation20_spill] sm:$0xff] %v9235_v40  ;;  %3692 = vmatmul.mubr.bf16.vlgmr.msra.gmra.mrb[48].mxu0 %v3466_v22  ;;  %3733 = vmatmul.mubr.bf16.vlgmr.msra.gmra.mrb[80].mxu1 %v3466_v22  ;;  %v9377_v22 = vld [vmem:[#allocation8 + $0xe4] ss:$16 sps:$4 sm:$0xff]  }
 0x4b1   :  { %3961 = vmatpush1.bf16.msra.mxu0 %v9029_v32  ;;  %4002 = vmatpush1.bf16.msra.mxu1 %v9223_v2 }
 0x4b2   :  { %3962 = vmatprep.subr.bf16.mxu0 %v9033_v62  ;;  %4003 = vmatprep.subr.bf16.mxu1 %v9227_v54  ;;  %v9255_v62 = vld [vmem:[#allocation10 + $0x48] ss:$16 sps:$4 sm:$0xff]  }
 0x4b3   :  { %v7788_v11 = vpop.eup %7787  ;;  %3992 = vmatprep.mubr.bf16.mxu0 %v10098_v35  ;;  %4033 = vmatprep.mubr.bf16.mxu1 %v10098_v35 }
 0x4b4   :  { %v7790_v34 = vpop.eup %7789  ;;  %v3404_v32 = vmul.f32 0.5, %v7788_v11  ;;  %v9383_v11 = vld [vmem:[#allocation10 + $0x4] ss:$16 sps:$4 sm:$0xff]  }
 0x4b5   :  { %v3408_v18 = vmul.f32 0.5, %v7790_v34  ;;  %3963 = vmatpush1.bf16.msra.mxu0 %v9037_v48  ;;  %4004 = vmatpush1.bf16.msra.mxu1 %v9241_v38  ;;  %v7792_v21 = vpop.eup %7791  ;;  %v9266_v48 = vld [vmem:[#allocation10 + $0x68] ss:$16 sps:$4 sm:$0xff]  }
 0x4b6   :  { %v3405_v27 = vadd.f32 0.5, %v3404_v32  ;;  %3964 = vmatprep.subr.bf16.mxu0 %v9041_v7  ;;  %4005 = vmatprep.subr.bf16.mxu1 %v9245_v56  ;;  %v9270_v7 = vld [vmem:[#allocation10 + $0x8c] ss:$16 sps:$4 sm:$0xff]   ;;  %v10147_v32 = vld [vmem:[#allocation27_spill] sm:$0xff] }
 0x4b7   :  { %v3409_v19 = vadd.f32 0.5, %v3408_v18  ;;  %v10148_v18 = vld [vmem:[#allocation43_spill] sm:$0xff] }
 0x4b8   :  { %v3416_v16 = vmul.f32 %v7792_v21, %v3405_v27 }
 0x4b9   :  { %v3415_v37 = vmul.f32 %v3409_v19, %v9261_v59  ;;  %3965 = vmatpush1.bf16.msra.mxu0 %v9051_v60  ;;  %4006 = vmatpush1.bf16.msra.mxu1 %v9255_v62  ;;  %v7794_v60 = vpop.eup %7793 }
 0x4ba   :  { %3966 = vmatprep.subr.bf16.mxu0 %v9055_v51  ;;  %4007 = vmatprep.subr.bf16.mxu1 %v9259_v61  ;;  %v3413_v51 = vmul.f32 0.5, %v7794_v60  ;;  %v10150_v60 = vld [vmem:[#allocation44_spill] sm:$0xff] }
 0x4bb   :  { %v9272_v5 = vadd.f32 %v3416_v16, %v3415_v37  ;;  %v10149_v16 = vld [vmem:[#allocation28_spill] sm:$0xff] }
 0x4bd   :  { %7795 = vtanh.f32 %v9272_v5  ;;  %3967 = vmatpush1.bf16.msra.mxu0 %v9062_v20  ;;  %4008 = vmatpush1.bf16.msra.mxu1 %v9266_v48  ;;  %v3414_v20 = vadd.f32 0.5, %v3413_v51 }
 0x4be   :  { %3968 = vmatprep.subr.bf16.mxu0 %v9066_v13  ;;  %4009 = vmatprep.subr.bf16.mxu1 %v9270_v7 }
 0x4c1   :  { %3969 = vmatpush1.bf16.msra.mxu0 %v9073_v4  ;;  %4010 = vmatpush1.bf16.msra.mxu1 %v9277_v24  ;;  %v9291_v4 = vpop.permute.xlu1 %3446 }
 0x4c2   :  { %3970 = vmatprep.subr.bf16.mxu0 %v9077_v58  ;;  %4011 = vmatprep.subr.bf16.mxu1 %v9079_v23  ;;  %v3449_v23 = vmul.f32 %v9291_v4, %v9120_v15 }
 0x4c5   :  { %3971 = vmatpush1.bf16.msra.mxu0 %v9083_v8  ;;  %4012 = vmatpush1.bf16.msra.mxu1 %v9085_v26 }
 0x4c6   :  { %3972 = vmatprep.subr.bf16.mxu0 %v9089_v1  ;;  %4013 = vmatprep.subr.bf16.mxu1 %v9091_v14  ;;  %v9309_v1 = vmul.f32 %v9120_v15, %v9105_v0  ;;  %v10145_v0 = vld [vmem:[#allocation66_spill] sm:$0xff] }
 0x4c7   :  { %v7796_v13 = vpop.eup %7795  ;;  %v9337_v15 = vld [vmem:[#allocation8] ss:$16 sps:$4 sm:$0xff]  }
 0x4c8   :  { %v3419_v9 = vmul.f32 %v7796_v13, %v3414_v20  ;;  %10140 = vst [vmem:[#allocation40_spill] sm:$0xff] %v9309_v1 }
 0x4c9   :  { %3973 = vmatpush1.bf16.msra.mxu0 %v9095_v31  ;;  %4014 = vmatpush1.bf16.msra.mxu1 %v9097_v25  ;;  %v10142_v25 = vld [vmem:[#allocation63_spill] sm:$0xff]  ;;  %v10165_v31 = vld [vmem:[#allocation46_spill] sm:$0xff] }
 0x4ca   :  { %v3442_v58 = vmul.f32 %v9289_v55, %v3419_v9  ;;  %3974 = vmatprep.subr.bf16.mxu0 %v9101_v29  ;;  %4015 = vmatprep.subr.bf16.mxu1 %v9103_v17  ;;  %v10143_v29 = vld [vmem:[#allocation64_spill] sm:$0xff]  ;;  %v10144_v17 = vld [vmem:[#allocation65_spill] sm:$0xff] }
 0x4cc   :  { %v9300_v8 = vadd.f32 %v3449_v23, %v3442_v58 }
 0x4cd   :  { %3975 = vmatpush1.bf16.msra.mxu0 %v9111_v63  ;;  %4016 = vmatpush1.bf16.msra.mxu1 %v9113_v53  ;;  %v10146_v63 = vld [vmem:[#allocation67_spill] sm:$0xff] }
 0x4ce   :  { %v3767_v26 = vpack.c.bf16 %v9300_v8, %v9300_v8  ;;  %4344 = vmatprep.subr.bf16.mxu1 %v9145_v30  ;;  %v9313_v14 = vmul.f32 %v9300_v8, %v9289_v55  ;;  %v9335_v53 = vld [vmem:[#allocation8 + $0x4] ss:$16 sps:$4 sm:$0xff]  }
 0x4cf   :  { %4303 = vmatprep.subr.bf16.mxu0 %v9335_v53  ;;  %v9341_v30 = vld [vmem:[#allocation8 + $0x24] ss:$16 sps:$4 sm:$0xff]  }
 0x4d0   :  { %10141 = vst [vmem:[#allocation33_spill] sm:$0xff] %v9313_v14  ;;  %3993 = vmatmul.mubr.bf16.vlgmr.msra.gmra.mrb[52].mxu0 %v3767_v26  ;;  %4034 = vmatmul.mubr.bf16.vlgmr.msra.gmra.mrb[84].mxu1 %v3767_v26 }
 0x4d1   :  { %4345 = vmatpush1.bf16.msra.mxu1 %v9147_v28  ;;  %4335 = vmatprep.mubr.bf16.mxu0 %v10098_v35  ;;  %v9343_v28 = vld [vmem:[#allocation8 + $0x20] ss:$16 sps:$4 sm:$0xff]  }
 0x4d2   :  { %4346 = vmatprep.subr.bf16.mxu1 %v9151_v39  ;;  %4376 = vmatprep.mubr.bf16.mxu1 %v10098_v35  ;;  %v9347_v39 = vld [vmem:[#allocation8 + $0x44] ss:$16 sps:$4 sm:$0xff]  }
 0x4d3   :  { %4304 = vmatpush1.bf16.msra.mxu0 %v9337_v15 }
 0x4d4   :  { %4305 = vmatprep.subr.bf16.mxu0 %v9341_v30 }
 0x4d5   :  { %4347 = vmatpush1.bf16.msra.mxu1 %v9153_v41  ;;  %v9349_v41 = vld [vmem:[#allocation8 + $0x40] ss:$16 sps:$4 sm:$0xff]  }
 0x4d6   :  { %4348 = vmatprep.subr.bf16.mxu1 %v9157_v42  ;;  %v9353_v42 = vld [vmem:[#allocation8 + $0x64] ss:$16 sps:$4 sm:$0xff]  }
 0x4d7   :  { %4306 = vmatpush1.bf16.msra.mxu0 %v9343_v28 }
 0x4d8   :  { %4307 = vmatprep.subr.bf16.mxu0 %v9347_v39 }
 0x4d9   :  { %4349 = vmatpush1.bf16.msra.mxu1 %v9159_v43  ;;  %v9355_v43 = vld [vmem:[#allocation8 + $0x60] ss:$16 sps:$4 sm:$0xff]  }
 0x4da   :  { %4350 = vmatprep.subr.bf16.mxu1 %v9163_v44  ;;  %v9359_v44 = vld [vmem:[#allocation8 + $0x84] ss:$16 sps:$4 sm:$0xff]  }
 0x4db   :  { %4308 = vmatpush1.bf16.msra.mxu0 %v9349_v41 }
 0x4dc   :  { %4309 = vmatprep.subr.bf16.mxu0 %v9353_v42 }
 0x4dd   :  { %4351 = vmatpush1.bf16.msra.mxu1 %v9165_v45  ;;  %v9361_v45 = vld [vmem:[#allocation8 + $0x80] ss:$16 sps:$4 sm:$0xff]  }
 0x4de   :  { %4352 = vmatprep.subr.bf16.mxu1 %v9169_v46  ;;  %v9365_v46 = vld [vmem:[#allocation8 + $0xa4] ss:$16 sps:$4 sm:$0xff]  }
 0x4df   :  { %4310 = vmatpush1.bf16.msra.mxu0 %v9355_v43 }
 0x4e0   :  { %4311 = vmatprep.subr.bf16.mxu0 %v9359_v44 }
 0x4e1   :  { %4353 = vmatpush1.bf16.msra.mxu1 %v9171_v47  ;;  %v9367_v47 = vld [vmem:[#allocation8 + $0xa0] ss:$16 sps:$4 sm:$0xff]  }
 0x4e2   :  { %4354 = vmatprep.subr.bf16.mxu1 %v9175_v49  ;;  %v9371_v49 = vld [vmem:[#allocation8 + $0xc4] ss:$16 sps:$4 sm:$0xff]  }
 0x4e3   :  { %4312 = vmatpush1.bf16.msra.mxu0 %v9361_v45 }
 0x4e4   :  { %4313 = vmatprep.subr.bf16.mxu0 %v9365_v46 }
 0x4e5   :  { %4355 = vmatpush1.bf16.msra.mxu1 %v9177_v50  ;;  %v9373_v50 = vld [vmem:[#allocation8 + $0xc0] ss:$16 sps:$4 sm:$0xff]  }
 0x4e6   :  { %4356 = vmatprep.subr.bf16.mxu1 %v10142_v25 }
 0x4e7   :  { %4314 = vmatpush1.bf16.msra.mxu0 %v9367_v47 }
 0x4e8   :  { %4315 = vmatprep.subr.bf16.mxu0 %v9371_v49 }
 0x4e9   :  { %4357 = vmatpush1.bf16.msra.mxu1 %v10143_v29 }
 0x4ea   :  { %4358 = vmatprep.subr.bf16.mxu1 %v10144_v17  ;;  %v10151_v17 = vld [vmem:[#allocation19_spill] sm:$0xff] }
 0x4eb   :  { %4316 = vmatpush1.bf16.msra.mxu0 %v9373_v50 }
 0x4ec   :  { %4317 = vmatprep.subr.bf16.mxu0 %v9377_v22 }
 0x4ed   :  { %4359 = vmatpush1.bf16.msra.mxu1 %v10145_v0  ;;  %v3434_v0 = vmul.f32 %v9214_v3, %v10151_v17  ;;  %v10155_v17 = vld [vmem:[#allocation26_spill] sm:$0xff] }
 0x4ee   :  { %4645 = vmatprep.subr.bf16.mxu1 %v10146_v63 }
 0x4ef   :  { %4318 = vmatpush1.bf16.msra.mxu0 %v9379_v36 }
 0x4f0   :  { %4604 = vmatprep.subr.bf16.mxu0 %v9383_v11 }
 0x583   :  { %v3693_v33 = vpop.f32.mrb[48].mxu0  ;;  %v3734_v34 = vpop.f32.mrb[80].mxu1 }
 0x584   :  { %v3741_v12 = vadd.f32 %v3693_v33, %v10147_v32  ;;  %v3743_v27 = vadd.f32 %v3734_v34, %v10148_v18  ;;  %v3695_v21 = vpop.f32.mrb[49].mxu0  ;;  %v3736_v19 = vpop.f32.mrb[81].mxu1  ;;  %v10152_v34 = vld [vmem:[#allocation68_spill] sm:$0xff] }
 0x585   :  { %v3742_v37 = vadd.f32 %v3695_v21, %v10149_v16  ;;  %v3744_v51 = vadd.f32 %v3736_v19, %v10150_v60  ;;  %v3697_v20 = vpop.f32.mrb[50].mxu0  ;;  %v3738_v13 = vpop.f32.mrb[82].mxu1  ;;  %v3435_v32 = vmul.f32 %v9216_v52, %v10152_v34 }
 0x586   :  { %v3745_v9 = vmul.f32 0.5, %v3741_v12  ;;  %v3698_v58 = vpop.f32.mrb[51].mxu0  ;;  %v3739_v23 = vpop.f32.mrb[83].mxu1 }
 0x587   :  { %v3749_v26 = vmul.f32 0.5, %v3742_v37  ;;  %v3754_v25 = vmul.f32 0.5, %v3744_v51  ;;  %v9394_v19 = vadd.f32 %v3435_v32, %v3434_v0  ;;  %v10154_v58 = vld [vmem:[#allocation57_spill] sm:$0xff] }
 0x588   :  { %7797 = vtanh.f32 %v3745_v9  ;;  %v10153_v9 = vld [vmem:[#allocation25_spill] sm:$0xff] }
 0x589   :  { %7799 = vtanh.f32 %v3749_v26 }
 0x58a   :  { %7801 = vtanh.f32 %v3743_v27 }
 0x58b   :  { %7803 = vtanh.f32 %v3754_v25 }
 0x592   :  { %v7798_v29 = vpop.eup %7797 }
 0x593   :  { %v7800_v63 = vpop.eup %7799  ;;  %v3747_v33 = vmul.f32 0.5, %v7798_v29 }
 0x594   :  { %v3751_v18 = vmul.f32 0.5, %v7800_v63  ;;  %v7802_v12 = vpop.eup %7801  ;;  %v10156_v63 = vld [vmem:[#allocation58_spill] sm:$0xff] }
 0x595   :  { %v3748_v21 = vadd.f32 0.5, %v3747_v33  ;;  %v7804_v3 = vpop.eup %7803 }
 0x596   :  { %v3752_v16 = vadd.f32 0.5, %v3751_v18  ;;  %v3756_v51 = vmul.f32 0.5, %v7804_v3  ;;  %v9404_v3 = vpop.permute.xlu0 %4066 }
 0x597   :  { %v3759_v37 = vmul.f32 %v7802_v12, %v3748_v21 }
 0x598   :  { %v3758_v27 = vmul.f32 %v3752_v16, %v9394_v19  ;;  %v3757_v29 = vadd.f32 0.5, %v3756_v51 }
 0x59a   :  { %v9397_v60 = vadd.f32 %v3759_v37, %v3758_v27 }
 0x59c   :  { %7805 = vtanh.f32 %v9397_v60 }
 0x5a3   :  { %v3994_v20 = vpop.f32.mrb[52].mxu0  ;;  %v4035_v13 = vpop.f32.mrb[84].mxu1 }
 0x5a4   :  { %v4042_v52 = vadd.f32 %v3994_v20, %v10153_v9  ;;  %v4044_v23 = vadd.f32 %v4035_v13, %v10154_v58  ;;  %v3996_v26 = vpop.f32.mrb[53].mxu0  ;;  %v4037_v25 = vpop.f32.mrb[85].mxu1  ;;  %v9413_v58 = vld [vmem:[#allocation10] ss:$16 sps:$4 sm:$0xff]  }
 0x5a5   :  { %v4043_v0 = vadd.f32 %v3996_v26, %v10155_v17  ;;  %v4045_v33 = vadd.f32 %v4037_v25, %v10156_v63  ;;  %v3998_v34 = vpop.f32.mrb[54].mxu0  ;;  %v4039_v32 = vpop.f32.mrb[86].mxu1  ;;  %v9417_v26 = vld [vmem:[#allocation10 + $0x24] ss:$16 sps:$4 sm:$0xff]   ;;  %v3451_v17 = vmul.f32 %v9289_v55, %v9272_v5 }
 0x5a6   :  { %v7806_v18 = vpop.eup %7805  ;;  %v4046_v21 = vmul.f32 0.5, %v4042_v52  ;;  %v3999_v12 = vpop.f32.mrb[55].mxu0  ;;  %v9439_v5 = vld [vmem:[#allocation10 + $0x64] ss:$16 sps:$4 sm:$0xff]  }
 0x5a7   :  { %v4040_v16 = vpop.f32.mrb[87].mxu1  ;;  %v3762_v37 = vmul.f32 %v7806_v18, %v3757_v29  ;;  %v4050_v27 = vmul.f32 0.5, %v4043_v0  ;;  %v9406_v20 = vpop.permute.xlu1 %4073  ;;  %v4055_v25 = vmul.f32 0.5, %v4045_v33  ;;  %v9421_v29 = vld [vmem:[#allocation10 + $0x20] ss:$16 sps:$4 sm:$0xff]  }
 0x5a8   :  { %7807 = vtanh.f32 %v4046_v21  ;;  %v4076_v51 = vmul.f32 %v9406_v20, %v9221_v57  ;;  %v9425_v57 = vld [vmem:[#allocation10 + $0x44] ss:$16 sps:$4 sm:$0xff]   ;;  %v9457_v12 = vld [vmem:[#allocation10 + $0x80] ss:$16 sps:$4 sm:$0xff]   ;;  %v9463_v16 = vld [vmem:[#allocation10 + $0xac] ss:$16 sps:$4 sm:$0xff]  }
 0x5a9   :  { %v4069_v13 = vmul.f32 %v9404_v3, %v3762_v37  ;;  %7809 = vtanh.f32 %v4050_v27  ;;  %v9467_v37 = vld [vmem:[#allocation10 + $0xa0] ss:$16 sps:$4 sm:$0xff]   ;;  %v9469_v27 = vld [vmem:[#allocation10 + $0xa8] ss:$16 sps:$4 sm:$0xff]  }
 0x5aa   :  { %7811 = vtanh.f32 %v4044_v23 }
 0x5ab   :  { %v9411_v9 = vadd.f32 %v4076_v51, %v4069_v13  ;;  %7813 = vtanh.f32 %v4055_v25  ;;  %v9473_v13 = vld [vmem:[#allocation10 + $0xc4] ss:$16 sps:$4 sm:$0xff]   ;;  %v9479_v51 = vld [vmem:[#allocation10 + $0xc0] ss:$16 sps:$4 sm:$0xff]  }
 0x5ac   :  { %v9485_v25 = vld [vmem:[#allocation10 + $0xe4] ss:$16 sps:$4 sm:$0xff]  }
 0x5ad   :  { %v4110_v52 = vpack.c.bf16 %v9411_v9, %v9411_v9 }
 0x5af   :  { %4336 = vmatmul.mubr.bf16.vlgmr.msra.gmra.mrb[56].mxu0 %v4110_v52  ;;  %4377 = vmatmul.mubr.bf16.vlgmr.msra.gmra.mrb[88].mxu1 %v4110_v52 }
 0x5b0   :  { %4605 = vmatpush1.bf16.msra.mxu0 %v9413_v58  ;;  %4646 = vmatpush1.bf16.msra.mxu1 %v9223_v2  ;;  %v3452_v2 = vmul.f32 %v9291_v4, %v9261_v59 }
 0x5b1   :  { %4606 = vmatprep.subr.bf16.mxu0 %v9417_v26  ;;  %4647 = vmatprep.subr.bf16.mxu1 %v9227_v54  ;;  %v9435_v54 = vld [vmem:[#allocation10 + $0x40] ss:$16 sps:$4 sm:$0xff]  }
 0x5b2   :  { %v7808_v23 = vpop.eup %7807  ;;  %4636 = vmatprep.mubr.bf16.mxu0 %v10098_v35  ;;  %4677 = vmatprep.mubr.bf16.mxu1 %v10098_v35  ;;  %v9441_v32 = vadd.f32 %v3452_v2, %v3451_v17  ;;  %v9491_v2 = vpop.permute.xlu1 %4090 }
 0x5b3   :  { %v7810_v0 = vpop.eup %7809  ;;  %v4048_v63 = vmul.f32 0.5, %v7808_v23  ;;  %v9487_v23 = vld [vmem:[#allocation10 + $0xec] ss:$16 sps:$4 sm:$0xff]  }
 0x5b4   :  { %v4052_v33 = vmul.f32 0.5, %v7810_v0  ;;  %4607 = vmatpush1.bf16.msra.mxu0 %v9421_v29  ;;  %4648 = vmatpush1.bf16.msra.mxu1 %v9241_v38  ;;  %v7812_v55 = vpop.eup %7811  ;;  %v9446_v38 = vld [vmem:[#allocation10 + $0x60] ss:$16 sps:$4 sm:$0xff]  }
 0x5b5   :  { %v4049_v34 = vadd.f32 0.5, %v4048_v63  ;;  %4608 = vmatprep.subr.bf16.mxu0 %v9425_v57  ;;  %4649 = vmatprep.subr.bf16.mxu1 %v9245_v56  ;;  %v9450_v56 = vld [vmem:[#allocation10 + $0x84] ss:$16 sps:$4 sm:$0xff]   ;;  %v9489_v63 = vpop.permute.xlu0 %4083 }
 0x5b6   :  { %v4053_v18 = vadd.f32 0.5, %v4052_v33  ;;  %v9495_v33 = vld [vmem:[#allocation10 + $0xe0] ss:$16 sps:$4 sm:$0xff]  }
 0x5b7   :  { %v4060_v59 = vmul.f32 %v7812_v55, %v4049_v34  ;;  %v9497_v34 = vld [vmem:[#allocation10 + $0xe8] ss:$16 sps:$4 sm:$0xff]  }
 0x5b8   :  { %v4059_v4 = vmul.f32 %v4053_v18, %v9441_v32  ;;  %4609 = vmatpush1.bf16.msra.mxu0 %v9435_v54  ;;  %4650 = vmatpush1.bf16.msra.mxu1 %v9255_v62  ;;  %v9461_v62 = vld [vmem:[#allocation10 + $0xa4] ss:$16 sps:$4 sm:$0xff]   ;;  %v4093_v18 = vmul.f32 %v9491_v2, %v9300_v8  ;;  %v9529_v8 = vld [vmem:[#allocation8 + $0xc] ss:$16 sps:$4 sm:$0xff]  }
 0x5b9   :  { %4610 = vmatprep.subr.bf16.mxu0 %v9439_v5  ;;  %4651 = vmatprep.subr.bf16.mxu1 %v9259_v61  ;;  %v7814_v61 = vpop.eup %7813 }
 0x5ba   :  { %v9452_v21 = vadd.f32 %v4060_v59, %v4059_v4 }
 0x5bc   :  { %7815 = vtanh.f32 %v9452_v21  ;;  %4611 = vmatpush1.bf16.msra.mxu0 %v9446_v38  ;;  %4652 = vmatpush1.bf16.msra.mxu1 %v9266_v48  ;;  %v4057_v48 = vmul.f32 0.5, %v7814_v61 }
 0x5bd   :  { %4612 = vmatprep.subr.bf16.mxu0 %v9450_v56  ;;  %4653 = vmatprep.subr.bf16.mxu1 %v9270_v7  ;;  %v9475_v7 = vld [vmem:[#allocation10 + $0xcc] ss:$16 sps:$4 sm:$0xff]  }
 0x5be   :  { %v4058_v52 = vadd.f32 0.5, %v4057_v48  ;;  %v10162_v48 = vld [vmem:[#allocation30_spill] sm:$0xff] }
 0x5c0   :  { %4613 = vmatpush1.bf16.msra.mxu0 %v9457_v12  ;;  %4654 = vmatpush1.bf16.msra.mxu1 %v9277_v24  ;;  %v9481_v24 = vld [vmem:[#allocation10 + $0xc8] ss:$16 sps:$4 sm:$0xff]  }
 0x5c1   :  { %4614 = vmatprep.subr.bf16.mxu0 %v9461_v62  ;;  %4655 = vmatprep.subr.bf16.mxu1 %v9463_v16 }
 0x5c4   :  { %4615 = vmatpush1.bf16.msra.mxu0 %v9467_v37  ;;  %4656 = vmatpush1.bf16.msra.mxu1 %v9469_v27 }
 0x5c5   :  { %4616 = vmatprep.subr.bf16.mxu0 %v9473_v13  ;;  %4657 = vmatprep.subr.bf16.mxu1 %v9475_v7 }
 0x5c6   :  { %v7816_v17 = vpop.eup %7815 }
 0x5c7   :  { %v4063_v0 = vmul.f32 %v7816_v17, %v4058_v52  ;;  %v10163_v17 = vld [vmem:[#allocation45_spill] sm:$0xff] }
 0x5c8   :  { %4617 = vmatpush1.bf16.msra.mxu0 %v9479_v51  ;;  %4658 = vmatpush1.bf16.msra.mxu1 %v9481_v24 }
 0x5c9   :  { %v4086_v55 = vmul.f32 %v9489_v63, %v4063_v0  ;;  %4618 = vmatprep.subr.bf16.mxu0 %v9485_v25  ;;  %4659 = vmatprep.subr.bf16.mxu1 %v9487_v23 }
 0x5cb   :  { %v9504_v59 = vadd.f32 %v4093_v18, %v4086_v55 }
 0x5cc   :  { %4619 = vmatpush1.bf16.msra.mxu0 %v9495_v33  ;;  %4660 = vmatpush1.bf16.msra.mxu1 %v9497_v34 }
 0x5cd   :  { %v4411_v4 = vpack.c.bf16 %v9504_v59, %v9504_v59  ;;  %4947 = vmatprep.subr.bf16.mxu0 %v9335_v53  ;;  %v9531_v53 = vld [vmem:[#allocation8 + $0x8] ss:$16 sps:$4 sm:$0xff]   ;;  %4988 = vmatprep.subr.bf16.mxu1 %v9529_v8 }
 0x5cf   :  { %4637 = vmatmul.mubr.bf16.vlgmr.msra.gmra.mrb[60].mxu0 %v4411_v4  ;;  %4678 = vmatmul.mubr.bf16.vlgmr.msra.gmra.mrb[92].mxu1 %v4411_v4  ;;  %v10164_v4 = vld [vmem:[#allocation32_spill] sm:$0xff] }
 0x5d0   :  { %4948 = vmatpush1.bf16.msra.mxu0 %v9337_v15  ;;  %4979 = vmatprep.mubr.bf16.mxu0 %v10098_v35  ;;  %v9535_v15 = vld [vmem:[#allocation8 + $0x2c] ss:$16 sps:$4 sm:$0xff]  }
 0x5d1   :  { %4949 = vmatprep.subr.bf16.mxu0 %v9341_v30  ;;  %5020 = vmatprep.mubr.bf16.mxu1 %v10098_v35  ;;  %v9537_v30 = vld [vmem:[#allocation8 + $0x28] ss:$16 sps:$4 sm:$0xff]  }
 0x5d2   :  { %4989 = vmatpush1.bf16.msra.mxu1 %v9531_v53 }
 0x5d3   :  { %4990 = vmatprep.subr.bf16.mxu1 %v9535_v15 }
 0x5d4   :  { %4950 = vmatpush1.bf16.msra.mxu0 %v9343_v28  ;;  %v9541_v28 = vld [vmem:[#allocation8 + $0x4c] ss:$16 sps:$4 sm:$0xff]  }
 0x5d5   :  { %4951 = vmatprep.subr.bf16.mxu0 %v9347_v39  ;;  %v9543_v39 = vld [vmem:[#allocation8 + $0x48] ss:$16 sps:$4 sm:$0xff]  }
 0x5d6   :  { %4991 = vmatpush1.bf16.msra.mxu1 %v9537_v30 }
 0x5d7   :  { %4992 = vmatprep.subr.bf16.mxu1 %v9541_v28 }
 0x5d8   :  { %4952 = vmatpush1.bf16.msra.mxu0 %v9349_v41  ;;  %v9547_v41 = vld [vmem:[#allocation8 + $0x6c] ss:$16 sps:$4 sm:$0xff]  }
 0x5d9   :  { %4953 = vmatprep.subr.bf16.mxu0 %v9353_v42  ;;  %v9549_v42 = vld [vmem:[#allocation8 + $0x68] ss:$16 sps:$4 sm:$0xff]  }
 0x5da   :  { %4993 = vmatpush1.bf16.msra.mxu1 %v9543_v39 }
 0x5db   :  { %4994 = vmatprep.subr.bf16.mxu1 %v9547_v41 }
 0x5dc   :  { %4954 = vmatpush1.bf16.msra.mxu0 %v9355_v43  ;;  %v9553_v43 = vld [vmem:[#allocation8 + $0x8c] ss:$16 sps:$4 sm:$0xff]  }
 0x5dd   :  { %4955 = vmatprep.subr.bf16.mxu0 %v9359_v44  ;;  %v9555_v44 = vld [vmem:[#allocation8 + $0x88] ss:$16 sps:$4 sm:$0xff]  }
 0x5de   :  { %4995 = vmatpush1.bf16.msra.mxu1 %v9549_v42 }
 0x5df   :  { %4996 = vmatprep.subr.bf16.mxu1 %v9553_v43 }
 0x5e0   :  { %4956 = vmatpush1.bf16.msra.mxu0 %v9361_v45  ;;  %v9559_v45 = vld [vmem:[#allocation8 + $0xac] ss:$16 sps:$4 sm:$0xff]  }
 0x5e1   :  { %4957 = vmatprep.subr.bf16.mxu0 %v9365_v46  ;;  %v9561_v46 = vld [vmem:[#allocation8 + $0xa8] ss:$16 sps:$4 sm:$0xff]  }
 0x5e2   :  { %4997 = vmatpush1.bf16.msra.mxu1 %v9555_v44 }
 0x5e3   :  { %4998 = vmatprep.subr.bf16.mxu1 %v9559_v45 }
 0x5e4   :  { %4958 = vmatpush1.bf16.msra.mxu0 %v9367_v47  ;;  %v9565_v47 = vld [vmem:[#allocation8 + $0xcc] ss:$16 sps:$4 sm:$0xff]  }
 0x5e5   :  { %4959 = vmatprep.subr.bf16.mxu0 %v9371_v49  ;;  %10157 = vst [vmem:[#allocation61_spill] sm:$0xff] %v9565_v47  ;;  %v9567_v49 = vld [vmem:[#allocation8 + $0xc8] ss:$16 sps:$4 sm:$0xff]  }
 0x5e6   :  { %4999 = vmatpush1.bf16.msra.mxu1 %v9561_v46  ;;  %10158 = vst [vmem:[#allocation34_spill] sm:$0xff] %v9567_v49 }
 0x5e7   :  { %5000 = vmatprep.subr.bf16.mxu1 %v9565_v47 }
 0x5e8   :  { %4960 = vmatpush1.bf16.msra.mxu0 %v9373_v50  ;;  %v9571_v50 = vld [vmem:[#allocation8 + $0xec] ss:$16 sps:$4 sm:$0xff]  }
 0x5e9   :  { %4961 = vmatprep.subr.bf16.mxu0 %v9377_v22  ;;  %10159 = vst [vmem:[#allocation62_spill] sm:$0xff] %v9571_v50  ;;  %v9573_v22 = vld [vmem:[#allocation8 + $0xe8] ss:$16 sps:$4 sm:$0xff]  }
 0x5ea   :  { %5001 = vmatpush1.bf16.msra.mxu1 %v9567_v49  ;;  %10160 = vst [vmem:[#allocation22_spill] sm:$0xff] %v9573_v22 }
 0x5eb   :  { %5002 = vmatprep.subr.bf16.mxu1 %v9571_v50 }
 0x5ec   :  { %4962 = vmatpush1.bf16.msra.mxu0 %v9379_v36  ;;  %v9577_v36 = vld [vmem:[#allocation10 + $0xc] ss:$16 sps:$4 sm:$0xff]  }
 0x5ed   :  { %5248 = vmatprep.subr.bf16.mxu0 %v9383_v11  ;;  %10161 = vst [vmem:[#allocation41_spill] sm:$0xff] %v9577_v36 }
 0x5ee   :  { %5003 = vmatpush1.bf16.msra.mxu1 %v9573_v22 }
 0x5ef   :  { %5289 = vmatprep.subr.bf16.mxu1 %v9577_v36 }
 0x682   :  { %v4337_v11 = vpop.f32.mrb[56].mxu0  ;;  %v4378_v61 = vpop.f32.mrb[88].mxu1 }
 0x683   :  { %v4385_v52 = vadd.f32 %v4337_v11, %v10162_v48  ;;  %v4387_v0 = vadd.f32 %v4378_v61, %v10163_v17  ;;  %v4339_v55 = vpop.f32.mrb[57].mxu0  ;;  %v4380_v18 = vpop.f32.mrb[89].mxu1  ;;  %v4078_v11 = vmul.f32 %v9404_v3, %v9397_v60  ;;  %v4079_v17 = vmul.f32 %v9406_v20, %v9394_v19  ;;  %v10169_v20 = vld [vmem:[#allocation55_spill] sm:$0xff] }
 0x684   :  { %v4386_v6 = vadd.f32 %v4339_v55, %v10164_v4  ;;  %v4388_v10 = vadd.f32 %v4380_v18, %v10165_v31  ;;  %v4341_v40 = vpop.f32.mrb[58].mxu0  ;;  %v4382_v14 = vpop.f32.mrb[90].mxu1 }
 0x685   :  { %v4389_v1 = vmul.f32 0.5, %v4385_v52  ;;  %v4342_v22 = vpop.f32.mrb[59].mxu0  ;;  %v4383_v50 = vpop.f32.mrb[91].mxu1 }
 0x686   :  { %v4393_v49 = vmul.f32 0.5, %v4386_v6  ;;  %v4398_v36 = vmul.f32 0.5, %v4388_v10  ;;  %v9588_v22 = vadd.f32 %v4079_v17, %v4078_v11  ;;  %v10170_v11 = vld [vmem:[#allocation23_spill] sm:$0xff] }
 0x687   :  { %7817 = vtanh.f32 %v4389_v1 }
 0x688   :  { %7819 = vtanh.f32 %v4393_v49  ;;  %10166 = vst [vmem:[#allocation24_spill] sm:$0xff] %v9588_v22 }
 0x689   :  { %7821 = vtanh.f32 %v4387_v0  ;;  %v10168_v0 = vld [vmem:[#allocation21_spill] sm:$0xff] }
 0x68a   :  { %7823 = vtanh.f32 %v4398_v36 }
 0x691   :  { %v7818_v47 = vpop.eup %7817 }
 0x692   :  { %v7820_v61 = vpop.eup %7819  ;;  %v4391_v48 = vmul.f32 0.5, %v7818_v47 }
 0x693   :  { %v4395_v31 = vmul.f32 0.5, %v7820_v61  ;;  %v7822_v14 = vpop.eup %7821 }
 0x694   :  { %v4392_v40 = vadd.f32 0.5, %v4391_v48  ;;  %v7824_v60 = vpop.eup %7823  ;;  %v10171_v48 = vld [vmem:[#allocation56_spill] sm:$0xff] }
 0x695   :  { %v4396_v6 = vadd.f32 0.5, %v4395_v31  ;;  %v4400_v50 = vmul.f32 0.5, %v7824_v60 }
 0x696   :  { %v4403_v1 = vmul.f32 %v7822_v14, %v4392_v40 }
 0x697   :  { %v4402_v49 = vmul.f32 %v4396_v6, %v9588_v22  ;;  %v4401_v4 = vadd.f32 0.5, %v4400_v50 }
 0x699   :  { %v9591_v10 = vadd.f32 %v4403_v1, %v4402_v49 }
 0x69b   :  { %10167 = vst [vmem:[#allocation42_spill] sm:$0xff] %v9591_v10  ;;  %7825 = vtanh.f32 %v9591_v10  ;;  %v9598_v10 = vpop.permute.xlu0 %4710 }
 0x6a2   :  { %v4638_v47 = vpop.f32.mrb[60].mxu0  ;;  %v4679_v52 = vpop.f32.mrb[92].mxu1 }
 0x6a3   :  { %v4686_v19 = vadd.f32 %v4638_v47, %v10168_v0  ;;  %v4688_v36 = vadd.f32 %v4679_v52, %v10169_v20  ;;  %v4640_v55 = vpop.f32.mrb[61].mxu0  ;;  %v4681_v18 = vpop.f32.mrb[93].mxu1  ;;  %v9607_v20 = vld [vmem:[#allocation10 + $0x8] ss:$16 sps:$4 sm:$0xff]  }
 0x6a4   :  { %v4687_v61 = vadd.f32 %v4640_v55, %v10170_v11  ;;  %v4689_v17 = vadd.f32 %v4681_v18, %v10171_v48  ;;  %v4642_v31 = vpop.f32.mrb[62].mxu0  ;;  %v4683_v40 = vpop.f32.mrb[94].mxu1  ;;  %v9611_v55 = vld [vmem:[#allocation10 + $0x2c] ss:$16 sps:$4 sm:$0xff]   ;;  %v9615_v18 = vmul.f32 %v9411_v9, %v9404_v3  ;;  %v9625_v11 = vld [vmem:[#allocation10 + $0x28] ss:$16 sps:$4 sm:$0xff]  }
 0x6a5   :  { %v7826_v14 = vpop.eup %7825  ;;  %v4690_v6 = vmul.f32 0.5, %v4686_v19  ;;  %v4643_v1 = vpop.f32.mrb[63].mxu0  ;;  %v9629_v3 = vld [vmem:[#allocation10 + $0x4c] ss:$16 sps:$4 sm:$0xff]  }
 0x6a6   :  { %v4684_v49 = vpop.f32.mrb[95].mxu1  ;;  %v4406_v60 = vmul.f32 %v7826_v14, %v4401_v4  ;;  %v4694_v22 = vmul.f32 0.5, %v4687_v61  ;;  %v9600_v47 = vpop.permute.xlu1 %4717  ;;  %v4095_v61 = vmul.f32 %v9489_v63, %v9452_v21  ;;  %v9643_v21 = vld [vmem:[#allocation10 + $0x6c] ss:$16 sps:$4 sm:$0xff]  }
 0x6a7   :  { %7827 = vtanh.f32 %v4690_v6  ;;  %v4720_v50 = vmul.f32 %v9600_v47, %v9411_v9 }
 0x6a8   :  { %v4713_v52 = vmul.f32 %v9598_v10, %v4406_v60  ;;  %7829 = vtanh.f32 %v4694_v22  ;;  %v9661_v60 = vld [vmem:[#allocation10 + $0x88] ss:$16 sps:$4 sm:$0xff]  }
 0x6a9   :  { %7831 = vtanh.f32 %v4688_v36  ;;  %v4699_v36 = vmul.f32 0.5, %v4689_v17  ;;  %v4096_v17 = vmul.f32 %v9491_v2, %v9441_v32 }
 0x6aa   :  { %v9605_v0 = vadd.f32 %v4720_v50, %v4713_v52  ;;  %v9673_v50 = vpop.permute.xlu0 %4727 }
 0x6ab   :  { %7833 = vtanh.f32 %v4699_v36  ;;  %v9645_v6 = vadd.f32 %v4096_v17, %v4095_v61  ;;  %v7665_v36 = vld [vmem:[#allocation8 + $0xe0] ss:$16 sps:$4 sm:$0xff]  }
 0x6ac   :  { %v4754_v19 = vpack.c.bf16 %v9605_v0, %v9605_v0  ;;  %v9619_v4 = vmul.f32 %v9605_v0, %v9598_v10 }
 0x6ae   :  { %4980 = vmatmul.mubr.bf16.vlgmr.msra.gmra.mrb[64].mxu0 %v4754_v19  ;;  %5021 = vmatmul.mubr.bf16.vlgmr.msra.gmra.mrb[96].mxu1 %v4754_v19  ;;  %v6047_v22 = vpack.c.bf16 %v9619_v4, %v9615_v18  ;;  %v7667_v19 = vld [vmem:[#allocation8 + $0xe4] ss:$16 sps:$4 sm:$0xff]  }
 0x6af   :  { %5249 = vmatpush1.bf16.msra.mxu0 %v9413_v58  ;;  %5290 = vmatpush1.bf16.msra.mxu1 %v9607_v20 }
 0x6b0   :  { %5250 = vmatprep.subr.bf16.mxu0 %v9417_v26  ;;  %5291 = vmatprep.subr.bf16.mxu1 %v9611_v55  ;;  %v9639_v26 = vld [vmem:[#allocation10 + $0x48] ss:$16 sps:$4 sm:$0xff]  }
 0x6b1   :  { %v7828_v9 = vpop.eup %7827  ;;  %5280 = vmatprep.mubr.bf16.mxu0 %v10098_v35  ;;  %5321 = vmatprep.mubr.bf16.mxu1 %v10098_v35 }
 0x6b2   :  { %v7830_v48 = vpop.eup %7829  ;;  %v4692_v58 = vmul.f32 0.5, %v7828_v9  ;;  %v7670_v9 = vld [vmem:[#allocation10 + $0x4] ss:$16 sps:$4 sm:$0xff]  }
 0x6b3   :  { %v4696_v31 = vmul.f32 0.5, %v7830_v48  ;;  %5251 = vmatpush1.bf16.msra.mxu0 %v9421_v29  ;;  %5292 = vmatpush1.bf16.msra.mxu1 %v9625_v11  ;;  %v7832_v14 = vpop.eup %7831  ;;  %v9650_v29 = vld [vmem:[#allocation10 + $0x68] ss:$16 sps:$4 sm:$0xff]  }
 0x6b4   :  { %v4693_v40 = vadd.f32 0.5, %v4692_v58  ;;  %5252 = vmatprep.subr.bf16.mxu0 %v9425_v57  ;;  %5293 = vmatprep.subr.bf16.mxu1 %v9629_v3  ;;  %v9654_v57 = vld [vmem:[#allocation10 + $0x8c] ss:$16 sps:$4 sm:$0xff]   ;;  %v10177_v58 = vld [vmem:[#allocation35_spill] sm:$0xff] }
 0x6b5   :  { %v4697_v1 = vadd.f32 0.5, %v4696_v31  ;;  %v10178_v31 = vld [vmem:[#allocation47_spill] sm:$0xff] }
 0x6b6   :  { %v4704_v32 = vmul.f32 %v7832_v14, %v4693_v40 }
 0x6b7   :  { %v4703_v2 = vmul.f32 %v4697_v1, %v9645_v6  ;;  %5253 = vmatpush1.bf16.msra.mxu0 %v9435_v54  ;;  %5294 = vmatpush1.bf16.msra.mxu1 %v9639_v26  ;;  %v7834_v54 = vpop.eup %7833 }
 0x6b8   :  { %5254 = vmatprep.subr.bf16.mxu0 %v9439_v5  ;;  %5295 = vmatprep.subr.bf16.mxu1 %v9643_v21  ;;  %v4701_v5 = vmul.f32 0.5, %v7834_v54  ;;  %v10180_v54 = vld [vmem:[#allocation48_spill] sm:$0xff] }
 0x6b9   :  { %v9656_v49 = vadd.f32 %v4704_v32, %v4703_v2  ;;  %v10179_v32 = vld [vmem:[#allocation36_spill] sm:$0xff] }
 0x6bb   :  { %7835 = vtanh.f32 %v9656_v49  ;;  %5255 = vmatpush1.bf16.msra.mxu0 %v9446_v38  ;;  %5296 = vmatpush1.bf16.msra.mxu1 %v9650_v29  ;;  %v4702_v38 = vadd.f32 0.5, %v4701_v5 }
 0x6bc   :  { %5256 = vmatprep.subr.bf16.mxu0 %v9450_v56  ;;  %5297 = vmatprep.subr.bf16.mxu1 %v9654_v57 }
 0x6bf   :  { %5257 = vmatpush1.bf16.msra.mxu0 %v9457_v12  ;;  %5298 = vmatpush1.bf16.msra.mxu1 %v9661_v60  ;;  %v9675_v12 = vpop.permute.xlu1 %4734 }
 0x6c0   :  { %5258 = vmatprep.subr.bf16.mxu0 %v9461_v62  ;;  %5299 = vmatprep.subr.bf16.mxu1 %v9463_v16  ;;  %v4737_v16 = vmul.f32 %v9675_v12, %v9504_v59 }
 0x6c3   :  { %5259 = vmatpush1.bf16.msra.mxu0 %v9467_v37  ;;  %5300 = vmatpush1.bf16.msra.mxu1 %v9469_v27 }
 0x6c4   :  { %5260 = vmatprep.subr.bf16.mxu0 %v9473_v13  ;;  %5301 = vmatprep.subr.bf16.mxu1 %v9475_v7  ;;  %v9693_v13 = vmul.f32 %v9504_v59, %v9489_v63  ;;  %v10175_v63 = vld [vmem:[#allocation22_spill] sm:$0xff] }
 0x6c5   :  { %v7836_v56 = vpop.eup %7835  ;;  %v7644_v59 = vld [vmem:[#allocation8] ss:$16 sps:$4 sm:$0xff]  }
 0x6c6   :  { %v4707_v52 = vmul.f32 %v7836_v56, %v4702_v38 }
 0x6c7   :  { %5261 = vmatpush1.bf16.msra.mxu0 %v9479_v51  ;;  %5302 = vmatpush1.bf16.msra.mxu1 %v9481_v24  ;;  %v10172_v24 = vld [vmem:[#allocation61_spill] sm:$0xff] }
 0x6c8   :  { %v4730_v62 = vmul.f32 %v9673_v50, %v4707_v52  ;;  %5262 = vmatprep.subr.bf16.mxu0 %v9485_v25  ;;  %5303 = vmatprep.subr.bf16.mxu1 %v9487_v23  ;;  %v10173_v25 = vld [vmem:[#allocation34_spill] sm:$0xff] }
 0x6c9   :  { %v10174_v23 = vld [vmem:[#allocation62_spill] sm:$0xff] }
 0x6ca   :  { %v9684_v37 = vadd.f32 %v4737_v16, %v4730_v62 }
 0x6cb   :  { %5263 = vmatpush1.bf16.msra.mxu0 %v9495_v33  ;;  %5304 = vmatpush1.bf16.msra.mxu1 %v9497_v34  ;;  %v10176_v33 = vld [vmem:[#allocation41_spill] sm:$0xff] }
 0x6cc   :  { %v5055_v27 = vpack.c.bf16 %v9684_v37, %v9684_v37  ;;  %5632 = vmatprep.subr.bf16.mxu1 %v9529_v8  ;;  %v9697_v7 = vmul.f32 %v9684_v37, %v9673_v50  ;;  %v7646_v34 = vld [vmem:[#allocation8 + $0x4] ss:$16 sps:$4 sm:$0xff]  }
 0x6cd   :  { %5591 = vmatprep.subr.bf16.mxu0 %v7646_v34  ;;  %v7649_v8 = vld [vmem:[#allocation8 + $0x24] ss:$16 sps:$4 sm:$0xff]  }
 0x6ce   :  { %5281 = vmatmul.mubr.bf16.vlgmr.msra.gmra.mrb[68].mxu0 %v5055_v27  ;;  %5322 = vmatmul.mubr.bf16.vlgmr.msra.gmra.mrb[100].mxu1 %v5055_v27  ;;  %v6066_v51 = vpack.c.bf16 %v9693_v13, %v9697_v7  ;;  %v10199_v13 = vld [vmem:[#allocation72_spill] sm:$0xff] }
 0x6cf   :  { %5633 = vmatpush1.bf16.msra.mxu1 %v9531_v53  ;;  %5623 = vmatprep.mubr.bf16.mxu0 %v10098_v35  ;;  %v7647_v53 = vld [vmem:[#allocation8 + $0x20] ss:$16 sps:$4 sm:$0xff]  }
 0x6d0   :  { %5634 = vmatprep.subr.bf16.mxu1 %v9535_v15  ;;  %5664 = vmatprep.mubr.bf16.mxu1 %v10098_v35  ;;  %v7652_v15 = vld [vmem:[#allocation8 + $0x44] ss:$16 sps:$4 sm:$0xff]  }
 0x6d1   :  { %5592 = vmatpush1.bf16.msra.mxu0 %v7644_v59  ;;  %v10182_v59 = vld [vmem:[#allocation24_spill] sm:$0xff] }
 0x6d2   :  { %5593 = vmatprep.subr.bf16.mxu0 %v7649_v8  ;;  %v4723_v8 = vmul.f32 %v9600_v47, %v10182_v59  ;;  %v7671_v59 = vld [vmem:[#allocation10 + $0x20] ss:$16 sps:$4 sm:$0xff]  }
 0x6d3   :  { %5635 = vmatpush1.bf16.msra.mxu1 %v9537_v30  ;;  %v7650_v30 = vld [vmem:[#allocation8 + $0x40] ss:$16 sps:$4 sm:$0xff]  }
 0x6d4   :  { %5636 = vmatprep.subr.bf16.mxu1 %v9541_v28  ;;  %v7655_v28 = vld [vmem:[#allocation8 + $0x64] ss:$16 sps:$4 sm:$0xff]  }
 0x6d5   :  { %5594 = vmatpush1.bf16.msra.mxu0 %v7647_v53 }
 0x6d6   :  { %5595 = vmatprep.subr.bf16.mxu0 %v7652_v15 }
 0x6d7   :  { %5637 = vmatpush1.bf16.msra.mxu1 %v9543_v39  ;;  %v7653_v39 = vld [vmem:[#allocation8 + $0x60] ss:$16 sps:$4 sm:$0xff]  }
 0x6d8   :  { %5638 = vmatprep.subr.bf16.mxu1 %v9547_v41  ;;  %v7658_v41 = vld [vmem:[#allocation8 + $0x84] ss:$16 sps:$4 sm:$0xff]  }
 0x6d9   :  { %5596 = vmatpush1.bf16.msra.mxu0 %v7650_v30 }
 0x6da   :  { %5597 = vmatprep.subr.bf16.mxu0 %v7655_v28 }
 0x6db   :  { %5639 = vmatpush1.bf16.msra.mxu1 %v9549_v42  ;;  %v7656_v42 = vld [vmem:[#allocation8 + $0x80] ss:$16 sps:$4 sm:$0xff]  }
 0x6dc   :  { %5640 = vmatprep.subr.bf16.mxu1 %v9553_v43  ;;  %v7661_v43 = vld [vmem:[#allocation8 + $0xa4] ss:$16 sps:$4 sm:$0xff]  }
 0x6dd   :  { %5598 = vmatpush1.bf16.msra.mxu0 %v7653_v39 }
 0x6de   :  { %5599 = vmatprep.subr.bf16.mxu0 %v7658_v41 }
 0x6df   :  { %5641 = vmatpush1.bf16.msra.mxu1 %v9555_v44  ;;  %v7659_v44 = vld [vmem:[#allocation8 + $0xa0] ss:$16 sps:$4 sm:$0xff]  }
 0x6e0   :  { %5642 = vmatprep.subr.bf16.mxu1 %v9559_v45  ;;  %v7664_v45 = vld [vmem:[#allocation8 + $0xc4] ss:$16 sps:$4 sm:$0xff]  }
 0x6e1   :  { %5600 = vmatpush1.bf16.msra.mxu0 %v7656_v42 }
 0x6e2   :  { %5601 = vmatprep.subr.bf16.mxu0 %v7661_v43 }
 0x6e3   :  { %5643 = vmatpush1.bf16.msra.mxu1 %v9561_v46  ;;  %v7662_v46 = vld [vmem:[#allocation8 + $0xc0] ss:$16 sps:$4 sm:$0xff]  }
 0x6e4   :  { %5644 = vmatprep.subr.bf16.mxu1 %v10172_v24 }
 0x6e5   :  { %5602 = vmatpush1.bf16.msra.mxu0 %v7659_v44 }
 0x6e6   :  { %5603 = vmatprep.subr.bf16.mxu0 %v7664_v45 }
 0x6e7   :  { %5645 = vmatpush1.bf16.msra.mxu1 %v10173_v25 }
 0x6e8   :  { %5646 = vmatprep.subr.bf16.mxu1 %v10174_v23  ;;  %v10181_v23 = vld [vmem:[#allocation42_spill] sm:$0xff] }
 0x6e9   :  { %5604 = vmatpush1.bf16.msra.mxu0 %v7662_v46 }
 0x6ea   :  { %5605 = vmatprep.subr.bf16.mxu0 %v7667_v19  ;;  %v10183_v19 = vld [vmem:[#allocation17_spill] sm:$0xff] }
 0x6eb   :  { %5647 = vmatpush1.bf16.msra.mxu1 %v10175_v63  ;;  %v4722_v63 = vmul.f32 %v9598_v10, %v10181_v23  ;;  %v7668_v23 = vld [vmem:[#allocation10] ss:$16 sps:$4 sm:$0xff]  }
 0x6ec   :  { %5933 = vmatprep.subr.bf16.mxu1 %v10176_v33 }
 0x6ed   :  { %5606 = vmatpush1.bf16.msra.mxu0 %v7665_v36  ;;  %v9727_v28 = vadd.f32 %v4723_v8, %v4722_v63  ;;  %v10184_v36 = vld [vmem:[#allocation53_spill] sm:$0xff] }
 0x6ee   :  { %5892 = vmatprep.subr.bf16.mxu0 %v7670_v9 }
 0x781   :  { %v4981_v61 = vpop.f32.mrb[64].mxu0  ;;  %v5022_v48 = vpop.f32.mrb[96].mxu1 }
 0x782   :  { %v5029_v17 = vadd.f32 %v4981_v61, %v10177_v58  ;;  %v5031_v40 = vadd.f32 %v5022_v48, %v10178_v31  ;;  %v4983_v14 = vpop.f32.mrb[65].mxu0  ;;  %v5024_v1 = vpop.f32.mrb[97].mxu1 }
 0x783   :  { %v5030_v2 = vadd.f32 %v4983_v14, %v10179_v32  ;;  %v5032_v5 = vadd.f32 %v5024_v1, %v10180_v54  ;;  %v4985_v38 = vpop.f32.mrb[66].mxu0  ;;  %v5026_v56 = vpop.f32.mrb[98].mxu1 }
 0x784   :  { %v5033_v52 = vmul.f32 0.5, %v5029_v17  ;;  %v4986_v62 = vpop.f32.mrb[67].mxu0  ;;  %v5027_v16 = vpop.f32.mrb[99].mxu1  ;;  %v10185_v17 = vld [vmem:[#allocation18_spill] sm:$0xff] }
 0x785   :  { %v5037_v27 = vmul.f32 0.5, %v5030_v2  ;;  %v5042_v24 = vmul.f32 0.5, %v5032_v5  ;;  %v9737_v62 = vpop.permute.xlu0 %5354  ;;  %v9739_v16 = vpop.permute.xlu1 %5361 }
 0x786   :  { %7837 = vtanh.f32 %v5033_v52 }
 0x787   :  { %7839 = vtanh.f32 %v5037_v27 }
 0x788   :  { %7841 = vtanh.f32 %v5031_v40  ;;  %v10186_v40 = vld [vmem:[#allocation54_spill] sm:$0xff] }
 0x789   :  { %7843 = vtanh.f32 %v5042_v24  ;;  %v5364_v24 = vmul.f32 %v9739_v16, %v9605_v0  ;;  %v7676_v0 = vld [vmem:[#allocation10 + $0x44] ss:$16 sps:$4 sm:$0xff]  }
 0x790   :  { %v7838_v25 = vpop.eup %7837 }
 0x791   :  { %v7840_v33 = vpop.eup %7839  ;;  %v5035_v34 = vmul.f32 0.5, %v7838_v25 }
 0x792   :  { %v5039_v53 = vmul.f32 0.5, %v7840_v33  ;;  %v7842_v30 = vpop.eup %7841  ;;  %v7673_v33 = vld [vmem:[#allocation10 + $0x24] ss:$16 sps:$4 sm:$0xff]  }
 0x793   :  { %v5036_v15 = vadd.f32 0.5, %v5035_v34  ;;  %v7844_v10 = vpop.eup %7843 }
 0x794   :  { %v5040_v39 = vadd.f32 0.5, %v5039_v53  ;;  %v5044_v44 = vmul.f32 0.5, %v7844_v10  ;;  %v4739_v53 = vmul.f32 %v9673_v50, %v9656_v49  ;;  %v7679_v49 = vld [vmem:[#allocation10 + $0x64] ss:$16 sps:$4 sm:$0xff]  }
 0x795   :  { %v5047_v41 = vmul.f32 %v7842_v30, %v5036_v15 }
 0x796   :  { %v5046_v42 = vmul.f32 %v5040_v39, %v9727_v28  ;;  %v5045_v58 = vadd.f32 0.5, %v5044_v44  ;;  %v4740_v39 = vmul.f32 %v9675_v12, %v9645_v6  ;;  %v7677_v6 = vld [vmem:[#allocation10 + $0x60] ss:$16 sps:$4 sm:$0xff]  }
 0x798   :  { %v9730_v43 = vadd.f32 %v5047_v41, %v5046_v42  ;;  %v9758_v42 = vadd.f32 %v4740_v39, %v4739_v53  ;;  %v10188_v53 = vld [vmem:[#allocation49_spill] sm:$0xff] }
 0x79a   :  { %7845 = vtanh.f32 %v9730_v43 }
 0x7a1   :  { %v5282_v45 = vpop.f32.mrb[68].mxu0  ;;  %v5323_v46 = vpop.f32.mrb[100].mxu1 }
 0x7a2   :  { %v5330_v47 = vadd.f32 %v5282_v45, %v10183_v19  ;;  %v5332_v9 = vadd.f32 %v5323_v46, %v10184_v36  ;;  %v5284_v61 = vpop.f32.mrb[69].mxu0  ;;  %v5325_v48 = vpop.f32.mrb[101].mxu1  ;;  %v7685_v45 = vld [vmem:[#allocation10 + $0xa4] ss:$16 sps:$4 sm:$0xff]   ;;  %v7688_v46 = vld [vmem:[#allocation10 + $0xac] ss:$16 sps:$4 sm:$0xff]  }
 0x7a3   :  { %v5331_v31 = vadd.f32 %v5284_v61, %v10185_v17  ;;  %v5333_v14 = vadd.f32 %v5325_v48, %v10186_v40  ;;  %v5286_v1 = vpop.f32.mrb[70].mxu0  ;;  %v5327_v32 = vpop.f32.mrb[102].mxu1  ;;  %v7691_v36 = vld [vmem:[#allocation10 + $0xc4] ss:$16 sps:$4 sm:$0xff]   ;;  %v7692_v61 = vld [vmem:[#allocation10 + $0xc8] ss:$16 sps:$4 sm:$0xff]  }
 0x7a4   :  { %v7846_v2 = vpop.eup %7845  ;;  %v5334_v54 = vmul.f32 0.5, %v5330_v47  ;;  %v5287_v5 = vpop.f32.mrb[71].mxu0  ;;  %v7698_v1 = vld [vmem:[#allocation10 + $0xe8] ss:$16 sps:$4 sm:$0xff]  }
 0x7a5   :  { %v5328_v38 = vpop.f32.mrb[103].mxu1  ;;  %v5050_v56 = vmul.f32 %v7846_v2, %v5045_v58  ;;  %v5338_v52 = vmul.f32 0.5, %v5331_v31  ;;  %v5343_v34 = vmul.f32 0.5, %v5333_v14  ;;  %v7700_v58 = vld [vmem:[#allocation10 + $0xec] ss:$16 sps:$4 sm:$0xff]   ;;  %v9769_v40 = vpop.permute.xlu0 %5371 }
 0x7a6   :  { %7847 = vtanh.f32 %v5334_v54  ;;  %v7695_v14 = vld [vmem:[#allocation10 + $0xe0] ss:$16 sps:$4 sm:$0xff]  }
 0x7a7   :  { %v5357_v27 = vmul.f32 %v9737_v62, %v5050_v56  ;;  %7849 = vtanh.f32 %v5338_v52  ;;  %v7701_v38 = vld [vmem:[%s10016_s9] sm:$0xff]   ;;  %v7703_v56 = vld [vmem:[%s10016_s9 + $0x10] sm:$0xff]   ;;  %v7704_v52 = vld [vmem:[%s10016_s9 + $0x18] sm:$0xff]  }
 0x7a8   :  { %7851 = vtanh.f32 %v5332_v9  ;;  %v7694_v9 = vld [vmem:[#allocation10 + $0xcc] ss:$16 sps:$4 sm:$0xff]  }
 0x7a9   :  { %v9744_v25 = vadd.f32 %v5364_v24, %v5357_v27  ;;  %7853 = vtanh.f32 %v5343_v34  ;;  %v7705_v27 = vld [vmem:[%s10016_s9 + $0x20] sm:$0xff]   ;;  %v7706_v24 = vld [vmem:[%s10016_s9 + $0x28] sm:$0xff]  }
 0x7ab   :  { %v5398_v63 = vpack.c.bf16 %v9744_v25, %v9744_v25 }
 0x7ad   :  { %5624 = vmatmul.mubr.bf16.vlgmr.msra.gmra.mrb[72].mxu0 %v5398_v63  ;;  %5665 = vmatmul.mubr.bf16.vlgmr.msra.gmra.mrb[104].mxu1 %v5398_v63  ;;  %v7708_v63 = vld [vmem:[%s10016_s9 + $0x38] sm:$0xff]  }
 0x7ae   :  { %5893 = vmatpush1.bf16.msra.mxu0 %v7668_v23  ;;  %5934 = vmatpush1.bf16.msra.mxu1 %v9607_v20  ;;  %v7674_v20 = vld [vmem:[#allocation10 + $0x40] ss:$16 sps:$4 sm:$0xff]  }
 0x7af   :  { %5894 = vmatprep.subr.bf16.mxu0 %v7673_v33  ;;  %5935 = vmatprep.subr.bf16.mxu1 %v9611_v55  ;;  %v7707_v23 = vld [vmem:[%s10016_s9 + $0x30] sm:$0xff]   ;;  %v9807_v33 = vld [vmem:[%s10015_s8] sm:$0xff]  }
 0x7b0   :  { %v7848_v8 = vpop.eup %7847  ;;  %5924 = vmatprep.mubr.bf16.mxu0 %v10098_v35  ;;  %5965 = vmatprep.mubr.bf16.mxu1 %v10098_v35 }
 0x7b1   :  { %v7850_v15 = vpop.eup %7849  ;;  %v5336_v30 = vmul.f32 0.5, %v7848_v8 }
 0x7b2   :  { %v5340_v41 = vmul.f32 0.5, %v7850_v15  ;;  %5895 = vmatpush1.bf16.msra.mxu0 %v7671_v59  ;;  %5936 = vmatpush1.bf16.msra.mxu1 %v9625_v11  ;;  %v7852_v50 = vpop.eup %7851  ;;  %v7682_v11 = vld [vmem:[#allocation10 + $0x84] ss:$16 sps:$4 sm:$0xff]  }
 0x7b3   :  { %v5337_v55 = vadd.f32 0.5, %v5336_v30  ;;  %5896 = vmatprep.subr.bf16.mxu0 %v7676_v0  ;;  %5937 = vmatprep.subr.bf16.mxu1 %v9629_v3  ;;  %v7680_v3 = vld [vmem:[#allocation10 + $0x80] ss:$16 sps:$4 sm:$0xff]   ;;  %v7854_v19 = vpop.eup %7853 }
 0x7b4   :  { %v5341_v35 = vadd.f32 0.5, %v5340_v41  ;;  %v5345_v47 = vmul.f32 0.5, %v7854_v19  ;;  %v10187_v0 = vld [vmem:[#allocation37_spill] sm:$0xff]  ;;  %v10189_v41 = vld [vmem:[#allocation38_spill] sm:$0xff] }
 0x7b5   :  { %v5348_v10 = vmul.f32 %v7852_v50, %v5337_v55  ;;  %v10190_v55 = vld [vmem:[#allocation50_spill] sm:$0xff] }
 0x7b6   :  { %v5347_v44 = vmul.f32 %v5341_v35, %v9758_v42  ;;  %5897 = vmatpush1.bf16.msra.mxu0 %v7674_v20  ;;  %5938 = vmatpush1.bf16.msra.mxu1 %v9639_v26  ;;  %v7683_v26 = vld [vmem:[#allocation10 + $0xa0] ss:$16 sps:$4 sm:$0xff]   ;;  %v5346_v48 = vadd.f32 0.5, %v5345_v47 }
 0x7b7   :  { %5898 = vmatprep.subr.bf16.mxu0 %v7679_v49  ;;  %5939 = vmatprep.subr.bf16.mxu1 %v9643_v21  ;;  %v7686_v21 = vld [vmem:[#allocation10 + $0xa8] ss:$16 sps:$4 sm:$0xff]  }
 0x7b8   :  { %v9763_v12 = vadd.f32 %v5348_v10, %v5347_v44 }
 0x7ba   :  { %7855 = vtanh.f32 %v9763_v12  ;;  %5899 = vmatpush1.bf16.msra.mxu0 %v7677_v6  ;;  %5940 = vmatpush1.bf16.msra.mxu1 %v9650_v29  ;;  %v7689_v29 = vld [vmem:[#allocation10 + $0xc0] ss:$16 sps:$4 sm:$0xff]  }
 0x7bb   :  { %5900 = vmatprep.subr.bf16.mxu0 %v7682_v11  ;;  %5941 = vmatprep.subr.bf16.mxu1 %v9654_v57  ;;  %v7697_v57 = vld [vmem:[#allocation10 + $0xe4] ss:$16 sps:$4 sm:$0xff]  }
 0x7be   :  { %5901 = vmatpush1.bf16.msra.mxu0 %v7680_v3  ;;  %5942 = vmatpush1.bf16.msra.mxu1 %v9661_v60  ;;  %v9771_v60 = vpop.permute.xlu1 %5378 }
 0x7bf   :  { %5902 = vmatprep.subr.bf16.mxu0 %v7685_v45  ;;  %5943 = vmatprep.subr.bf16.mxu1 %v7688_v46  ;;  %v5381_v2 = vmul.f32 %v9771_v60, %v9684_v37  ;;  %v7702_v37 = vld [vmem:[%s10016_s9 + $0x8] sm:$0xff]   ;;  %v5366_v46 = vmul.f32 %v9737_v62, %v9730_v43 }
 0x7c2   :  { %5903 = vmatpush1.bf16.msra.mxu0 %v7683_v26  ;;  %5944 = vmatpush1.bf16.msra.mxu1 %v7686_v21  ;;  %v5367_v21 = vmul.f32 %v9739_v16, %v9727_v28 }
 0x7c3   :  { %5904 = vmatprep.subr.bf16.mxu0 %v7691_v36  ;;  %5945 = vmatprep.subr.bf16.mxu1 %v7694_v9 }
 0x7c4   :  { %v7856_v17 = vpop.eup %7855 }
 0x7c5   :  { %v5351_v31 = vmul.f32 %v7856_v17, %v5346_v48 }
 0x7c6   :  { %5905 = vmatpush1.bf16.msra.mxu0 %v7689_v29  ;;  %5946 = vmatpush1.bf16.msra.mxu1 %v7692_v61  ;;  %v5368_v29 = vadd.f32 %v5367_v21, %v5366_v46  ;;  %v5384_v46 = vmul.f32 %v9771_v60, %v9758_v42 }
 0x7c7   :  { %v5374_v32 = vmul.f32 %v9769_v40, %v5351_v31  ;;  %5906 = vmatprep.subr.bf16.mxu0 %v7697_v57  ;;  %5947 = vmatprep.subr.bf16.mxu1 %v7700_v58 }
 0x7c9   :  { %v9776_v54 = vadd.f32 %v5381_v2, %v5374_v32  ;;  %v10191_v2 = vld [vmem:[#allocation15_spill] sm:$0xff] }
 0x7ca   :  { %5907 = vmatpush1.bf16.msra.mxu0 %v7695_v14  ;;  %5948 = vmatpush1.bf16.msra.mxu1 %v7698_v1  ;;  %v6013_v14 = vpop.permute.xlu0 %6012  ;;  %v6020_v1 = vpop.permute.xlu1 %6019 }
 0x7cb   :  { %v5699_v5 = vpack.c.bf16 %v9776_v54, %v9776_v54  ;;  %7192 = vmatprep.subr.bf16.mxu0 %v7701_v38  ;;  %v5389_v42 = vmul.f32 %v9776_v54, %v9769_v40 }
 0x7cd   :  { %5925 = vmatmul.mubr.bf16.vlgmr.msra.gmra.mrb[76].mxu0 %v5699_v5  ;;  %5966 = vmatmul.mubr.bf16.vlgmr.msra.gmra.mrb[108].mxu1 %v5699_v5 }
 0x7ce   :  { %7193 = vmatpush3.bf16.msra.mxu0 %v7701_v38  ;;  %v10192_v38 = vld [vmem:[#allocation51_spill] sm:$0xff] }
 0x7cf   :  { %7194 = vmatprep.subr.bf16.mxu0 %v7702_v37 }
 0x7d2   :  { %7195 = vmatpush3.bf16.msra.mxu0 %v7702_v37 }
 0x7d3   :  { %7196 = vmatprep.subr.bf16.mxu0 %v7703_v56 }
 0x7d6   :  { %7197 = vmatpush3.bf16.msra.mxu0 %v7703_v56 }
 0x7d7   :  { %7198 = vmatprep.subr.bf16.mxu0 %v7704_v52 }
 0x7da   :  { %7199 = vmatpush3.bf16.msra.mxu0 %v7704_v52  ;;  %v10193_v52 = vld [vmem:[#allocation16_spill] sm:$0xff] }
 0x7db   :  { %7200 = vmatprep.subr.bf16.mxu0 %v7705_v27 }
 0x7de   :  { %7201 = vmatpush3.bf16.msra.mxu0 %v7705_v27 }
 0x7df   :  { %7202 = vmatprep.subr.bf16.mxu0 %v7706_v24 }
 0x7e2   :  { %7203 = vmatpush3.bf16.msra.mxu0 %v7706_v24  ;;  %v10194_v24 = vld [vmem:[#allocation52_spill] sm:$0xff] }
 0x7e3   :  { %7204 = vmatprep.subr.bf16.mxu0 %v7707_v23 }
 0x7e6   :  { %7205 = vmatpush3.bf16.msra.mxu0 %v7707_v23 }
 0x7e7   :  { %7206 = vmatprep.subr.bf16.mxu0 %v7708_v63 }
 0x7ea   :  { %7207 = vmatpush3.bf16.msra.mxu0 %v7708_v63 }
 0x7eb   :  { %7216 = vmatprep.subr.bf16.mxu0 %v9807_v33 }
 0x880   :  { %v5625_v34 = vpop.f32.mrb[72].mxu0  ;;  %v5666_v59 = vpop.f32.mrb[104].mxu1 }
 0x881   :  { %v5673_v8 = vadd.f32 %v5625_v34, %v10187_v0  ;;  %v5675_v15 = vadd.f32 %v5666_v59, %v10188_v53  ;;  %v5627_v30 = vpop.f32.mrb[73].mxu0  ;;  %v5668_v39 = vpop.f32.mrb[105].mxu1 }
 0x882   :  { %v5674_v20 = vadd.f32 %v5627_v30, %v10189_v41  ;;  %v5676_v49 = vadd.f32 %v5668_v39, %v10190_v55  ;;  %v5629_v50 = vpop.f32.mrb[74].mxu0  ;;  %v5670_v35 = vpop.f32.mrb[106].mxu1 }
 0x883   :  { %v5677_v10 = vmul.f32 0.5, %v5673_v8  ;;  %v5630_v44 = vpop.f32.mrb[75].mxu0  ;;  %v5671_v6 = vpop.f32.mrb[107].mxu1  ;;  %v5386_v50 = vmul.f32 %v9744_v25, %v9737_v62 }
 0x884   :  { %v5681_v11 = vmul.f32 0.5, %v5674_v20  ;;  %v5686_v3 = vmul.f32 0.5, %v5676_v49  ;;  %v5999_v39 = vpop.permute.xlu0 %5998  ;;  %v6006_v41 = vpop.permute.xlu1 %6005 }
 0x885   :  { %7857 = vtanh.f32 %v5677_v10  ;;  %v6008_v55 = vmul.f32 %v6006_v41, %v9744_v25 }
 0x886   :  { %7859 = vtanh.f32 %v5681_v11  ;;  %v5383_v11 = vmul.f32 %v9769_v40, %v9763_v12  ;;  %v7711_v40 = vld [vmem:[%s10015_s8 + $0x10] sm:$0xff]  }
 0x887   :  { %7861 = vtanh.f32 %v5675_v15 }
 0x888   :  { %7863 = vtanh.f32 %v5686_v3 }
 0x88f   :  { %v7858_v45 = vpop.eup %7857 }
 0x890   :  { %v7860_v19 = vpop.eup %7859  ;;  %v5679_v26 = vmul.f32 0.5, %v7858_v45 }
 0x891   :  { %v5683_v47 = vmul.f32 0.5, %v7860_v19  ;;  %v7862_v9 = vpop.eup %7861 }
 0x892   :  { %v5680_v36 = vadd.f32 0.5, %v5679_v26  ;;  %v7864_v17 = vpop.eup %7863 }
 0x893   :  { %v5684_v61 = vadd.f32 0.5, %v5683_v47  ;;  %v5688_v31 = vmul.f32 0.5, %v7864_v17  ;;  %v5385_v47 = vadd.f32 %v5384_v46, %v5383_v11  ;;  %v6022_v17 = vmul.f32 %v6020_v1, %v9776_v54  ;;  %v7712_v54 = vld [vmem:[%s10015_s8 + $0x18] sm:$0xff]  }
 0x894   :  { %v5691_v48 = vmul.f32 %v7862_v9, %v5680_v36 }
 0x895   :  { %v5690_v57 = vmul.f32 %v5684_v61, %v5368_v29  ;;  %v5689_v56 = vadd.f32 0.5, %v5688_v31 }
 0x897   :  { %v5692_v58 = vadd.f32 %v5691_v48, %v5690_v57 }
 0x899   :  { %7865 = vtanh.f32 %v5692_v58 }
 0x8a0   :  { %v5926_v43 = vpop.f32.mrb[76].mxu0  ;;  %v5967_v32 = vpop.f32.mrb[108].mxu1 }
 0x8a1   :  { %v5974_v5 = vadd.f32 %v5926_v43, %v10191_v2  ;;  %v5976_v28 = vadd.f32 %v5967_v32, %v10192_v38  ;;  %v5928_v16 = vpop.f32.mrb[77].mxu0  ;;  %v5969_v37 = vpop.f32.mrb[109].mxu1  ;;  %v7710_v32 = vld [vmem:[%s10015_s8 + $0x8] sm:$0xff]  }
 0x8a2   :  { %v5975_v27 = vadd.f32 %v5928_v16, %v10193_v52  ;;  %v5977_v23 = vadd.f32 %v5969_v37, %v10194_v24  ;;  %v5930_v63 = vpop.f32.mrb[78].mxu0  ;;  %v5971_v34 = vpop.f32.mrb[110].mxu1  ;;  %v10195_v2 = vld [vmem:[#allocation40_spill] sm:$0xff] }
 0x8a3   :  { %v7866_v59 = vpop.eup %7865  ;;  %v5978_v0 = vmul.f32 0.5, %v5974_v5  ;;  %v5931_v8 = vpop.f32.mrb[79].mxu0  ;;  %v10196_v5 = vld [vmem:[#allocation33_spill] sm:$0xff]  ;;  %v7714_v16 = vld [vmem:[%s10015_s8 + $0x28] sm:$0xff]  }
 0x8a4   :  { %v5972_v53 = vpop.f32.mrb[111].mxu1  ;;  %v5694_v15 = vmul.f32 %v7866_v59, %v5689_v56  ;;  %v5982_v30 = vmul.f32 0.5, %v5975_v27  ;;  %v5987_v44 = vmul.f32 0.5, %v5977_v23  ;;  %v10197_v1 = vpack.c.bf16 %v10195_v2, %v10196_v5  ;;  %v7715_v37 = vld [vmem:[%s10015_s8 + $0x30] sm:$0xff]   ;;  %v7716_v56 = vld [vmem:[%s10015_s8 + $0x38] sm:$0xff]   ;;  %v10205_v27 = vld [vmem:[#allocation39_spill] sm:$0xff] }
 0x8a5   :  { %7867 = vtanh.f32 %v5978_v0  ;;  %v10204_v52 = vld [vmem:[#allocation20_spill] sm:$0xff]  ;;  %v7159_v23 = vld [vmem:[%s10017_s10] ss:$0 sm:$0xff] }
 0x8a6   :  { %v6001_v20 = vmul.f32 %v5999_v39, %v5694_v15  ;;  %7869 = vtanh.f32 %v5982_v30  ;;  %v10206_v24 = vpack.c.bf16 %v10204_v52, %v10205_v27 }
 0x8a7   :  { %7871 = vtanh.f32 %v5976_v28  ;;  %v7713_v28 = vld [vmem:[%s10015_s8 + $0x20] sm:$0xff]  }
 0x8a8   :  { %v6009_v49 = vadd.f32 %v6008_v55, %v6001_v20  ;;  %7873 = vtanh.f32 %v5987_v44  ;;  %v6418_v44 = vpop.permute.xlu1 %6417 }
 0x8aa   :  { %v6024_v35 = vmul.f32 %v6009_v49, %v5999_v39 }
 0x8ac   :  { %v6048_v10 = vpack.c.bf16 %v6024_v35, %v5386_v50  ;;  %v6413_v50 = vld [vmem:[%s10010_s3 + $0x28] sm:$0xff]  ;;  %v6415_v35 = vld [vmem:[%s10010_s3 + $0x38] sm:$0xff]  ;;  %v6424_v11 = vpop.permute.xlu1 %6423 }
 0x8af   :  { %v7868_v6 = vpop.eup %7867 }
 0x8b0   :  { %v7870_v3 = vpop.eup %7869  ;;  %v5980_v45 = vmul.f32 0.5, %v7868_v6  ;;  %v6421_v6 = vpop.permute.xlu0 %6420 }
 0x8b1   :  { %v5984_v19 = vmul.f32 0.5, %v7870_v3  ;;  %v7872_v21 = vpop.eup %7871 }
 0x8b2   :  { %v5981_v26 = vadd.f32 0.5, %v5980_v45  ;;  %v7874_v29 = vpop.eup %7873  ;;  %v9910_v45 = vpop.permute.xlu1 %6426 }
 0x8b3   :  { %v5985_v36 = vadd.f32 0.5, %v5984_v19  ;;  %v5989_v61 = vmul.f32 0.5, %v7874_v29 }
 0x8b4   :  { %v5992_v9 = vmul.f32 %v7872_v21, %v5981_v26  ;;  %v9908_v3 = vpop.permute.xlu0 %6429 }
 0x8b5   :  { %v5991_v62 = vmul.f32 %v5985_v36, %v5385_v47  ;;  %v5990_v48 = vadd.f32 0.5, %v5989_v61 }
 0x8b7   :  { %v5993_v25 = vadd.f32 %v5992_v9, %v5991_v62 }
 0x8b9   :  { %7875 = vtanh.f32 %v5993_v25 }
 0x8c3   :  { %v7876_v57 = vpop.eup %7875 }
 0x8c4   :  { %v5995_v12 = vmul.f32 %v7876_v57, %v5990_v48 }
 0x8c6   :  { %v6015_v58 = vmul.f32 %v6013_v14, %v5995_v12 }
 0x8c8   :  { %v6023_v31 = vadd.f32 %v6022_v17, %v6015_v58 }
 0x8ca   :  { %v6027_v60 = vmul.f32 %v6023_v31, %v6013_v14  ;;  %v10198_v14 = vld [vmem:[#allocation71_spill] sm:$0xff] }
 0x8cb   :  { %v10200_v7 = vpack.c.bf16 %v10198_v14, %v10199_v13 }
 0x8cc   :  { %v6065_v43 = vpack.c.bf16 %v5389_v42, %v6027_v60 }
 0x8ce   :  { %7208 = vmatprep.mubr.bf16.mxu0 %v6065_v43 }
 0x8cf   :  { %7209 = vmatmul.mubr.bf16.vlgmr.msra.gmra.mrb[80].mxu0 %v6066_v51  ;;  %v10201_v51 = vld [vmem:[#allocation70_spill] sm:$0xff] }
 0x8d0   :  { %7217 = vmatpush3.bf16.msra.mxu0 %v9807_v33  ;;  %7212 = vmatprep.mubr.bf16.mxu0 %v10197_v1  ;;  %v10202_v33 = vld [vmem:[#allocation69_spill] sm:$0xff] }
 0x8d1   :  { %7218 = vmatprep.subr.bf16.mxu0 %v7710_v32  ;;  %v10203_v38 = vpack.c.bf16 %v10201_v51, %v10202_v33  ;;  %v10207_v51 = vlaneseq }
 0x8d3   :  { %v6407_v33 = vand.u32 127, %v10207_v51 }
 0x8d4   :  { %7219 = vmatpush3.bf16.msra.mxu0 %v7710_v32 }
 0x8d5   :  { %7220 = vmatprep.subr.bf16.mxu0 %v7711_v40  ;;  %vm6440_vm0 = vcmp.eq.s32.totalorder %v6407_v33, %v6418_v44  ;;  %vm6441_vm1 = vcmp.eq.s32.totalorder %v6407_v33, %v6421_v6  ;;  %vm6442_vm2 = vcmp.eq.s32.totalorder %v6407_v33, %v6424_v11  ;;  %vm6444_vm3 = vcmp.eq.s32.totalorder %v6407_v33, %v9908_v3 }
 0x8d6   :  { %vm6443_vm4 = vcmp.eq.s32.totalorder %v6407_v33, %v9910_v45 }
 0x8d7   :  { %7213 = vmatmul.mubr.bf16.gmra.mrb[84].mxu0 %v10200_v7 }
 0x8d8   :  { %7221 = vmatpush3.bf16.msra.mxu0 %v7711_v40  ;;  %7232 = vmatprep.mubr.bf16.mxu0 %v10203_v38 }
 0x8d9   :  { %7222 = vmatprep.subr.bf16.mxu0 %v7712_v54 }
 0x8dc   :  { %7223 = vmatpush3.bf16.msra.mxu0 %v7712_v54 }
 0x8dd   :  { %7224 = vmatprep.subr.bf16.mxu0 %v7713_v28 }
 0x8e0   :  { %7225 = vmatpush3.bf16.msra.mxu0 %v7713_v28 }
 0x8e1   :  { %7226 = vmatprep.subr.bf16.mxu0 %v7714_v16 }
 0x8e4   :  { %7227 = vmatpush3.bf16.msra.mxu0 %v7714_v16  ;;  %v8011_v16 = vmov 0.0  }
 0x8e5   :  { %7228 = vmatprep.subr.bf16.mxu0 %v7715_v37 }
 0x8e8   :  { %7229 = vmatpush3.bf16.msra.mxu0 %v7715_v37  ;;  %v7160_v37 = vsel %vm6440_vm0, 1.0, %v8011_v16 }
 0x8e9   :  { %7230 = vmatprep.subr.bf16.mxu0 %v7716_v56 }
 0x8ec   :  { %7231 = vmatpush3.bf16.msra.mxu0 %v7716_v56 }
 0x8ef   :  { %7233 = vmatmul.mubr.bf16.vlgmr.msra.gmra.mrb[80].mxu0 %v10206_v24  ;;  %v7161_v24 = vsel %vm6441_vm1, 1.0, %v8011_v16 }
 0x8f0   :  { %7236 = vmatprep.mubr.bf16.mxu0 %v6047_v22 }
 0x8f7   :  { %7237 = vmatmul.mubr.bf16.gmra.mrb[84].mxu0 %v6048_v10  ;;  %v6414_v10 = vld [vmem:[%s10010_s3 + $0x30] sm:$0xff] }
 0x9c2   :  { %v7234_v63 = vpop.f32.mrb[80].mxu0 }
 0x9c3   :  { %v9875_v34 = vadd.f32 %v7234_v63, %v7159_v23  ;;  %v6280_v59 = vpop.f32.mrb[81].mxu0 }
 0x9c4   :  { %v7235_v0 = vpop.f32.mrb[82].mxu0  ;;  %v9880_v15 = vadd.f32 %v7159_v23, %v6280_v59 }
 0x9c5   :  { %6330 = vmax.xlane.f32.xlu0 %v9875_v34  ;;  %v6283_v8 = vpop.f32.mrb[83].mxu0  ;;  %v9884_v4 = vadd.f32 %v7235_v0, %v7159_v23 }
 0x9c6   :  { %v9878_v53 = vadd.f32 %v7159_v23, %v6283_v8  ;;  %v6464_v56 = vmul.f32 %v7160_v37, %v9880_v15  ;;  %v7164_v8 = vsel %vm6444_vm3, 1.0, %v8011_v16 }
 0x9c8   :  { %6328 = vmax.xlane.f32.xlu1 %v9878_v53  ;;  %v6465_v0 = vmul.f32 %v7161_v24, %v9878_v53  ;;  %v6500_v24 = vld [vmem:[%s10009_s2 + $0x20] sm:$0xff] }
 0x9c9   :  { %6326 = vmax.xlane.f32.xlu0 %v9880_v15 }
 0x9ca   :  { %v7238_v18 = vpop.f32.mrb[84].mxu0 }
 0x9cb   :  { %v9886_v22 = vadd.f32 %v7238_v18, %v7159_v23  ;;  %v6296_v30 = vpop.f32.mrb[85].mxu0 }
 0x9cc   :  { %v7239_v39 = vpop.f32.mrb[86].mxu0  ;;  %v9890_v20 = vadd.f32 %v7159_v23, %v6296_v30 }
 0x9cd   :  { %6332 = vmax.xlane.f32.xlu0 %v9884_v4  ;;  %6338 = vmax.xlane.f32.xlu1 %v9886_v22  ;;  %v6299_v41 = vpop.f32.mrb[87].mxu0  ;;  %v9892_v55 = vadd.f32 %v7239_v39, %v7159_v23 }
 0x9ce   :  { %v9896_v49 = vadd.f32 %v7159_v23, %v6299_v41  ;;  %v7162_v23 = vsel %vm6442_vm2, 1.0, %v8011_v16  ;;  %v6468_v30 = vmul.f32 %v7164_v8, %v9890_v20 }
 0x9cf   :  { %v6466_v59 = vmul.f32 %v7162_v23, %v9875_v34 }
 0x9d1   :  { %6334 = vmax.xlane.f32.xlu1 %v9890_v20  ;;  %6340 = vmax.xlane.f32.xlu0 %v9892_v55 }
 0x9d5   :  { %6336 = vmax.xlane.f32.xlu0 %v9896_v49 }
 0x9e2   :  { %6432 = vperm.xlu1 %7259, %v6413_v50  }
 0x9e6   :  { %6438 = vperm.xlu1 %7259, %v6415_v35  }
 0x9eb   :  { %6435 = vperm.xlu0 %7258, %v6414_v10  }
 0xa52   :  { %v9912_v46 = vpop.xlane.xlu0 %6330 }
 0xa53   :  { %v6344_v47 = vsub.f32 %v9875_v34, %v9912_v46 }
 0xa55   :  { %v9914_v19 = vpop.xlane.xlu1 %6328  ;;  %v6354_v61 = vmul.f32 1.442695, %v6344_v47 }
 0xa56   :  { %v6343_v26 = vsub.f32 %v9878_v53, %v9914_v19  ;;  %v9918_v21 = vpop.xlane.xlu0 %6326 }
 0xa57   :  { %v6342_v36 = vsub.f32 %v9880_v15, %v9918_v21  ;;  %v7163_v15 = vsel %vm6443_vm4, 1.0, %v8011_v16 }
 0xa58   :  { %v6352_v9 = vmul.f32 1.442695, %v6343_v26  ;;  %v6467_v39 = vmul.f32 %v7163_v15, %v9884_v4 }
 0xa59   :  { %v6350_v62 = vmul.f32 1.442695, %v6342_v36 }
 0xa5a   :  { %7877 = vpow2.f32 %v6352_v9  ;;  %v9924_v25 = vpop.xlane.xlu0 %6332  ;;  %v9926_v29 = vpop.xlane.xlu1 %6338 }
 0xa5b   :  { %7879 = vpow2.f32 %v6350_v62  ;;  %v6345_v48 = vsub.f32 %v9884_v4, %v9924_v25  ;;  %v6348_v12 = vsub.f32 %v9886_v22, %v9926_v29 }
 0xa5c   :  { %7881 = vpow2.f32 %v6354_v61 }
 0xa5d   :  { %v6356_v57 = vmul.f32 1.442695, %v6345_v48  ;;  %v6362_v60 = vmul.f32 1.442695, %v6348_v12 }
 0xa5e   :  { %v9932_v58 = vpop.xlane.xlu1 %6334  ;;  %v9934_v17 = vpop.xlane.xlu0 %6340 }
 0xa5f   :  { %v6346_v31 = vsub.f32 %v9890_v20, %v9932_v58  ;;  %7883 = vpow2.f32 %v6356_v57  ;;  %v6349_v32 = vsub.f32 %v9892_v55, %v9934_v17  ;;  %v6496_v57 = vld [vmem:[%s10009_s2] sm:$0xff] }
 0xa61   :  { %v6358_v42 = vmul.f32 1.442695, %v6346_v31  ;;  %v6364_v54 = vmul.f32 1.442695, %v6349_v32 }
 0xa62   :  { %v9938_v43 = vpop.xlane.xlu0 %6336  ;;  %v6433_v27 = vpop.permute.xlu1 %6432 }
 0xa63   :  { %7885 = vpow2.f32 %v6358_v42  ;;  %v6347_v2 = vsub.f32 %v9896_v49, %v9938_v43  ;;  %vm6445_vm5 = vcmp.eq.s32.totalorder %v6407_v33, %v6433_v27 }
 0xa64   :  { %v7878_v5 = vpop.eup %7877  ;;  %7887 = vpow2.f32 %v6362_v60  ;;  %v7165_v41 = vsel %vm6445_vm5, 1.0, %v8011_v16 }
 0xa65   :  { %v7880_v1 = vpop.eup %7879  ;;  %v6360_v40 = vmul.f32 1.442695, %v6347_v2  ;;  %6368 = vadd.xlane.f32.xlu1 %v7878_v5  ;;  %v6469_v53 = vmul.f32 %v7165_v41, %v9896_v49  ;;  %v6497_v5 = vld [vmem:[%s10009_s2 + $0x8] sm:$0xff] }
 0xa66   :  { %6366 = vadd.xlane.f32.xlu0 %v7880_v1  ;;  %v7882_v14 = vpop.eup %7881  ;;  %v6439_v18 = vpop.permute.xlu1 %6438 }
 0xa67   :  { %7889 = vpow2.f32 %v6360_v40  ;;  %vm6447_vm7 = vcmp.eq.s32.totalorder %v6407_v33, %v6439_v18 }
 0xa68   :  { %7891 = vpow2.f32 %v6364_v54  ;;  %v7167_v35 = vsel %vm6447_vm7, 1.0, %v8011_v16 }
 0xa69   :  { %v7884_v13 = vpop.eup %7883  ;;  %v6471_v10 = vmul.f32 %v7167_v35, %v9892_v55  ;;  %v6502_v35 = vld [vmem:[%s10009_s2 + $0x30] sm:$0xff] }
 0xa6a   :  { %6370 = vadd.xlane.f32.xlu0 %v7882_v14  ;;  %v6436_v63 = vpop.permute.xlu0 %6435 }
 0xa6b   :  { %vm6446_vm6 = vcmp.eq.s32.totalorder %v6407_v33, %v6436_v63 }
 0xa6c   :  { %v7166_v50 = vsel %vm6446_vm6, 1.0, %v8011_v16 }
 0xa6d   :  { %v7886_v7 = vpop.eup %7885  ;;  %v6470_v34 = vmul.f32 %v7166_v50, %v9886_v22 }
 0xa6e   :  { %6374 = vadd.xlane.f32.xlu1 %v7886_v7  ;;  %6372 = vadd.xlane.f32.xlu0 %v7884_v13  ;;  %v7888_v38 = vpop.eup %7887 }
 0xa71   :  { %v7890_v28 = vpop.eup %7889 }
 0xa72   :  { %6378 = vadd.xlane.f32.xlu1 %v7888_v38  ;;  %6376 = vadd.xlane.f32.xlu0 %v7890_v28  ;;  %v7892_v52 = vpop.eup %7891 }
 0xa76   :  { %6472 = vadd.xlane.f32.xlu1 %v6464_v56  ;;  %6380 = vadd.xlane.f32.xlu0 %v7892_v52 }
 0xa7a   :  { %6476 = vadd.xlane.f32.xlu1 %v6466_v59  ;;  %6474 = vadd.xlane.f32.xlu0 %v6465_v0 }
 0xa7e   :  { %6480 = vadd.xlane.f32.xlu1 %v6468_v30  ;;  %6478 = vadd.xlane.f32.xlu0 %v6467_v39 }
 0xa82   :  { %6484 = vadd.xlane.f32.xlu1 %v6470_v34  ;;  %6482 = vadd.xlane.f32.xlu0 %v6469_v53  ;;  %v6501_v34 = vld [vmem:[%s10009_s2 + $0x28] sm:$0xff] }
 0xa86   :  { %6486 = vadd.xlane.f32.xlu0 %v6471_v10 }
 0xaf2   :  { %v6369_v44 = vpop.xlane.xlu1 %6368 }
 0xaf3   :  { %v6367_v6 = vpop.xlane.xlu0 %6366 }
 0xaf4   :  { %7893 = vlog2.f32 %v6367_v6 }
 0xaf5   :  { %7895 = vlog2.f32 %v6369_v44 }
 0xaf7   :  { %v6371_v4 = vpop.xlane.xlu0 %6370 }
 0xaf8   :  { %7897 = vlog2.f32 %v6371_v4 }
 0xafb   :  { %v6375_v20 = vpop.xlane.xlu1 %6374  ;;  %v6373_v11 = vpop.xlane.xlu0 %6372 }
 0xafc   :  { %7899 = vlog2.f32 %v6375_v20 }
 0xafd   :  { %7901 = vlog2.f32 %v6373_v11 }
 0xafe   :  { %v7894_v3 = vpop.eup %7893 }
 0xaff   :  { %v7896_v22 = vpop.eup %7895  ;;  %v6383_v45 = vmul.f32 0.6931472, %v7894_v3  ;;  %v6379_v49 = vpop.xlane.xlu1 %6378  ;;  %v6503_v3 = vld [vmem:[%s10009_s2 + $0x38] sm:$0xff] }
 0xb00   :  { %v6377_v26 = vpop.xlane.xlu0 %6376  ;;  %7903 = vlog2.f32 %v6379_v49  ;;  %v6385_v36 = vmul.f32 0.6931472, %v7896_v22 }
 0xb01   :  { %7905 = vlog2.f32 %v6377_v26  ;;  %v6398_v55 = vadd.f32 %v6383_v45, %v9918_v21  ;;  %v6498_v21 = vld [vmem:[%s10009_s2 + $0x10] sm:$0xff] }
 0xb02   :  { %v7898_v47 = vpop.eup %7897  ;;  %v6399_v42 = vadd.f32 %v6385_v36, %v9914_v19 }
 0xb03   :  { %v6387_v9 = vmul.f32 0.6931472, %v7898_v47  ;;  %v6473_v62 = vpop.xlane.xlu1 %6472 }
 0xb04   :  { %v6381_v61 = vpop.xlane.xlu0 %6380  ;;  %v6488_v48 = vsub.f32 %v6398_v55, %v6473_v62 }
 0xb05   :  { %7907 = vlog2.f32 %v6381_v61  ;;  %v6400_v12 = vadd.f32 %v6387_v9, %v9912_v46 }
 0xb06   :  { %v7900_v31 = vpop.eup %7899  ;;  %v6504_v54 = vmul.f32 %v6496_v57, %v6488_v48 }
 0xb07   :  { %v7902_v60 = vpop.eup %7901  ;;  %v6391_v32 = vmul.f32 0.6931472, %v7900_v31  ;;  %v6477_v2 = vpop.xlane.xlu1 %6476 }
 0xb08   :  { %v6475_v1 = vpop.xlane.xlu0 %6474  ;;  %v6389_v40 = vmul.f32 0.6931472, %v7902_v60  ;;  %v6490_v14 = vsub.f32 %v6400_v12, %v6477_v2  ;;  %v6513_v52 = vsel %vm6512_vm8, %v6504_v54, 0.0 }
 0xb09   :  { %v6489_v13 = vsub.f32 %v6399_v42, %v6475_v1  ;;  %v6402_v46 = vadd.f32 %v6391_v32, %v9932_v58  ;;  %v6499_v58 = vld [vmem:[%s10009_s2 + $0x18] sm:$0xff]  ;;  %s6543_s2 = sshll.u32 %s8012_s19, 4  ;;  %s6544_s2 = int_to_ptr.vmem [resolvable:$true] %s6543_s2 }
 0xb0a   :  { %v7904_v19 = vpop.eup %7903  ;;  %v6506_v7 = vmul.f32 %v6498_v21, %v6490_v14  ;;  %v6401_v33 = vadd.f32 %v6389_v40, %v9924_v25  ;;  %s7975_s4 = scalar_lea.vmem %s6544_s2, 16  ;;  %s7979_s13 = scalar_lea.vmem %s6544_s2, 32 }
 0xb0b   :  { %v6505_v51 = vmul.f32 %v6497_v5, %v6489_v13  ;;  %v7906_v38 = vpop.eup %7905  ;;  %v6395_v28 = vmul.f32 0.6931472, %v7904_v19  ;;  %v6481_v16 = vpop.xlane.xlu1 %6480  ;;  %p7976_p10 = scmp.ne.s32.totalorder %s6544_s2, %s7975_s4  ;;  %p7980_p11 = scmp.lt.s32.totalorder %s6544_s2, %s6544_s2 }
 0xb0c   :  { %v6479_v37 = vpop.xlane.xlu0 %6478  ;;  %v6393_v56 = vmul.f32 0.6931472, %v7906_v38  ;;  %v6492_v23 = vsub.f32 %v6402_v46, %v6481_v16  ;;  %v6516_v8 = vsel %vm6512_vm8, %v6506_v7, 0.0  ;;  %p7981_p12 = scmp.lt.s32.totalorder %s7979_s13, %s7975_s4 }
 0xb0d   :  { %v6514_v27 = vsel %vm6512_vm8, %v6505_v51, 0.0  ;;  %v6491_v25 = vsub.f32 %v6401_v33, %v6479_v37  ;;  %v6404_v59 = vadd.f32 %v6395_v28, %v9926_v29 }
 0xb0e   :  { %v6515_v63 = vadd.f32 %v6514_v27, %v6513_v52  ;;  %v6403_v15 = vadd.f32 %v6393_v56, %v9938_v43  ;;  %v6508_v30 = vmul.f32 %v6500_v24, %v6492_v23  ;;  %p7982_p13 = por %p7981_p12, %p7980_p11 }
 0xb0f   :  { %v7908_v0 = vpop.eup %7907  ;;  %v6507_v41 = vmul.f32 %v6499_v58, %v6491_v25  ;;  %v6485_v50 = vpop.xlane.xlu1 %6484 }
 0xb10   :  { %v6397_v18 = vmul.f32 0.6931472, %v7908_v0  ;;  %v6517_v39 = vadd.f32 %v6516_v8, %v6515_v63  ;;  %v6483_v53 = vpop.xlane.xlu0 %6482  ;;  %v6494_v29 = vsub.f32 %v6404_v59, %v6485_v50  ;;  %v6520_v20 = vsel %vm6512_vm8, %v6508_v30, 0.0  ;;  %p7983_p0 = pnand %p7982_p13, %p7976_p10 }
 0xb11   :  { %v6493_v10 = vsub.f32 %v6403_v15, %v6483_v53  ;;  %v6518_v44 = vsel %vm6512_vm8, %v6507_v41, 0.0 }
 0xb12   :  { %v6405_v43 = vadd.f32 %v6397_v18, %v9934_v17  ;;  %v6519_v6 = vadd.f32 %v6518_v44, %v6517_v39  ;;  %v6510_v11 = vmul.f32 %v6502_v35, %v6494_v29 }
 0xb13   :  { %v6509_v4 = vmul.f32 %v6501_v34, %v6493_v10 }
 0xb14   :  { %v6487_v22 = vpop.xlane.xlu0 %6486  ;;  %v6521_v45 = vadd.f32 %v6520_v20, %v6519_v6  ;;  %v6524_v36 = vsel %vm6512_vm8, %v6510_v11, 0.0 }
 0xb15   :  { %v6522_v49 = vsel %vm6512_vm8, %v6509_v4, 0.0  ;;  %v6495_v26 = vsub.f32 %v6405_v43, %v6487_v22 }
 0xb16   :  { %v6523_v55 = vadd.f32 %v6522_v49, %v6521_v45 }
 0xb17   :  { %v6511_v47 = vmul.f32 %v6503_v3, %v6495_v26 }
 0xb18   :  { %v6525_v9 = vadd.f32 %v6524_v36, %v6523_v55 }
 0xb19   :  { %v6526_v17 = vsel %vm6512_vm8, %v6511_v47, 0.0 }
 0xb1a   :  { %v6527_v62 = vadd.f32 %v6526_v17, %v6525_v9 }
 0xb1c   :  { %v6528_v61 = vrot.slane %v6527_v62, 4 }
 0xb1e   :  { %v6529_v48 = vadd.f32 %v6528_v61, %v6527_v62 }
 0xb20   :  { %v6530_v57 = vrot.slane %v6529_v48, 2 }
 0xb22   :  { %v6531_v12 = vadd.f32 %v6530_v57, %v6529_v48 }
 0xb24   :  { %v6532_v31 = vrot.slane %v6531_v12, 1 }
 0xb26   :  { %v6533_v42 = vadd.f32 %v6532_v31, %v6531_v12 }
 0xb28   :  { %v6534_v60 = vmul.f32 0.0625, %v6533_v42 }
 0xb2a   :  { %6536 = vst.msk [vmem:[#allocation11] sm:$0x1] %vm6535_vm9, %v6534_v60 }
 0xb2b   :  { %7986 = shalt.err (!%p7983_p0)
}
 0xb2c   :  { %s7987_s28 = scalar_lea.hbm %s10018_s11, 16 }
 0xb2d   :  { %p7988_p1 = scmp.ne.s32.totalorder %s10018_s11, %s7987_s28  ;;  %p7991_p2 = scmp.lt.u32.totalorder %s7987_s28, %s10018_s11 }
 0xb2f   :  { %p7993_p3 = pnand %p7991_p2, %p7988_p1 }
 0xb31   :  { %7996 = shalt.err (!%p7993_p3)
}
 0xb32   :  { %6546 = dma.vmem_to_hbm [thread:$0]  %s6544_s2, 16, %s10018_s11, [#allocation7]  }
 0xb33   :  { %8001 = dma.done.wait [#allocation7], 16  }
 0xb34   :  { %8002 = vsyncadd [#allocation7], 4294967280 }
 0xb35   :  { %6550 = vsyncpa [#allocation6], 1 }
 0xb36   :  { %6551 = vsyncpa [#allocation9], 1 }
 0xb37   :  { %6552 = vsyncpa [#allocation7], 1 }

</bundles_post_ra>
